<compile_context>
chip_gen: v7x
topology: tpu7x:2x2x1
jax: 0.10.0
libtpu: 0.0.40
codegen_flags: <defaults>
</compile_context>

<pallas_src>
import jax
import jax.numpy as jnp
from jax import lax
from jax.experimental import pallas as pl
from jax.experimental.pallas import tpu as pltpu

EPS = 1e-5  # PyTorch BatchNorm2d default


def _conv3x3_bn_in_kernel(scale_ref, shift_ref, w_ref, b_ref, x_ref,
                          out_ref, stats_ref, buf_ref):
    """One (batch, row-tile) grid step.

    Refs:
      scale_ref, shift_ref : (1, Cin)  f32   input-side affine (ones/zeros for conv1)
      w_ref                : (9*Cin, Cout)   bf16, HWIO weights reshaped row-major
      b_ref                : (1, Cout) f32
      x_ref                : (1, H, W, Cin)  f32, whole sample (fetched once per n)
      out_ref              : (1, TH, W, Cout) f32  raw conv output tile
      stats_ref            : (1, 1, 2, Cout) f32  per-tile [sum, sum_sq]
      buf_ref (scratch)    : (TH+2, W+2, Cin) bf16  normalized + zero-padded halo tile
    """
    _, H, W, Cin = x_ref.shape
    TH = out_ref.shape[1]
    Cout = out_ref.shape[-1]

    r0 = pl.program_id(1) * TH                 # first output row of this tile

    # Hoisted per-channel parameters (loaded once per tile, not per row).
    scale = scale_ref[...]                     # (1, Cin)
    shift = shift_ref[...]                     # (1, Cin)
    bias = b_ref[...]                          # (1, Cout)
    zcol = jnp.zeros((1, 1, Cin), jnp.bfloat16)

    # ---- build the affine-transformed, spatially zero-padded input tile ----
    def fill_row(i, carry):
        g = r0 - 1 + i                                       # global input row
        valid = jnp.logical_and(g >= 0, g < H)
        gc = jnp.clip(g, 0, H - 1)
        row = x_ref[0, pl.ds(gc, 1), :, :]                   # (1, W, Cin) f32
        row = row * scale + shift                            # folded previous BN
        row = row * jnp.where(valid, 1.0, 0.0)               # halo rows -> exact 0
        row = row.astype(jnp.bfloat16)
        # width halo built by value-concat (no misaligned masked stores)
        buf_ref[pl.ds(i, 1)] = jnp.concatenate([zcol, row, zcol], axis=1)
        return carry

    lax.fori_loop(0, TH + 2, fill_row, 0, unroll=(TH + 2) <= 16)

    # ---- 3x3 conv: ONE (TH*W, 9*Cin) @ (9*Cin, Cout) MXU matmul ------------
    taps = []
    for dy in range(3):
        for dx in range(3):
            t = buf_ref[dy:dy + TH, dx:dx + W, :]            # (TH, W, Cin) bf16
            taps.append(t.reshape(TH * W, Cin))
    patches = jnp.concatenate(taps, axis=-1)                 # (TH*W, 9*Cin)

    y = jnp.dot(patches, w_ref[...], preferred_element_type=jnp.float32)
    y = y + bias                                             # (TH*W, Cout) f32

    out_ref[...] = y.reshape(1, TH, W, Cout)

    # ---- partial BatchNorm statistics (finalized outside the kernel) -------
    s1 = jnp.sum(y, axis=0, keepdims=True)                   # (1, Cout)
    s2 = jnp.sum(y * y, axis=0, keepdims=True)               # (1, Cout)
    stats_ref[...] = jnp.concatenate([s1, s2], axis=0).reshape(1, 1, 2, Cout)


def _pick_row_tile(H, W, target_rows=128):
    """Largest row-tile TH dividing H with TH*W around `target_rows` (M >= 128)."""
    th = max(1, min(H, target_rows // max(W, 1)))
    while H % th:
        th -= 1
    return th


def _conv_layer(x_nhwc, scale, shift, w9, bias, *, tile_h):
    """conv3x3 (with input affine folded in) + per-tile BN partial stats."""
    N, H, W, Cin = x_nhwc.shape
    Cout = w9.shape[-1]
    TH = tile_h
    nh = H // TH

    # Rough VMEM budget: double-buffered sample block + output tile + scratch.
    vmem_est = (2 * H * W * Cin * 4 + 2 * TH * W * Cout * 4
                + (TH + 2) * (W + 2) * Cin * 2 + 9 * Cin * Cout * 2
                + 2 * Cin * 4 + 8 * Cout * 4)
    vmem_limit = min(max(4 * vmem_est + (8 << 20), 16 << 20), 100 << 20)

    y, stats = pl.pallas_call(
        _conv3x3_bn_in_kernel,
        out_shape=(
            jax.ShapeDtypeStruct((N, H, W, Cout), jnp.float32),
            jax.ShapeDtypeStruct((N, nh, 2, Cout), jnp.float32),
        ),
        grid_spec=pltpu.PrefetchScalarGridSpec(
            num_scalar_prefetch=0,
            grid=(N, nh),
            in_specs=[
                pl.BlockSpec((1, Cin), lambda n, h: (0, 0)),            # scale
                pl.BlockSpec((1, Cin), lambda n, h: (0, 0)),            # shift
                pl.BlockSpec((9 * Cin, Cout), lambda n, h: (0, 0)),     # weights
                pl.BlockSpec((1, Cout), lambda n, h: (0, 0)),           # bias
                pl.BlockSpec((1, H, W, Cin), lambda n, h: (n, 0, 0, 0)),  # sample
            ],
            out_specs=(
                pl.BlockSpec((1, TH, W, Cout), lambda n, h: (n, h, 0, 0)),
                pl.BlockSpec((1, 1, 2, Cout), lambda n, h: (n, h, 0, 0)),
            ),
            scratch_shapes=[pltpu.VMEM((TH + 2, W + 2, Cin), jnp.bfloat16)],
        ),
        compiler_params=pltpu.CompilerParams(
            dimension_semantics=("parallel", "parallel"),
            vmem_limit_bytes=vmem_limit,
        ),
    )(scale, shift, w9, bias, x_nhwc)
    return y, stats


def _bn_affine(stats, count, gamma, beta):
    """Finalize partial [sum, sum_sq] into per-channel scale/shift (tiny XLA ops)."""
    s = jnp.sum(stats[:, :, 0, :], axis=(0, 1))              # (Cout,)
    ss = jnp.sum(stats[:, :, 1, :], axis=(0, 1))             # (Cout,)
    mean = s / count
    var = jnp.maximum(ss / count - mean * mean, 0.0)          # biased (training fwd)
    scale = gamma * lax.rsqrt(var + EPS)
    shift = beta - mean * scale
    return scale.reshape(1, -1), shift.reshape(1, -1)


def conv_block_pallas(x_nchw, w1, b1, g1, be1, w2, b2, g2, be2):
    """x_nchw: (N, Cin, H, W). Conv weights are HWIO: (3, 3, Cin/Cout, Cout)."""
    N, Cin, H, W = x_nchw.shape
    Cout = w1.shape[-1]
    TH = _pick_row_tile(H, W)
    count = N * H * W

    # PyTorch I/O is NCHW; the kernel runs NHWC (channels on lanes).
    x = jnp.transpose(x_nchw, (0, 2, 3, 1)).astype(jnp.float32)

    # bf16 MXU operands, f32 accumulation.  Row-major (ky, kx, cin) matches the
    # tap-concatenation order inside the kernel.
    w1r = w1.astype(jnp.bfloat16).reshape(9 * Cin, Cout)
    w2r = w2.astype(jnp.bfloat16).reshape(9 * Cout, Cout)

    one = jnp.ones((1, Cin), jnp.float32)
    zero = jnp.zeros((1, Cin), jnp.float32)

    # conv1 (+ BN1 partial stats)
    y1, st1 = _conv_layer(x, one, zero, w1r,
                          b1.reshape(1, -1).astype(jnp.float32), tile_h=TH)
    sc1, sh1 = _bn_affine(st1, count, g1.astype(jnp.float32), be1.astype(jnp.float32))

    # conv2 with BN1 folded into its input path (+ BN2 partial stats)
    y2, st2 = _conv_layer(y1, sc1, sh1, w2r,
                          b2.reshape(1, -1).astype(jnp.float32), tile_h=TH)
    sc2, sh2 = _bn_affine(st2, count, g2.astype(jnp.float32), be2.astype(jnp.float32))

    # BN2 + ReLU + NHWC->NCHW: cheap elementwise, fused by XLA with the transpose.
    out = jnp.maximum(y2 * sc2.reshape(1, 1, 1, Cout) + sh2.reshape(1, 1, 1, Cout), 0.0)
    return jnp.transpose(out, (0, 3, 1, 2))


def _ref_forward(x_nchw, w1, b1, g1, be1, w2, b2, g2, be2):
    """Pure-JAX reference (PyTorch training-mode forward; bf16 matmul operands
    to match the kernel's MXU precision, f32 accumulation)."""
    def conv(x, w, b):
        y = lax.conv_general_dilated(
            x.astype(jnp.bfloat16), w.astype(jnp.bfloat16),
            window_strides=(1, 1), padding=((1, 1), (1, 1)),
            dimension_numbers=("NCHW", "HWIO", "NCHW"),
            preferred_element_type=jnp.float32)
        return y + b.reshape(1, -1, 1, 1)

    def bn(x, g, bta):
        m = jnp.mean(x, axis=(0, 2, 3), keepdims=True)
        v = jnp.mean((x - m) ** 2, axis=(0, 2, 3), keepdims=True)
        return (x - m) * lax.rsqrt(v + EPS) * g.reshape(1, -1, 1, 1) + bta.reshape(1, -1, 1, 1)

    y = bn(conv(x_nchw, w1, b1), g1, be1)
    y = bn(conv(y, w2, b2), g2, be2)
    return jnp.maximum(y, 0.0)


if __name__ == "__main__":
    key = jax.random.PRNGKey(0)
    ks = jax.random.split(key, 9)

    N, Cin, Cout, H, W = 2, 4, 8, 16, 16
    x = jax.random.normal(ks[0], (N, Cin, H, W), jnp.float32)

    # Deterministic synthetic parameters (shapes from _ConvBlock.__init__).
    w1 = 0.2 * jax.random.normal(ks[1], (3, 3, Cin, Cout), jnp.float32)   # conv1 weight (HWIO)
    b1 = 0.1 * jax.random.normal(ks[2], (Cout,), jnp.float32)             # conv1 bias
    g1 = 1.0 + 0.1 * jax.random.normal(ks[3], (Cout,), jnp.float32)       # bn1 gamma
    be1 = 0.1 * jax.random.normal(ks[4], (Cout,), jnp.float32)            # bn1 beta
    w2 = 0.2 * jax.random.normal(ks[5], (3, 3, Cout, Cout), jnp.float32)  # conv2 weight (HWIO)
    b2 = 0.1 * jax.random.normal(ks[6], (Cout,), jnp.float32)             # conv2 bias
    g2 = 1.0 + 0.1 * jax.random.normal(ks[7], (Cout,), jnp.float32)       # bn2 gamma
    be2 = 0.1 * jax.random.normal(ks[8], (Cout,), jnp.float32)            # bn2 beta

    run = jax.jit(conv_block_pallas)
    out = jax.block_until_ready(run(x, w1, b1, g1, be1, w2, b2, g2, be2))

    ref = _ref_forward(x, w1, b1, g1, be1, w2, b2, g2, be2)
    assert out.shape == ref.shape == (N, Cout, H, W)
    if not jnp.allclose(out, ref, rtol=5e-3, atol=5e-3):
        raise AssertionError(
            f"mismatch vs reference, max abs err = {float(jnp.max(jnp.abs(out - ref)))}")

    # TODO(synk): BatchNorm running_mean/running_var updates (training-time buffer
    # side effect) are not modeled; only the forward output is reproduced.
    print("KERNEL_OK")
</pallas_src>

<mosaic_0001>
module attributes {stable_mosaic.version = 11 : i64} {
  func.func @_conv3x3_bn_in_kernel(%arg0: i32, %arg1: i32, %arg2: memref<1x8xf32, #tpu.memory_space<vmem>>, %arg3: memref<1x8xf32, #tpu.memory_space<vmem>>, %arg4: memref<72x8xbf16, #tpu.memory_space<vmem>>, %arg5: memref<1x8xf32, #tpu.memory_space<vmem>>, %arg6: memref<1x16x16x8xf32, #tpu.memory_space<vmem>>, %arg7: memref<1x8x16x8xf32, #tpu.memory_space<vmem>>, %arg8: memref<1x1x2x8xf32, #tpu.memory_space<vmem>>, %arg9: memref<10x18x8xbf16, #tpu.memory_space<vmem>>) attributes {dimension_semantics = [#tpu.dimension_semantics<parallel>, #tpu.dimension_semantics<parallel>], iteration_bounds = array<i64: 2, 2>, scalar_prefetch = 0 : i64, scratch_operands = 1 : i64, tpu.core_type = #tpu.core_type<tc>, window_params = [{pipeline_mode = #tpu.pipeline_mode<synchronous>, transform_indices = @transform_0, window_bounds = array<i64: 1, 8>}, {pipeline_mode = #tpu.pipeline_mode<synchronous>, transform_indices = @transform_1, window_bounds = array<i64: 1, 8>}, {pipeline_mode = #tpu.pipeline_mode<synchronous>, transform_indices = @transform_2, window_bounds = array<i64: 72, 8>}, {pipeline_mode = #tpu.pipeline_mode<synchronous>, transform_indices = @transform_3, window_bounds = array<i64: 1, 8>}, {transform_indices = @transform_4, window_bounds = array<i64: 1, 16, 16, 8>}, {transform_indices = @transform_5, window_bounds = array<i64: 1, 8, 16, 8>}, {transform_indices = @transform_6, window_bounds = array<i64: 1, 1, 2, 8>}]} {
    %c8_i32 = arith.constant 8 : i32
    %0 = arith.muli %arg1, %c8_i32 : i32
    %c0 = arith.constant 0 : index
    %c0_0 = arith.constant 0 : index
    %1 = vector.load %arg2[%c0, %c0_0] : memref<1x8xf32, #tpu.memory_space<vmem>>, vector<1x8xf32>
    %c0_1 = arith.constant 0 : index
    %c0_2 = arith.constant 0 : index
    %2 = vector.load %arg3[%c0_1, %c0_2] : memref<1x8xf32, #tpu.memory_space<vmem>>, vector<1x8xf32>
    %c0_3 = arith.constant 0 : index
    %c0_4 = arith.constant 0 : index
    %3 = vector.load %arg5[%c0_3, %c0_4] : memref<1x8xf32, #tpu.memory_space<vmem>>, vector<1x8xf32>
    %cst = arith.constant 0.000000e+00 : bf16
    %4 = vector.broadcast %cst : bf16 to vector<1x1x8xbf16>
    %c0_i32 = arith.constant 0 : i32
    %c1_i32 = arith.constant 1 : i32
    %5 = arith.subi %0, %c1_i32 : i32
    %6 = arith.addi %5, %c0_i32 : i32
    %c0_i32_5 = arith.constant 0 : i32
    %7 = arith.cmpi sge, %6, %c0_i32_5 : i32
    %c16_i32 = arith.constant 16 : i32
    %8 = arith.cmpi slt, %6, %c16_i32 : i32
    %9 = arith.andi %7, %8 : i1
    %c0_i32_6 = arith.constant 0 : i32
    %c15_i32 = arith.constant 15 : i32
    %10 = arith.maxsi %c0_i32_6, %6 : i32
    %11 = arith.minsi %c15_i32, %10 : i32
    %c0_7 = arith.constant 0 : index
    %12 = arith.index_cast %11 : i32 to index
    %c0_8 = arith.constant 0 : index
    %c0_9 = arith.constant 0 : index
    %13 = vector.load %arg6[%c0_7, %12, %c0_8, %c0_9] : memref<1x16x16x8xf32, #tpu.memory_space<vmem>>, vector<1x1x16x8xf32>
    %14 = vector.shape_cast %13 : vector<1x1x16x8xf32> to vector<1x16x8xf32>
    %15 = vector.shape_cast %1 : vector<1x8xf32> to vector<1x1x8xf32>
    %16 = vector.broadcast %15 : vector<1x1x8xf32> to vector<1x16x8xf32>
    %17 = arith.mulf %14, %16 : vector<1x16x8xf32>
    %18 = vector.shape_cast %2 : vector<1x8xf32> to vector<1x1x8xf32>
    %19 = vector.broadcast %18 : vector<1x1x8xf32> to vector<1x16x8xf32>
    %20 = arith.addf %17, %19 : vector<1x16x8xf32>
    %cst_10 = arith.constant 1.000000e+00 : f32
    %cst_11 = arith.constant 0.000000e+00 : f32
    %21 = arith.select %9, %cst_10, %cst_11 : f32
    %22 = vector.broadcast %21 : f32 to vector<1x16x8xf32>
    %23 = arith.mulf %20, %22 : vector<1x16x8xf32>
    %24 = arith.truncf %23 : vector<1x16x8xf32> to vector<1x16x8xbf16>
    %25 = tpu.concatenate %4, %24, %4 in 1 : vector<1x1x8xbf16>, vector<1x16x8xbf16>, vector<1x1x8xbf16> -> vector<1x18x8xbf16>
    %26 = arith.index_cast %c0_i32 : i32 to index
    %c0_12 = arith.constant 0 : index
    %c0_13 = arith.constant 0 : index
    %27 = vector.load %arg9[%26, %c0_12, %c0_13] : memref<10x18x8xbf16, #tpu.memory_space<vmem>>, vector<1x18x8xbf16>
    tpu.vector_store %arg9[%26, %c0_12, %c0_13], %25 {strides = array<i32>} : memref<10x18x8xbf16, #tpu.memory_space<vmem>>, vector<1x18x8xbf16>,
    %c1_i32_14 = arith.constant 1 : i32
    %c1_i32_15 = arith.constant 1 : i32
    %28 = arith.subi %0, %c1_i32_15 : i32
    %29 = arith.addi %28, %c1_i32_14 : i32
    %c0_i32_16 = arith.constant 0 : i32
    %30 = arith.cmpi sge, %29, %c0_i32_16 : i32
    %c16_i32_17 = arith.constant 16 : i32
    %31 = arith.cmpi slt, %29, %c16_i32_17 : i32
    %32 = arith.andi %30, %31 : i1
    %c0_i32_18 = arith.constant 0 : i32
    %c15_i32_19 = arith.constant 15 : i32
    %33 = arith.maxsi %c0_i32_18, %29 : i32
    %34 = arith.minsi %c15_i32_19, %33 : i32
    %c0_20 = arith.constant 0 : index
    %35 = arith.index_cast %34 : i32 to index
    %c0_21 = arith.constant 0 : index
    %c0_22 = arith.constant 0 : index
    %36 = vector.load %arg6[%c0_20, %35, %c0_21, %c0_22] : memref<1x16x16x8xf32, #tpu.memory_space<vmem>>, vector<1x1x16x8xf32>
    %37 = vector.shape_cast %36 : vector<1x1x16x8xf32> to vector<1x16x8xf32>
    %38 = vector.shape_cast %1 : vector<1x8xf32> to vector<1x1x8xf32>
    %39 = vector.broadcast %38 : vector<1x1x8xf32> to vector<1x16x8xf32>
    %40 = arith.mulf %37, %39 : vector<1x16x8xf32>
    %41 = vector.shape_cast %2 : vector<1x8xf32> to vector<1x1x8xf32>
    %42 = vector.broadcast %41 : vector<1x1x8xf32> to vector<1x16x8xf32>
    %43 = arith.addf %40, %42 : vector<1x16x8xf32>
    %cst_23 = arith.constant 1.000000e+00 : f32
    %cst_24 = arith.constant 0.000000e+00 : f32
    %44 = arith.select %32, %cst_23, %cst_24 : f32
    %45 = vector.broadcast %44 : f32 to vector<1x16x8xf32>
    %46 = arith.mulf %43, %45 : vector<1x16x8xf32>
    %47 = arith.truncf %46 : vector<1x16x8xf32> to vector<1x16x8xbf16>
    %48 = tpu.concatenate %4, %47, %4 in 1 : vector<1x1x8xbf16>, vector<1x16x8xbf16>, vector<1x1x8xbf16> -> vector<1x18x8xbf16>
    %49 = arith.index_cast %c1_i32_14 : i32 to index
    %c0_25 = arith.constant 0 : index
    %c0_26 = arith.constant 0 : index
    %50 = vector.load %arg9[%49, %c0_25, %c0_26] : memref<10x18x8xbf16, #tpu.memory_space<vmem>>, vector<1x18x8xbf16>
    tpu.vector_store %arg9[%49, %c0_25, %c0_26], %48 {strides = array<i32>} : memref<10x18x8xbf16, #tpu.memory_space<vmem>>, vector<1x18x8xbf16>,
    %c2_i32 = arith.constant 2 : i32
    %c1_i32_27 = arith.constant 1 : i32
    %51 = arith.subi %0, %c1_i32_27 : i32
    %52 = arith.addi %51, %c2_i32 : i32
    %c0_i32_28 = arith.constant 0 : i32
    %53 = arith.cmpi sge, %52, %c0_i32_28 : i32
    %c16_i32_29 = arith.constant 16 : i32
    %54 = arith.cmpi slt, %52, %c16_i32_29 : i32
    %55 = arith.andi %53, %54 : i1
    %c0_i32_30 = arith.constant 0 : i32
    %c15_i32_31 = arith.constant 15 : i32
    %56 = arith.maxsi %c0_i32_30, %52 : i32
    %57 = arith.minsi %c15_i32_31, %56 : i32
    %c0_32 = arith.constant 0 : index
    %58 = arith.index_cast %57 : i32 to index
    %c0_33 = arith.constant 0 : index
    %c0_34 = arith.constant 0 : index
    %59 = vector.load %arg6[%c0_32, %58, %c0_33, %c0_34] : memref<1x16x16x8xf32, #tpu.memory_space<vmem>>, vector<1x1x16x8xf32>
    %60 = vector.shape_cast %59 : vector<1x1x16x8xf32> to vector<1x16x8xf32>
    %61 = vector.shape_cast %1 : vector<1x8xf32> to vector<1x1x8xf32>
    %62 = vector.broadcast %61 : vector<1x1x8xf32> to vector<1x16x8xf32>
    %63 = arith.mulf %60, %62 : vector<1x16x8xf32>
    %64 = vector.shape_cast %2 : vector<1x8xf32> to vector<1x1x8xf32>
    %65 = vector.broadcast %64 : vector<1x1x8xf32> to vector<1x16x8xf32>
    %66 = arith.addf %63, %65 : vector<1x16x8xf32>
    %cst_35 = arith.constant 1.000000e+00 : f32
    %cst_36 = arith.constant 0.000000e+00 : f32
    %67 = arith.select %55, %cst_35, %cst_36 : f32
    %68 = vector.broadcast %67 : f32 to vector<1x16x8xf32>
    %69 = arith.mulf %66, %68 : vector<1x16x8xf32>
    %70 = arith.truncf %69 : vector<1x16x8xf32> to vector<1x16x8xbf16>
    %71 = tpu.concatenate %4, %70, %4 in 1 : vector<1x1x8xbf16>, vector<1x16x8xbf16>, vector<1x1x8xbf16> -> vector<1x18x8xbf16>
    %72 = arith.index_cast %c2_i32 : i32 to index
    %c0_37 = arith.constant 0 : index
    %c0_38 = arith.constant 0 : index
    %73 = vector.load %arg9[%72, %c0_37, %c0_38] : memref<10x18x8xbf16, #tpu.memory_space<vmem>>, vector<1x18x8xbf16>
    tpu.vector_store %arg9[%72, %c0_37, %c0_38], %71 {strides = array<i32>} : memref<10x18x8xbf16, #tpu.memory_space<vmem>>, vector<1x18x8xbf16>,
    %c3_i32 = arith.constant 3 : i32
    %c1_i32_39 = arith.constant 1 : i32
    %74 = arith.subi %0, %c1_i32_39 : i32
    %75 = arith.addi %74, %c3_i32 : i32
    %c0_i32_40 = arith.constant 0 : i32
    %76 = arith.cmpi sge, %75, %c0_i32_40 : i32
    %c16_i32_41 = arith.constant 16 : i32
    %77 = arith.cmpi slt, %75, %c16_i32_41 : i32
    %78 = arith.andi %76, %77 : i1
    %c0_i32_42 = arith.constant 0 : i32
    %c15_i32_43 = arith.constant 15 : i32
    %79 = arith.maxsi %c0_i32_42, %75 : i32
    %80 = arith.minsi %c15_i32_43, %79 : i32
    %c0_44 = arith.constant 0 : index
    %81 = arith.index_cast %80 : i32 to index
    %c0_45 = arith.constant 0 : index
    %c0_46 = arith.constant 0 : index
    %82 = vector.load %arg6[%c0_44, %81, %c0_45, %c0_46] : memref<1x16x16x8xf32, #tpu.memory_space<vmem>>, vector<1x1x16x8xf32>
    %83 = vector.shape_cast %82 : vector<1x1x16x8xf32> to vector<1x16x8xf32>
    %84 = vector.shape_cast %1 : vector<1x8xf32> to vector<1x1x8xf32>
    %85 = vector.broadcast %84 : vector<1x1x8xf32> to vector<1x16x8xf32>
    %86 = arith.mulf %83, %85 : vector<1x16x8xf32>
    %87 = vector.shape_cast %2 : vector<1x8xf32> to vector<1x1x8xf32>
    %88 = vector.broadcast %87 : vector<1x1x8xf32> to vector<1x16x8xf32>
    %89 = arith.addf %86, %88 : vector<1x16x8xf32>
    %cst_47 = arith.constant 1.000000e+00 : f32
    %cst_48 = arith.constant 0.000000e+00 : f32
    %90 = arith.select %78, %cst_47, %cst_48 : f32
    %91 = vector.broadcast %90 : f32 to vector<1x16x8xf32>
    %92 = arith.mulf %89, %91 : vector<1x16x8xf32>
    %93 = arith.truncf %92 : vector<1x16x8xf32> to vector<1x16x8xbf16>
    %94 = tpu.concatenate %4, %93, %4 in 1 : vector<1x1x8xbf16>, vector<1x16x8xbf16>, vector<1x1x8xbf16> -> vector<1x18x8xbf16>
    %95 = arith.index_cast %c3_i32 : i32 to index
    %c0_49 = arith.constant 0 : index
    %c0_50 = arith.constant 0 : index
    %96 = vector.load %arg9[%95, %c0_49, %c0_50] : memref<10x18x8xbf16, #tpu.memory_space<vmem>>, vector<1x18x8xbf16>
    tpu.vector_store %arg9[%95, %c0_49, %c0_50], %94 {strides = array<i32>} : memref<10x18x8xbf16, #tpu.memory_space<vmem>>, vector<1x18x8xbf16>,
    %c4_i32 = arith.constant 4 : i32
    %c1_i32_51 = arith.constant 1 : i32
    %97 = arith.subi %0, %c1_i32_51 : i32
    %98 = arith.addi %97, %c4_i32 : i32
    %c0_i32_52 = arith.constant 0 : i32
    %99 = arith.cmpi sge, %98, %c0_i32_52 : i32
    %c16_i32_53 = arith.constant 16 : i32
    %100 = arith.cmpi slt, %98, %c16_i32_53 : i32
    %101 = arith.andi %99, %100 : i1
    %c0_i32_54 = arith.constant 0 : i32
    %c15_i32_55 = arith.constant 15 : i32
    %102 = arith.maxsi %c0_i32_54, %98 : i32
    %103 = arith.minsi %c15_i32_55, %102 : i32
    %c0_56 = arith.constant 0 : index
    %104 = arith.index_cast %103 : i32 to index
    %c0_57 = arith.constant 0 : index
    %c0_58 = arith.constant 0 : index
    %105 = vector.load %arg6[%c0_56, %104, %c0_57, %c0_58] : memref<1x16x16x8xf32, #tpu.memory_space<vmem>>, vector<1x1x16x8xf32>
    %106 = vector.shape_cast %105 : vector<1x1x16x8xf32> to vector<1x16x8xf32>
    %107 = vector.shape_cast %1 : vector<1x8xf32> to vector<1x1x8xf32>
    %108 = vector.broadcast %107 : vector<1x1x8xf32> to vector<1x16x8xf32>
    %109 = arith.mulf %106, %108 : vector<1x16x8xf32>
    %110 = vector.shape_cast %2 : vector<1x8xf32> to vector<1x1x8xf32>
    %111 = vector.broadcast %110 : vector<1x1x8xf32> to vector<1x16x8xf32>
    %112 = arith.addf %109, %111 : vector<1x16x8xf32>
    %cst_59 = arith.constant 1.000000e+00 : f32
    %cst_60 = arith.constant 0.000000e+00 : f32
    %113 = arith.select %101, %cst_59, %cst_60 : f32
    %114 = vector.broadcast %113 : f32 to vector<1x16x8xf32>
    %115 = arith.mulf %112, %114 : vector<1x16x8xf32>
    %116 = arith.truncf %115 : vector<1x16x8xf32> to vector<1x16x8xbf16>
    %117 = tpu.concatenate %4, %116, %4 in 1 : vector<1x1x8xbf16>, vector<1x16x8xbf16>, vector<1x1x8xbf16> -> vector<1x18x8xbf16>
    %118 = arith.index_cast %c4_i32 : i32 to index
    %c0_61 = arith.constant 0 : index
    %c0_62 = arith.constant 0 : index
    %119 = vector.load %arg9[%118, %c0_61, %c0_62] : memref<10x18x8xbf16, #tpu.memory_space<vmem>>, vector<1x18x8xbf16>
    tpu.vector_store %arg9[%118, %c0_61, %c0_62], %117 {strides = array<i32>} : memref<10x18x8xbf16, #tpu.memory_space<vmem>>, vector<1x18x8xbf16>,
    %c5_i32 = arith.constant 5 : i32
    %c1_i32_63 = arith.constant 1 : i32
    %120 = arith.subi %0, %c1_i32_63 : i32
    %121 = arith.addi %120, %c5_i32 : i32
    %c0_i32_64 = arith.constant 0 : i32
    %122 = arith.cmpi sge, %121, %c0_i32_64 : i32
    %c16_i32_65 = arith.constant 16 : i32
    %123 = arith.cmpi slt, %121, %c16_i32_65 : i32
    %124 = arith.andi %122, %123 : i1
    %c0_i32_66 = arith.constant 0 : i32
    %c15_i32_67 = arith.constant 15 : i32
    %125 = arith.maxsi %c0_i32_66, %121 : i32
    %126 = arith.minsi %c15_i32_67, %125 : i32
    %c0_68 = arith.constant 0 : index
    %127 = arith.index_cast %126 : i32 to index
    %c0_69 = arith.constant 0 : index
    %c0_70 = arith.constant 0 : index
    %128 = vector.load %arg6[%c0_68, %127, %c0_69, %c0_70] : memref<1x16x16x8xf32, #tpu.memory_space<vmem>>, vector<1x1x16x8xf32>
    %129 = vector.shape_cast %128 : vector<1x1x16x8xf32> to vector<1x16x8xf32>
    %130 = vector.shape_cast %1 : vector<1x8xf32> to vector<1x1x8xf32>
    %131 = vector.broadcast %130 : vector<1x1x8xf32> to vector<1x16x8xf32>
    %132 = arith.mulf %129, %131 : vector<1x16x8xf32>
    %133 = vector.shape_cast %2 : vector<1x8xf32> to vector<1x1x8xf32>
    %134 = vector.broadcast %133 : vector<1x1x8xf32> to vector<1x16x8xf32>
    %135 = arith.addf %132, %134 : vector<1x16x8xf32>
    %cst_71 = arith.constant 1.000000e+00 : f32
    %cst_72 = arith.constant 0.000000e+00 : f32
    %136 = arith.select %124, %cst_71, %cst_72 : f32
    %137 = vector.broadcast %136 : f32 to vector<1x16x8xf32>
    %138 = arith.mulf %135, %137 : vector<1x16x8xf32>
    %139 = arith.truncf %138 : vector<1x16x8xf32> to vector<1x16x8xbf16>
    %140 = tpu.concatenate %4, %139, %4 in 1 : vector<1x1x8xbf16>, vector<1x16x8xbf16>, vector<1x1x8xbf16> -> vector<1x18x8xbf16>
    %141 = arith.index_cast %c5_i32 : i32 to index
    %c0_73 = arith.constant 0 : index
    %c0_74 = arith.constant 0 : index
    %142 = vector.load %arg9[%141, %c0_73, %c0_74] : memref<10x18x8xbf16, #tpu.memory_space<vmem>>, vector<1x18x8xbf16>
    tpu.vector_store %arg9[%141, %c0_73, %c0_74], %140 {strides = array<i32>} : memref<10x18x8xbf16, #tpu.memory_space<vmem>>, vector<1x18x8xbf16>,
    %c6_i32 = arith.constant 6 : i32
    %c1_i32_75 = arith.constant 1 : i32
    %143 = arith.subi %0, %c1_i32_75 : i32
    %144 = arith.addi %143, %c6_i32 : i32
    %c0_i32_76 = arith.constant 0 : i32
    %145 = arith.cmpi sge, %144, %c0_i32_76 : i32
    %c16_i32_77 = arith.constant 16 : i32
    %146 = arith.cmpi slt, %144, %c16_i32_77 : i32
    %147 = arith.andi %145, %146 : i1
    %c0_i32_78 = arith.constant 0 : i32
    %c15_i32_79 = arith.constant 15 : i32
    %148 = arith.maxsi %c0_i32_78, %144 : i32
    %149 = arith.minsi %c15_i32_79, %148 : i32
    %c0_80 = arith.constant 0 : index
    %150 = arith.index_cast %149 : i32 to index
    %c0_81 = arith.constant 0 : index
    %c0_82 = arith.constant 0 : index
    %151 = vector.load %arg6[%c0_80, %150, %c0_81, %c0_82] : memref<1x16x16x8xf32, #tpu.memory_space<vmem>>, vector<1x1x16x8xf32>
    %152 = vector.shape_cast %151 : vector<1x1x16x8xf32> to vector<1x16x8xf32>
    %153 = vector.shape_cast %1 : vector<1x8xf32> to vector<1x1x8xf32>
    %154 = vector.broadcast %153 : vector<1x1x8xf32> to vector<1x16x8xf32>
    %155 = arith.mulf %152, %154 : vector<1x16x8xf32>
    %156 = vector.shape_cast %2 : vector<1x8xf32> to vector<1x1x8xf32>
    %157 = vector.broadcast %156 : vector<1x1x8xf32> to vector<1x16x8xf32>
    %158 = arith.addf %155, %157 : vector<1x16x8xf32>
    %cst_83 = arith.constant 1.000000e+00 : f32
    %cst_84 = arith.constant 0.000000e+00 : f32
    %159 = arith.select %147, %cst_83, %cst_84 : f32
    %160 = vector.broadcast %159 : f32 to vector<1x16x8xf32>
    %161 = arith.mulf %158, %160 : vector<1x16x8xf32>
    %162 = arith.truncf %161 : vector<1x16x8xf32> to vector<1x16x8xbf16>
    %163 = tpu.concatenate %4, %162, %4 in 1 : vector<1x1x8xbf16>, vector<1x16x8xbf16>, vector<1x1x8xbf16> -> vector<1x18x8xbf16>
    %164 = arith.index_cast %c6_i32 : i32 to index
    %c0_85 = arith.constant 0 : index
    %c0_86 = arith.constant 0 : index
    %165 = vector.load %arg9[%164, %c0_85, %c0_86] : memref<10x18x8xbf16, #tpu.memory_space<vmem>>, vector<1x18x8xbf16>
    tpu.vector_store %arg9[%164, %c0_85, %c0_86], %163 {strides = array<i32>} : memref<10x18x8xbf16, #tpu.memory_space<vmem>>, vector<1x18x8xbf16>,
    %c7_i32 = arith.constant 7 : i32
    %c1_i32_87 = arith.constant 1 : i32
    %166 = arith.subi %0, %c1_i32_87 : i32
    %167 = arith.addi %166, %c7_i32 : i32
    %c0_i32_88 = arith.constant 0 : i32
    %168 = arith.cmpi sge, %167, %c0_i32_88 : i32
    %c16_i32_89 = arith.constant 16 : i32
    %169 = arith.cmpi slt, %167, %c16_i32_89 : i32
    %170 = arith.andi %168, %169 : i1
    %c0_i32_90 = arith.constant 0 : i32
    %c15_i32_91 = arith.constant 15 : i32
    %171 = arith.maxsi %c0_i32_90, %167 : i32
    %172 = arith.minsi %c15_i32_91, %171 : i32
    %c0_92 = arith.constant 0 : index
    %173 = arith.index_cast %172 : i32 to index
    %c0_93 = arith.constant 0 : index
    %c0_94 = arith.constant 0 : index
    %174 = vector.load %arg6[%c0_92, %173, %c0_93, %c0_94] : memref<1x16x16x8xf32, #tpu.memory_space<vmem>>, vector<1x1x16x8xf32>
    %175 = vector.shape_cast %174 : vector<1x1x16x8xf32> to vector<1x16x8xf32>
    %176 = vector.shape_cast %1 : vector<1x8xf32> to vector<1x1x8xf32>
    %177 = vector.broadcast %176 : vector<1x1x8xf32> to vector<1x16x8xf32>
    %178 = arith.mulf %175, %177 : vector<1x16x8xf32>
    %179 = vector.shape_cast %2 : vector<1x8xf32> to vector<1x1x8xf32>
    %180 = vector.broadcast %179 : vector<1x1x8xf32> to vector<1x16x8xf32>
    %181 = arith.addf %178, %180 : vector<1x16x8xf32>
    %cst_95 = arith.constant 1.000000e+00 : f32
    %cst_96 = arith.constant 0.000000e+00 : f32
    %182 = arith.select %170, %cst_95, %cst_96 : f32
    %183 = vector.broadcast %182 : f32 to vector<1x16x8xf32>
    %184 = arith.mulf %181, %183 : vector<1x16x8xf32>
    %185 = arith.truncf %184 : vector<1x16x8xf32> to vector<1x16x8xbf16>
    %186 = tpu.concatenate %4, %185, %4 in 1 : vector<1x1x8xbf16>, vector<1x16x8xbf16>, vector<1x1x8xbf16> -> vector<1x18x8xbf16>
    %187 = arith.index_cast %c7_i32 : i32 to index
    %c0_97 = arith.constant 0 : index
    %c0_98 = arith.constant 0 : index
    %188 = vector.load %arg9[%187, %c0_97, %c0_98] : memref<10x18x8xbf16, #tpu.memory_space<vmem>>, vector<1x18x8xbf16>
    tpu.vector_store %arg9[%187, %c0_97, %c0_98], %186 {strides = array<i32>} : memref<10x18x8xbf16, #tpu.memory_space<vmem>>, vector<1x18x8xbf16>,
    %c8_i32_99 = arith.constant 8 : i32
    %c1_i32_100 = arith.constant 1 : i32
    %189 = arith.subi %0, %c1_i32_100 : i32
    %190 = arith.addi %189, %c8_i32_99 : i32
    %c0_i32_101 = arith.constant 0 : i32
    %191 = arith.cmpi sge, %190, %c0_i32_101 : i32
    %c16_i32_102 = arith.constant 16 : i32
    %192 = arith.cmpi slt, %190, %c16_i32_102 : i32
    %193 = arith.andi %191, %192 : i1
    %c0_i32_103 = arith.constant 0 : i32
    %c15_i32_104 = arith.constant 15 : i32
    %194 = arith.maxsi %c0_i32_103, %190 : i32
    %195 = arith.minsi %c15_i32_104, %194 : i32
    %c0_105 = arith.constant 0 : index
    %196 = arith.index_cast %195 : i32 to index
    %c0_106 = arith.constant 0 : index
    %c0_107 = arith.constant 0 : index
    %197 = vector.load %arg6[%c0_105, %196, %c0_106, %c0_107] : memref<1x16x16x8xf32, #tpu.memory_space<vmem>>, vector<1x1x16x8xf32>
    %198 = vector.shape_cast %197 : vector<1x1x16x8xf32> to vector<1x16x8xf32>
    %199 = vector.shape_cast %1 : vector<1x8xf32> to vector<1x1x8xf32>
    %200 = vector.broadcast %199 : vector<1x1x8xf32> to vector<1x16x8xf32>
    %201 = arith.mulf %198, %200 : vector<1x16x8xf32>
    %202 = vector.shape_cast %2 : vector<1x8xf32> to vector<1x1x8xf32>
    %203 = vector.broadcast %202 : vector<1x1x8xf32> to vector<1x16x8xf32>
    %204 = arith.addf %201, %203 : vector<1x16x8xf32>
    %cst_108 = arith.constant 1.000000e+00 : f32
    %cst_109 = arith.constant 0.000000e+00 : f32
    %205 = arith.select %193, %cst_108, %cst_109 : f32
    %206 = vector.broadcast %205 : f32 to vector<1x16x8xf32>
    %207 = arith.mulf %204, %206 : vector<1x16x8xf32>
    %208 = arith.truncf %207 : vector<1x16x8xf32> to vector<1x16x8xbf16>
    %209 = tpu.concatenate %4, %208, %4 in 1 : vector<1x1x8xbf16>, vector<1x16x8xbf16>, vector<1x1x8xbf16> -> vector<1x18x8xbf16>
    %210 = arith.index_cast %c8_i32_99 : i32 to index
    %c0_110 = arith.constant 0 : index
    %c0_111 = arith.constant 0 : index
    %211 = vector.load %arg9[%210, %c0_110, %c0_111] : memref<10x18x8xbf16, #tpu.memory_space<vmem>>, vector<1x18x8xbf16>
    tpu.vector_store %arg9[%210, %c0_110, %c0_111], %209 {strides = array<i32>} : memref<10x18x8xbf16, #tpu.memory_space<vmem>>, vector<1x18x8xbf16>,
    %c9_i32 = arith.constant 9 : i32
    %c1_i32_112 = arith.constant 1 : i32
    %212 = arith.subi %0, %c1_i32_112 : i32
    %213 = arith.addi %212, %c9_i32 : i32
    %c0_i32_113 = arith.constant 0 : i32
    %214 = arith.cmpi sge, %213, %c0_i32_113 : i32
    %c16_i32_114 = arith.constant 16 : i32
    %215 = arith.cmpi slt, %213, %c16_i32_114 : i32
    %216 = arith.andi %214, %215 : i1
    %c0_i32_115 = arith.constant 0 : i32
    %c15_i32_116 = arith.constant 15 : i32
    %217 = arith.maxsi %c0_i32_115, %213 : i32
    %218 = arith.minsi %c15_i32_116, %217 : i32
    %c0_117 = arith.constant 0 : index
    %219 = arith.index_cast %218 : i32 to index
    %c0_118 = arith.constant 0 : index
    %c0_119 = arith.constant 0 : index
    %220 = vector.load %arg6[%c0_117, %219, %c0_118, %c0_119] : memref<1x16x16x8xf32, #tpu.memory_space<vmem>>, vector<1x1x16x8xf32>
    %221 = vector.shape_cast %220 : vector<1x1x16x8xf32> to vector<1x16x8xf32>
    %222 = vector.shape_cast %1 : vector<1x8xf32> to vector<1x1x8xf32>
    %223 = vector.broadcast %222 : vector<1x1x8xf32> to vector<1x16x8xf32>
    %224 = arith.mulf %221, %223 : vector<1x16x8xf32>
    %225 = vector.shape_cast %2 : vector<1x8xf32> to vector<1x1x8xf32>
    %226 = vector.broadcast %225 : vector<1x1x8xf32> to vector<1x16x8xf32>
    %227 = arith.addf %224, %226 : vector<1x16x8xf32>
    %cst_120 = arith.constant 1.000000e+00 : f32
    %cst_121 = arith.constant 0.000000e+00 : f32
    %228 = arith.select %216, %cst_120, %cst_121 : f32
    %229 = vector.broadcast %228 : f32 to vector<1x16x8xf32>
    %230 = arith.mulf %227, %229 : vector<1x16x8xf32>
    %231 = arith.truncf %230 : vector<1x16x8xf32> to vector<1x16x8xbf16>
    %232 = tpu.concatenate %4, %231, %4 in 1 : vector<1x1x8xbf16>, vector<1x16x8xbf16>, vector<1x1x8xbf16> -> vector<1x18x8xbf16>
    %233 = arith.index_cast %c9_i32 : i32 to index
    %c0_122 = arith.constant 0 : index
    %c0_123 = arith.constant 0 : index
    %234 = vector.load %arg9[%233, %c0_122, %c0_123] : memref<10x18x8xbf16, #tpu.memory_space<vmem>>, vector<1x18x8xbf16>
    tpu.vector_store %arg9[%233, %c0_122, %c0_123], %232 {strides = array<i32>} : memref<10x18x8xbf16, #tpu.memory_space<vmem>>, vector<1x18x8xbf16>,
    %c10_i32 = arith.constant 10 : i32
    %c0_124 = arith.constant 0 : index
    %c0_125 = arith.constant 0 : index
    %c0_126 = arith.constant 0 : index
    %235 = vector.load %arg9[%c0_124, %c0_125, %c0_126] : memref<10x18x8xbf16, #tpu.memory_space<vmem>>, vector<8x16x8xbf16>
    %236 = vector.shape_cast %235 : vector<8x16x8xbf16> to vector<128x8xbf16>
    %c0_127 = arith.constant 0 : index
    %c1 = arith.constant 1 : index
    %c0_128 = arith.constant 0 : index
    %237 = vector.load %arg9[%c0_127, %c1, %c0_128] : memref<10x18x8xbf16, #tpu.memory_space<vmem>>, vector<8x16x8xbf16>
    %238 = vector.shape_cast %237 : vector<8x16x8xbf16> to vector<128x8xbf16>
    %c0_129 = arith.constant 0 : index
    %c2 = arith.constant 2 : index
    %c0_130 = arith.constant 0 : index
    %239 = vector.load %arg9[%c0_129, %c2, %c0_130] : memref<10x18x8xbf16, #tpu.memory_space<vmem>>, vector<8x16x8xbf16>
    %240 = vector.shape_cast %239 : vector<8x16x8xbf16> to vector<128x8xbf16>
    %c1_131 = arith.constant 1 : index
    %c0_132 = arith.constant 0 : index
    %c0_133 = arith.constant 0 : index
    %241 = vector.load %arg9[%c1_131, %c0_132, %c0_133] : memref<10x18x8xbf16, #tpu.memory_space<vmem>>, vector<8x16x8xbf16>
    %242 = vector.shape_cast %241 : vector<8x16x8xbf16> to vector<128x8xbf16>
    %c1_134 = arith.constant 1 : index
    %c1_135 = arith.constant 1 : index
    %c0_136 = arith.constant 0 : index
    %243 = vector.load %arg9[%c1_134, %c1_135, %c0_136] : memref<10x18x8xbf16, #tpu.memory_space<vmem>>, vector<8x16x8xbf16>
    %244 = vector.shape_cast %243 : vector<8x16x8xbf16> to vector<128x8xbf16>
    %c1_137 = arith.constant 1 : index
    %c2_138 = arith.constant 2 : index
    %c0_139 = arith.constant 0 : index
    %245 = vector.load %arg9[%c1_137, %c2_138, %c0_139] : memref<10x18x8xbf16, #tpu.memory_space<vmem>>, vector<8x16x8xbf16>
    %246 = vector.shape_cast %245 : vector<8x16x8xbf16> to vector<128x8xbf16>
    %c2_140 = arith.constant 2 : index
    %c0_141 = arith.constant 0 : index
    %c0_142 = arith.constant 0 : index
    %247 = vector.load %arg9[%c2_140, %c0_141, %c0_142] : memref<10x18x8xbf16, #tpu.memory_space<vmem>>, vector<8x16x8xbf16>
    %248 = vector.shape_cast %247 : vector<8x16x8xbf16> to vector<128x8xbf16>
    %c2_143 = arith.constant 2 : index
    %c1_144 = arith.constant 1 : index
    %c0_145 = arith.constant 0 : index
    %249 = vector.load %arg9[%c2_143, %c1_144, %c0_145] : memref<10x18x8xbf16, #tpu.memory_space<vmem>>, vector<8x16x8xbf16>
    %250 = vector.shape_cast %249 : vector<8x16x8xbf16> to vector<128x8xbf16>
    %c2_146 = arith.constant 2 : index
    %c2_147 = arith.constant 2 : index
    %c0_148 = arith.constant 0 : index
    %251 = vector.load %arg9[%c2_146, %c2_147, %c0_148] : memref<10x18x8xbf16, #tpu.memory_space<vmem>>, vector<8x16x8xbf16>
    %252 = vector.shape_cast %251 : vector<8x16x8xbf16> to vector<128x8xbf16>
    %253 = tpu.concatenate %236, %238, %240, %242, %244, %246, %248, %250, %252 in 1 : vector<128x8xbf16>, vector<128x8xbf16>, vector<128x8xbf16>, vector<128x8xbf16>, vector<128x8xbf16>, vector<128x8xbf16>, vector<128x8xbf16>, vector<128x8xbf16>, vector<128x8xbf16> -> vector<128x72xbf16>
    %c0_149 = arith.constant 0 : index
    %c0_150 = arith.constant 0 : index
    %254 = vector.load %arg4[%c0_149, %c0_150] : memref<72x8xbf16, #tpu.memory_space<vmem>>, vector<72x8xbf16>
    %cst_151 = arith.constant dense<0.000000e+00> : vector<128x8xf32>
    %255 = tpu.matmul %253, %254, %cst_151 {dimension_numbers = #tpu.dot_dimension_numbers<[1], [0], [0], [1], [0, 0, 1, 1], [], []>} : vector<128x72xbf16>, vector<72x8xbf16>, vector<128x8xf32> -> vector<128x8xf32>
    %256 = vector.broadcast %3 : vector<1x8xf32> to vector<128x8xf32>
    %257 = arith.addf %255, %256 : vector<128x8xf32>
    %258 = vector.shape_cast %257 : vector<128x8xf32> to vector<1x8x16x8xf32>
    %c0_152 = arith.constant 0 : index
    %c0_153 = arith.constant 0 : index
    %c0_154 = arith.constant 0 : index
    %c0_155 = arith.constant 0 : index
    %259 = vector.load %arg7[%c0_152, %c0_153, %c0_154, %c0_155] : memref<1x8x16x8xf32, #tpu.memory_space<vmem>>, vector<1x8x16x8xf32>
    tpu.vector_store %arg7[%c0_152, %c0_153, %c0_154, %c0_155], %258 {strides = array<i32>} : memref<1x8x16x8xf32, #tpu.memory_space<vmem>>, vector<1x8x16x8xf32>,
    %cst_156 = arith.constant dense<0.000000e+00> : vector<8xf32>
    %260 = vector.multi_reduction <add>, %257, %cst_156 [0] : vector<128x8xf32> to vector<8xf32>
    %261 = vector.shape_cast %260 : vector<8xf32> to vector<1x8xf32>
    %262 = arith.mulf %257, %257 : vector<128x8xf32>
    %cst_157 = arith.constant dense<0.000000e+00> : vector<8xf32>
    %263 = vector.multi_reduction <add>, %262, %cst_157 [0] : vector<128x8xf32> to vector<8xf32>
    %264 = vector.shape_cast %263 : vector<8xf32> to vector<1x8xf32>
    %265 = tpu.concatenate %261, %264 in 0 : vector<1x8xf32>, vector<1x8xf32> -> vector<2x8xf32>
    %266 = vector.shape_cast %265 : vector<2x8xf32> to vector<1x1x2x8xf32>
    %c0_158 = arith.constant 0 : index
    %c0_159 = arith.constant 0 : index
    %c0_160 = arith.constant 0 : index
    %c0_161 = arith.constant 0 : index
    %267 = vector.load %arg8[%c0_158, %c0_159, %c0_160, %c0_161] : memref<1x1x2x8xf32, #tpu.memory_space<vmem>>, vector<1x1x2x8xf32>
    tpu.vector_store %arg8[%c0_158, %c0_159, %c0_160, %c0_161], %266 {strides = array<i32>} : memref<1x1x2x8xf32, #tpu.memory_space<vmem>>, vector<1x1x2x8xf32>,
    return
  }
  func.func @transform_0(%arg0: i32, %arg1: i32) -> (i32, i32) {
    %c0_i32 = arith.constant 0 : i32
    %c0_i32_0 = arith.constant 0 : i32
    %c0_i32_1 = arith.constant 0 : i32
    return %c0_i32, %c0_i32_0 : i32, i32
  }
  func.func @transform_1(%arg0: i32, %arg1: i32) -> (i32, i32) {
    %c0_i32 = arith.constant 0 : i32
    %c0_i32_0 = arith.constant 0 : i32
    %c0_i32_1 = arith.constant 0 : i32
    return %c0_i32, %c0_i32_0 : i32, i32
  }
  func.func @transform_2(%arg0: i32, %arg1: i32) -> (i32, i32) {
    %c0_i32 = arith.constant 0 : i32
    %c0_i32_0 = arith.constant 0 : i32
    %c0_i32_1 = arith.constant 0 : i32
    return %c0_i32, %c0_i32_0 : i32, i32
  }
  func.func @transform_3(%arg0: i32, %arg1: i32) -> (i32, i32) {
    %c0_i32 = arith.constant 0 : i32
    %c0_i32_0 = arith.constant 0 : i32
    %c0_i32_1 = arith.constant 0 : i32
    return %c0_i32, %c0_i32_0 : i32, i32
  }
  func.func @transform_4(%arg0: i32, %arg1: i32) -> (i32, i32, i32, i32) {
    %c0_i32 = arith.constant 0 : i32
    %c0_i32_0 = arith.constant 0 : i32
    %c0_i32_1 = arith.constant 0 : i32
    %c0_i32_2 = arith.constant 0 : i32
    return %arg0, %c0_i32, %c0_i32_0, %c0_i32_1 : i32, i32, i32, i32
  }
  func.func @transform_5(%arg0: i32, %arg1: i32) -> (i32, i32, i32, i32) {
    %c0_i32 = arith.constant 0 : i32
    %c0_i32_0 = arith.constant 0 : i32
    %c0_i32_1 = arith.constant 0 : i32
    return %arg0, %arg1, %c0_i32, %c0_i32_0 : i32, i32, i32, i32
  }
  func.func @transform_6(%arg0: i32, %arg1: i32) -> (i32, i32, i32, i32) {
    %c0_i32 = arith.constant 0 : i32
    %c0_i32_0 = arith.constant 0 : i32
    %c0_i32_1 = arith.constant 0 : i32
    return %arg0, %arg1, %c0_i32, %c0_i32_0 : i32, i32, i32, i32
  }
}

module attributes {stable_mosaic.version = 11 : i64} {
  func.func @_conv3x3_bn_in_kernel(%arg0: i32, %arg1: i32, %arg2: memref<1x4xf32, #tpu.memory_space<vmem>>, %arg3: memref<1x4xf32, #tpu.memory_space<vmem>>, %arg4: memref<36x8xbf16, #tpu.memory_space<vmem>>, %arg5: memref<1x8xf32, #tpu.memory_space<vmem>>, %arg6: memref<1x16x16x4xf32, #tpu.memory_space<vmem>>, %arg7: memref<1x8x16x8xf32, #tpu.memory_space<vmem>>, %arg8: memref<1x1x2x8xf32, #tpu.memory_space<vmem>>, %arg9: memref<10x18x4xbf16, #tpu.memory_space<vmem>>) attributes {dimension_semantics = [#tpu.dimension_semantics<parallel>, #tpu.dimension_semantics<parallel>], iteration_bounds = array<i64: 2, 2>, scalar_prefetch = 0 : i64, scratch_operands = 1 : i64, tpu.core_type = #tpu.core_type<tc>, window_params = [{pipeline_mode = #tpu.pipeline_mode<synchronous>, transform_indices = @transform_0, window_bounds = array<i64: 1, 4>}, {pipeline_mode = #tpu.pipeline_mode<synchronous>, transform_indices = @transform_1, window_bounds = array<i64: 1, 4>}, {pipeline_mode = #tpu.pipeline_mode<synchronous>, transform_indices = @transform_2, window_bounds = array<i64: 36, 8>}, {pipeline_mode = #tpu.pipeline_mode<synchronous>, transform_indices = @transform_3, window_bounds = array<i64: 1, 8>}, {transform_indices = @transform_4, window_bounds = array<i64: 1, 16, 16, 4>}, {transform_indices = @transform_5, window_bounds = array<i64: 1, 8, 16, 8>}, {transform_indices = @transform_6, window_bounds = array<i64: 1, 1, 2, 8>}]} {
    %c8_i32 = arith.constant 8 : i32
    %0 = arith.muli %arg1, %c8_i32 : i32
    %c0 = arith.constant 0 : index
    %c0_0 = arith.constant 0 : index
    %1 = vector.load %arg2[%c0, %c0_0] : memref<1x4xf32, #tpu.memory_space<vmem>>, vector<1x4xf32>
    %c0_1 = arith.constant 0 : index
    %c0_2 = arith.constant 0 : index
    %2 = vector.load %arg3[%c0_1, %c0_2] : memref<1x4xf32, #tpu.memory_space<vmem>>, vector<1x4xf32>
    %c0_3 = arith.constant 0 : index
    %c0_4 = arith.constant 0 : index
    %3 = vector.load %arg5[%c0_3, %c0_4] : memref<1x8xf32, #tpu.memory_space<vmem>>, vector<1x8xf32>
    %cst = arith.constant 0.000000e+00 : bf16
    %4 = vector.broadcast %cst : bf16 to vector<1x1x4xbf16>
    %c0_i32 = arith.constant 0 : i32
    %c1_i32 = arith.constant 1 : i32
    %5 = arith.subi %0, %c1_i32 : i32
    %6 = arith.addi %5, %c0_i32 : i32
    %c0_i32_5 = arith.constant 0 : i32
    %7 = arith.cmpi sge, %6, %c0_i32_5 : i32
    %c16_i32 = arith.constant 16 : i32
    %8 = arith.cmpi slt, %6, %c16_i32 : i32
    %9 = arith.andi %7, %8 : i1
    %c0_i32_6 = arith.constant 0 : i32
    %c15_i32 = arith.constant 15 : i32
    %10 = arith.maxsi %c0_i32_6, %6 : i32
    %11 = arith.minsi %c15_i32, %10 : i32
    %c0_7 = arith.constant 0 : index
    %12 = arith.index_cast %11 : i32 to index
    %c0_8 = arith.constant 0 : index
    %c0_9 = arith.constant 0 : index
    %13 = vector.load %arg6[%c0_7, %12, %c0_8, %c0_9] : memref<1x16x16x4xf32, #tpu.memory_space<vmem>>, vector<1x1x16x4xf32>
    %14 = vector.shape_cast %13 : vector<1x1x16x4xf32> to vector<1x16x4xf32>
    %15 = vector.shape_cast %1 : vector<1x4xf32> to vector<1x1x4xf32>
    %16 = vector.broadcast %15 : vector<1x1x4xf32> to vector<1x16x4xf32>
    %17 = arith.mulf %14, %16 : vector<1x16x4xf32>
    %18 = vector.shape_cast %2 : vector<1x4xf32> to vector<1x1x4xf32>
    %19 = vector.broadcast %18 : vector<1x1x4xf32> to vector<1x16x4xf32>
    %20 = arith.addf %17, %19 : vector<1x16x4xf32>
    %cst_10 = arith.constant 1.000000e+00 : f32
    %cst_11 = arith.constant 0.000000e+00 : f32
    %21 = arith.select %9, %cst_10, %cst_11 : f32
    %22 = vector.broadcast %21 : f32 to vector<1x16x4xf32>
    %23 = arith.mulf %20, %22 : vector<1x16x4xf32>
    %24 = arith.truncf %23 : vector<1x16x4xf32> to vector<1x16x4xbf16>
    %25 = tpu.concatenate %4, %24, %4 in 1 : vector<1x1x4xbf16>, vector<1x16x4xbf16>, vector<1x1x4xbf16> -> vector<1x18x4xbf16>
    %26 = arith.index_cast %c0_i32 : i32 to index
    %c0_12 = arith.constant 0 : index
    %c0_13 = arith.constant 0 : index
    %27 = vector.load %arg9[%26, %c0_12, %c0_13] : memref<10x18x4xbf16, #tpu.memory_space<vmem>>, vector<1x18x4xbf16>
    tpu.vector_store %arg9[%26, %c0_12, %c0_13], %25 {strides = array<i32>} : memref<10x18x4xbf16, #tpu.memory_space<vmem>>, vector<1x18x4xbf16>,
    %c1_i32_14 = arith.constant 1 : i32
    %c1_i32_15 = arith.constant 1 : i32
    %28 = arith.subi %0, %c1_i32_15 : i32
    %29 = arith.addi %28, %c1_i32_14 : i32
    %c0_i32_16 = arith.constant 0 : i32
    %30 = arith.cmpi sge, %29, %c0_i32_16 : i32
    %c16_i32_17 = arith.constant 16 : i32
    %31 = arith.cmpi slt, %29, %c16_i32_17 : i32
    %32 = arith.andi %30, %31 : i1
    %c0_i32_18 = arith.constant 0 : i32
    %c15_i32_19 = arith.constant 15 : i32
    %33 = arith.maxsi %c0_i32_18, %29 : i32
    %34 = arith.minsi %c15_i32_19, %33 : i32
    %c0_20 = arith.constant 0 : index
    %35 = arith.index_cast %34 : i32 to index
    %c0_21 = arith.constant 0 : index
    %c0_22 = arith.constant 0 : index
    %36 = vector.load %arg6[%c0_20, %35, %c0_21, %c0_22] : memref<1x16x16x4xf32, #tpu.memory_space<vmem>>, vector<1x1x16x4xf32>
    %37 = vector.shape_cast %36 : vector<1x1x16x4xf32> to vector<1x16x4xf32>
    %38 = vector.shape_cast %1 : vector<1x4xf32> to vector<1x1x4xf32>
    %39 = vector.broadcast %38 : vector<1x1x4xf32> to vector<1x16x4xf32>
    %40 = arith.mulf %37, %39 : vector<1x16x4xf32>
    %41 = vector.shape_cast %2 : vector<1x4xf32> to vector<1x1x4xf32>
    %42 = vector.broadcast %41 : vector<1x1x4xf32> to vector<1x16x4xf32>
    %43 = arith.addf %40, %42 : vector<1x16x4xf32>
    %cst_23 = arith.constant 1.000000e+00 : f32
    %cst_24 = arith.constant 0.000000e+00 : f32
    %44 = arith.select %32, %cst_23, %cst_24 : f32
    %45 = vector.broadcast %44 : f32 to vector<1x16x4xf32>
    %46 = arith.mulf %43, %45 : vector<1x16x4xf32>
    %47 = arith.truncf %46 : vector<1x16x4xf32> to vector<1x16x4xbf16>
    %48 = tpu.concatenate %4, %47, %4 in 1 : vector<1x1x4xbf16>, vector<1x16x4xbf16>, vector<1x1x4xbf16> -> vector<1x18x4xbf16>
    %49 = arith.index_cast %c1_i32_14 : i32 to index
    %c0_25 = arith.constant 0 : index
    %c0_26 = arith.constant 0 : index
    %50 = vector.load %arg9[%49, %c0_25, %c0_26] : memref<10x18x4xbf16, #tpu.memory_space<vmem>>, vector<1x18x4xbf16>
    tpu.vector_store %arg9[%49, %c0_25, %c0_26], %48 {strides = array<i32>} : memref<10x18x4xbf16, #tpu.memory_space<vmem>>, vector<1x18x4xbf16>,
    %c2_i32 = arith.constant 2 : i32
    %c1_i32_27 = arith.constant 1 : i32
    %51 = arith.subi %0, %c1_i32_27 : i32
    %52 = arith.addi %51, %c2_i32 : i32
    %c0_i32_28 = arith.constant 0 : i32
    %53 = arith.cmpi sge, %52, %c0_i32_28 : i32
    %c16_i32_29 = arith.constant 16 : i32
    %54 = arith.cmpi slt, %52, %c16_i32_29 : i32
    %55 = arith.andi %53, %54 : i1
    %c0_i32_30 = arith.constant 0 : i32
    %c15_i32_31 = arith.constant 15 : i32
    %56 = arith.maxsi %c0_i32_30, %52 : i32
    %57 = arith.minsi %c15_i32_31, %56 : i32
    %c0_32 = arith.constant 0 : index
    %58 = arith.index_cast %57 : i32 to index
    %c0_33 = arith.constant 0 : index
    %c0_34 = arith.constant 0 : index
    %59 = vector.load %arg6[%c0_32, %58, %c0_33, %c0_34] : memref<1x16x16x4xf32, #tpu.memory_space<vmem>>, vector<1x1x16x4xf32>
    %60 = vector.shape_cast %59 : vector<1x1x16x4xf32> to vector<1x16x4xf32>
    %61 = vector.shape_cast %1 : vector<1x4xf32> to vector<1x1x4xf32>
    %62 = vector.broadcast %61 : vector<1x1x4xf32> to vector<1x16x4xf32>
    %63 = arith.mulf %60, %62 : vector<1x16x4xf32>
    %64 = vector.shape_cast %2 : vector<1x4xf32> to vector<1x1x4xf32>
    %65 = vector.broadcast %64 : vector<1x1x4xf32> to vector<1x16x4xf32>
    %66 = arith.addf %63, %65 : vector<1x16x4xf32>
    %cst_35 = arith.constant 1.000000e+00 : f32
    %cst_36 = arith.constant 0.000000e+00 : f32
    %67 = arith.select %55, %cst_35, %cst_36 : f32
    %68 = vector.broadcast %67 : f32 to vector<1x16x4xf32>
    %69 = arith.mulf %66, %68 : vector<1x16x4xf32>
    %70 = arith.truncf %69 : vector<1x16x4xf32> to vector<1x16x4xbf16>
    %71 = tpu.concatenate %4, %70, %4 in 1 : vector<1x1x4xbf16>, vector<1x16x4xbf16>, vector<1x1x4xbf16> -> vector<1x18x4xbf16>
    %72 = arith.index_cast %c2_i32 : i32 to index
    %c0_37 = arith.constant 0 : index
    %c0_38 = arith.constant 0 : index
    %73 = vector.load %arg9[%72, %c0_37, %c0_38] : memref<10x18x4xbf16, #tpu.memory_space<vmem>>, vector<1x18x4xbf16>
    tpu.vector_store %arg9[%72, %c0_37, %c0_38], %71 {strides = array<i32>} : memref<10x18x4xbf16, #tpu.memory_space<vmem>>, vector<1x18x4xbf16>,
    %c3_i32 = arith.constant 3 : i32
    %c1_i32_39 = arith.constant 1 : i32
    %74 = arith.subi %0, %c1_i32_39 : i32
    %75 = arith.addi %74, %c3_i32 : i32
    %c0_i32_40 = arith.constant 0 : i32
    %76 = arith.cmpi sge, %75, %c0_i32_40 : i32
    %c16_i32_41 = arith.constant 16 : i32
    %77 = arith.cmpi slt, %75, %c16_i32_41 : i32
    %78 = arith.andi %76, %77 : i1
    %c0_i32_42 = arith.constant 0 : i32
    %c15_i32_43 = arith.constant 15 : i32
    %79 = arith.maxsi %c0_i32_42, %75 : i32
    %80 = arith.minsi %c15_i32_43, %79 : i32
    %c0_44 = arith.constant 0 : index
    %81 = arith.index_cast %80 : i32 to index
    %c0_45 = arith.constant 0 : index
    %c0_46 = arith.constant 0 : index
    %82 = vector.load %arg6[%c0_44, %81, %c0_45, %c0_46] : memref<1x16x16x4xf32, #tpu.memory_space<vmem>>, vector<1x1x16x4xf32>
    %83 = vector.shape_cast %82 : vector<1x1x16x4xf32> to vector<1x16x4xf32>
    %84 = vector.shape_cast %1 : vector<1x4xf32> to vector<1x1x4xf32>
    %85 = vector.broadcast %84 : vector<1x1x4xf32> to vector<1x16x4xf32>
    %86 = arith.mulf %83, %85 : vector<1x16x4xf32>
    %87 = vector.shape_cast %2 : vector<1x4xf32> to vector<1x1x4xf32>
    %88 = vector.broadcast %87 : vector<1x1x4xf32> to vector<1x16x4xf32>
    %89 = arith.addf %86, %88 : vector<1x16x4xf32>
    %cst_47 = arith.constant 1.000000e+00 : f32
    %cst_48 = arith.constant 0.000000e+00 : f32
    %90 = arith.select %78, %cst_47, %cst_48 : f32
    %91 = vector.broadcast %90 : f32 to vector<1x16x4xf32>
    %92 = arith.mulf %89, %91 : vector<1x16x4xf32>
    %93 = arith.truncf %92 : vector<1x16x4xf32> to vector<1x16x4xbf16>
    %94 = tpu.concatenate %4, %93, %4 in 1 : vector<1x1x4xbf16>, vector<1x16x4xbf16>, vector<1x1x4xbf16> -> vector<1x18x4xbf16>
    %95 = arith.index_cast %c3_i32 : i32 to index
    %c0_49 = arith.constant 0 : index
    %c0_50 = arith.constant 0 : index
    %96 = vector.load %arg9[%95, %c0_49, %c0_50] : memref<10x18x4xbf16, #tpu.memory_space<vmem>>, vector<1x18x4xbf16>
    tpu.vector_store %arg9[%95, %c0_49, %c0_50], %94 {strides = array<i32>} : memref<10x18x4xbf16, #tpu.memory_space<vmem>>, vector<1x18x4xbf16>,
    %c4_i32 = arith.constant 4 : i32
    %c1_i32_51 = arith.constant 1 : i32
    %97 = arith.subi %0, %c1_i32_51 : i32
    %98 = arith.addi %97, %c4_i32 : i32
    %c0_i32_52 = arith.constant 0 : i32
    %99 = arith.cmpi sge, %98, %c0_i32_52 : i32
    %c16_i32_53 = arith.constant 16 : i32
    %100 = arith.cmpi slt, %98, %c16_i32_53 : i32
    %101 = arith.andi %99, %100 : i1
    %c0_i32_54 = arith.constant 0 : i32
    %c15_i32_55 = arith.constant 15 : i32
    %102 = arith.maxsi %c0_i32_54, %98 : i32
    %103 = arith.minsi %c15_i32_55, %102 : i32
    %c0_56 = arith.constant 0 : index
    %104 = arith.index_cast %103 : i32 to index
    %c0_57 = arith.constant 0 : index
    %c0_58 = arith.constant 0 : index
    %105 = vector.load %arg6[%c0_56, %104, %c0_57, %c0_58] : memref<1x16x16x4xf32, #tpu.memory_space<vmem>>, vector<1x1x16x4xf32>
    %106 = vector.shape_cast %105 : vector<1x1x16x4xf32> to vector<1x16x4xf32>
    %107 = vector.shape_cast %1 : vector<1x4xf32> to vector<1x1x4xf32>
    %108 = vector.broadcast %107 : vector<1x1x4xf32> to vector<1x16x4xf32>
    %109 = arith.mulf %106, %108 : vector<1x16x4xf32>
    %110 = vector.shape_cast %2 : vector<1x4xf32> to vector<1x1x4xf32>
    %111 = vector.broadcast %110 : vector<1x1x4xf32> to vector<1x16x4xf32>
    %112 = arith.addf %109, %111 : vector<1x16x4xf32>
    %cst_59 = arith.constant 1.000000e+00 : f32
    %cst_60 = arith.constant 0.000000e+00 : f32
    %113 = arith.select %101, %cst_59, %cst_60 : f32
    %114 = vector.broadcast %113 : f32 to vector<1x16x4xf32>
    %115 = arith.mulf %112, %114 : vector<1x16x4xf32>
    %116 = arith.truncf %115 : vector<1x16x4xf32> to vector<1x16x4xbf16>
    %117 = tpu.concatenate %4, %116, %4 in 1 : vector<1x1x4xbf16>, vector<1x16x4xbf16>, vector<1x1x4xbf16> -> vector<1x18x4xbf16>
    %118 = arith.index_cast %c4_i32 : i32 to index
    %c0_61 = arith.constant 0 : index
    %c0_62 = arith.constant 0 : index
    %119 = vector.load %arg9[%118, %c0_61, %c0_62] : memref<10x18x4xbf16, #tpu.memory_space<vmem>>, vector<1x18x4xbf16>
    tpu.vector_store %arg9[%118, %c0_61, %c0_62], %117 {strides = array<i32>} : memref<10x18x4xbf16, #tpu.memory_space<vmem>>, vector<1x18x4xbf16>,
    %c5_i32 = arith.constant 5 : i32
    %c1_i32_63 = arith.constant 1 : i32
    %120 = arith.subi %0, %c1_i32_63 : i32
    %121 = arith.addi %120, %c5_i32 : i32
    %c0_i32_64 = arith.constant 0 : i32
    %122 = arith.cmpi sge, %121, %c0_i32_64 : i32
    %c16_i32_65 = arith.constant 16 : i32
    %123 = arith.cmpi slt, %121, %c16_i32_65 : i32
    %124 = arith.andi %122, %123 : i1
    %c0_i32_66 = arith.constant 0 : i32
    %c15_i32_67 = arith.constant 15 : i32
    %125 = arith.maxsi %c0_i32_66, %121 : i32
    %126 = arith.minsi %c15_i32_67, %125 : i32
    %c0_68 = arith.constant 0 : index
    %127 = arith.index_cast %126 : i32 to index
    %c0_69 = arith.constant 0 : index
    %c0_70 = arith.constant 0 : index
    %128 = vector.load %arg6[%c0_68, %127, %c0_69, %c0_70] : memref<1x16x16x4xf32, #tpu.memory_space<vmem>>, vector<1x1x16x4xf32>
    %129 = vector.shape_cast %128 : vector<1x1x16x4xf32> to vector<1x16x4xf32>
    %130 = vector.shape_cast %1 : vector<1x4xf32> to vector<1x1x4xf32>
    %131 = vector.broadcast %130 : vector<1x1x4xf32> to vector<1x16x4xf32>
    %132 = arith.mulf %129, %131 : vector<1x16x4xf32>
    %133 = vector.shape_cast %2 : vector<1x4xf32> to vector<1x1x4xf32>
    %134 = vector.broadcast %133 : vector<1x1x4xf32> to vector<1x16x4xf32>
    %135 = arith.addf %132, %134 : vector<1x16x4xf32>
    %cst_71 = arith.constant 1.000000e+00 : f32
    %cst_72 = arith.constant 0.000000e+00 : f32
    %136 = arith.select %124, %cst_71, %cst_72 : f32
    %137 = vector.broadcast %136 : f32 to vector<1x16x4xf32>
    %138 = arith.mulf %135, %137 : vector<1x16x4xf32>
    %139 = arith.truncf %138 : vector<1x16x4xf32> to vector<1x16x4xbf16>
    %140 = tpu.concatenate %4, %139, %4 in 1 : vector<1x1x4xbf16>, vector<1x16x4xbf16>, vector<1x1x4xbf16> -> vector<1x18x4xbf16>
    %141 = arith.index_cast %c5_i32 : i32 to index
    %c0_73 = arith.constant 0 : index
    %c0_74 = arith.constant 0 : index
    %142 = vector.load %arg9[%141, %c0_73, %c0_74] : memref<10x18x4xbf16, #tpu.memory_space<vmem>>, vector<1x18x4xbf16>
    tpu.vector_store %arg9[%141, %c0_73, %c0_74], %140 {strides = array<i32>} : memref<10x18x4xbf16, #tpu.memory_space<vmem>>, vector<1x18x4xbf16>,
    %c6_i32 = arith.constant 6 : i32
    %c1_i32_75 = arith.constant 1 : i32
    %143 = arith.subi %0, %c1_i32_75 : i32
    %144 = arith.addi %143, %c6_i32 : i32
    %c0_i32_76 = arith.constant 0 : i32
    %145 = arith.cmpi sge, %144, %c0_i32_76 : i32
    %c16_i32_77 = arith.constant 16 : i32
    %146 = arith.cmpi slt, %144, %c16_i32_77 : i32
    %147 = arith.andi %145, %146 : i1
    %c0_i32_78 = arith.constant 0 : i32
    %c15_i32_79 = arith.constant 15 : i32
    %148 = arith.maxsi %c0_i32_78, %144 : i32
    %149 = arith.minsi %c15_i32_79, %148 : i32
    %c0_80 = arith.constant 0 : index
    %150 = arith.index_cast %149 : i32 to index
    %c0_81 = arith.constant 0 : index
    %c0_82 = arith.constant 0 : index
    %151 = vector.load %arg6[%c0_80, %150, %c0_81, %c0_82] : memref<1x16x16x4xf32, #tpu.memory_space<vmem>>, vector<1x1x16x4xf32>
    %152 = vector.shape_cast %151 : vector<1x1x16x4xf32> to vector<1x16x4xf32>
    %153 = vector.shape_cast %1 : vector<1x4xf32> to vector<1x1x4xf32>
    %154 = vector.broadcast %153 : vector<1x1x4xf32> to vector<1x16x4xf32>
    %155 = arith.mulf %152, %154 : vector<1x16x4xf32>
    %156 = vector.shape_cast %2 : vector<1x4xf32> to vector<1x1x4xf32>
    %157 = vector.broadcast %156 : vector<1x1x4xf32> to vector<1x16x4xf32>
    %158 = arith.addf %155, %157 : vector<1x16x4xf32>
    %cst_83 = arith.constant 1.000000e+00 : f32
    %cst_84 = arith.constant 0.000000e+00 : f32
    %159 = arith.select %147, %cst_83, %cst_84 : f32
    %160 = vector.broadcast %159 : f32 to vector<1x16x4xf32>
    %161 = arith.mulf %158, %160 : vector<1x16x4xf32>
    %162 = arith.truncf %161 : vector<1x16x4xf32> to vector<1x16x4xbf16>
    %163 = tpu.concatenate %4, %162, %4 in 1 : vector<1x1x4xbf16>, vector<1x16x4xbf16>, vector<1x1x4xbf16> -> vector<1x18x4xbf16>
    %164 = arith.index_cast %c6_i32 : i32 to index
    %c0_85 = arith.constant 0 : index
    %c0_86 = arith.constant 0 : index
    %165 = vector.load %arg9[%164, %c0_85, %c0_86] : memref<10x18x4xbf16, #tpu.memory_space<vmem>>, vector<1x18x4xbf16>
    tpu.vector_store %arg9[%164, %c0_85, %c0_86], %163 {strides = array<i32>} : memref<10x18x4xbf16, #tpu.memory_space<vmem>>, vector<1x18x4xbf16>,
    %c7_i32 = arith.constant 7 : i32
    %c1_i32_87 = arith.constant 1 : i32
    %166 = arith.subi %0, %c1_i32_87 : i32
    %167 = arith.addi %166, %c7_i32 : i32
    %c0_i32_88 = arith.constant 0 : i32
    %168 = arith.cmpi sge, %167, %c0_i32_88 : i32
    %c16_i32_89 = arith.constant 16 : i32
    %169 = arith.cmpi slt, %167, %c16_i32_89 : i32
    %170 = arith.andi %168, %169 : i1
    %c0_i32_90 = arith.constant 0 : i32
    %c15_i32_91 = arith.constant 15 : i32
    %171 = arith.maxsi %c0_i32_90, %167 : i32
    %172 = arith.minsi %c15_i32_91, %171 : i32
    %c0_92 = arith.constant 0 : index
    %173 = arith.index_cast %172 : i32 to index
    %c0_93 = arith.constant 0 : index
    %c0_94 = arith.constant 0 : index
    %174 = vector.load %arg6[%c0_92, %173, %c0_93, %c0_94] : memref<1x16x16x4xf32, #tpu.memory_space<vmem>>, vector<1x1x16x4xf32>
    %175 = vector.shape_cast %174 : vector<1x1x16x4xf32> to vector<1x16x4xf32>
    %176 = vector.shape_cast %1 : vector<1x4xf32> to vector<1x1x4xf32>
    %177 = vector.broadcast %176 : vector<1x1x4xf32> to vector<1x16x4xf32>
    %178 = arith.mulf %175, %177 : vector<1x16x4xf32>
    %179 = vector.shape_cast %2 : vector<1x4xf32> to vector<1x1x4xf32>
    %180 = vector.broadcast %179 : vector<1x1x4xf32> to vector<1x16x4xf32>
    %181 = arith.addf %178, %180 : vector<1x16x4xf32>
    %cst_95 = arith.constant 1.000000e+00 : f32
    %cst_96 = arith.constant 0.000000e+00 : f32
    %182 = arith.select %170, %cst_95, %cst_96 : f32
    %183 = vector.broadcast %182 : f32 to vector<1x16x4xf32>
    %184 = arith.mulf %181, %183 : vector<1x16x4xf32>
    %185 = arith.truncf %184 : vector<1x16x4xf32> to vector<1x16x4xbf16>
    %186 = tpu.concatenate %4, %185, %4 in 1 : vector<1x1x4xbf16>, vector<1x16x4xbf16>, vector<1x1x4xbf16> -> vector<1x18x4xbf16>
    %187 = arith.index_cast %c7_i32 : i32 to index
    %c0_97 = arith.constant 0 : index
    %c0_98 = arith.constant 0 : index
    %188 = vector.load %arg9[%187, %c0_97, %c0_98] : memref<10x18x4xbf16, #tpu.memory_space<vmem>>, vector<1x18x4xbf16>
    tpu.vector_store %arg9[%187, %c0_97, %c0_98], %186 {strides = array<i32>} : memref<10x18x4xbf16, #tpu.memory_space<vmem>>, vector<1x18x4xbf16>,
    %c8_i32_99 = arith.constant 8 : i32
    %c1_i32_100 = arith.constant 1 : i32
    %189 = arith.subi %0, %c1_i32_100 : i32
    %190 = arith.addi %189, %c8_i32_99 : i32
    %c0_i32_101 = arith.constant 0 : i32
    %191 = arith.cmpi sge, %190, %c0_i32_101 : i32
    %c16_i32_102 = arith.constant 16 : i32
    %192 = arith.cmpi slt, %190, %c16_i32_102 : i32
    %193 = arith.andi %191, %192 : i1
    %c0_i32_103 = arith.constant 0 : i32
    %c15_i32_104 = arith.constant 15 : i32
    %194 = arith.maxsi %c0_i32_103, %190 : i32
    %195 = arith.minsi %c15_i32_104, %194 : i32
    %c0_105 = arith.constant 0 : index
    %196 = arith.index_cast %195 : i32 to index
    %c0_106 = arith.constant 0 : index
    %c0_107 = arith.constant 0 : index
    %197 = vector.load %arg6[%c0_105, %196, %c0_106, %c0_107] : memref<1x16x16x4xf32, #tpu.memory_space<vmem>>, vector<1x1x16x4xf32>
    %198 = vector.shape_cast %197 : vector<1x1x16x4xf32> to vector<1x16x4xf32>
    %199 = vector.shape_cast %1 : vector<1x4xf32> to vector<1x1x4xf32>
    %200 = vector.broadcast %199 : vector<1x1x4xf32> to vector<1x16x4xf32>
    %201 = arith.mulf %198, %200 : vector<1x16x4xf32>
    %202 = vector.shape_cast %2 : vector<1x4xf32> to vector<1x1x4xf32>
    %203 = vector.broadcast %202 : vector<1x1x4xf32> to vector<1x16x4xf32>
    %204 = arith.addf %201, %203 : vector<1x16x4xf32>
    %cst_108 = arith.constant 1.000000e+00 : f32
    %cst_109 = arith.constant 0.000000e+00 : f32
    %205 = arith.select %193, %cst_108, %cst_109 : f32
    %206 = vector.broadcast %205 : f32 to vector<1x16x4xf32>
    %207 = arith.mulf %204, %206 : vector<1x16x4xf32>
    %208 = arith.truncf %207 : vector<1x16x4xf32> to vector<1x16x4xbf16>
    %209 = tpu.concatenate %4, %208, %4 in 1 : vector<1x1x4xbf16>, vector<1x16x4xbf16>, vector<1x1x4xbf16> -> vector<1x18x4xbf16>
    %210 = arith.index_cast %c8_i32_99 : i32 to index
    %c0_110 = arith.constant 0 : index
    %c0_111 = arith.constant 0 : index
    %211 = vector.load %arg9[%210, %c0_110, %c0_111] : memref<10x18x4xbf16, #tpu.memory_space<vmem>>, vector<1x18x4xbf16>
    tpu.vector_store %arg9[%210, %c0_110, %c0_111], %209 {strides = array<i32>} : memref<10x18x4xbf16, #tpu.memory_space<vmem>>, vector<1x18x4xbf16>,
    %c9_i32 = arith.constant 9 : i32
    %c1_i32_112 = arith.constant 1 : i32
    %212 = arith.subi %0, %c1_i32_112 : i32
    %213 = arith.addi %212, %c9_i32 : i32
    %c0_i32_113 = arith.constant 0 : i32
    %214 = arith.cmpi sge, %213, %c0_i32_113 : i32
    %c16_i32_114 = arith.constant 16 : i32
    %215 = arith.cmpi slt, %213, %c16_i32_114 : i32
    %216 = arith.andi %214, %215 : i1
    %c0_i32_115 = arith.constant 0 : i32
    %c15_i32_116 = arith.constant 15 : i32
    %217 = arith.maxsi %c0_i32_115, %213 : i32
    %218 = arith.minsi %c15_i32_116, %217 : i32
    %c0_117 = arith.constant 0 : index
    %219 = arith.index_cast %218 : i32 to index
    %c0_118 = arith.constant 0 : index
    %c0_119 = arith.constant 0 : index
    %220 = vector.load %arg6[%c0_117, %219, %c0_118, %c0_119] : memref<1x16x16x4xf32, #tpu.memory_space<vmem>>, vector<1x1x16x4xf32>
    %221 = vector.shape_cast %220 : vector<1x1x16x4xf32> to vector<1x16x4xf32>
    %222 = vector.shape_cast %1 : vector<1x4xf32> to vector<1x1x4xf32>
    %223 = vector.broadcast %222 : vector<1x1x4xf32> to vector<1x16x4xf32>
    %224 = arith.mulf %221, %223 : vector<1x16x4xf32>
    %225 = vector.shape_cast %2 : vector<1x4xf32> to vector<1x1x4xf32>
    %226 = vector.broadcast %225 : vector<1x1x4xf32> to vector<1x16x4xf32>
    %227 = arith.addf %224, %226 : vector<1x16x4xf32>
    %cst_120 = arith.constant 1.000000e+00 : f32
    %cst_121 = arith.constant 0.000000e+00 : f32
    %228 = arith.select %216, %cst_120, %cst_121 : f32
    %229 = vector.broadcast %228 : f32 to vector<1x16x4xf32>
    %230 = arith.mulf %227, %229 : vector<1x16x4xf32>
    %231 = arith.truncf %230 : vector<1x16x4xf32> to vector<1x16x4xbf16>
    %232 = tpu.concatenate %4, %231, %4 in 1 : vector<1x1x4xbf16>, vector<1x16x4xbf16>, vector<1x1x4xbf16> -> vector<1x18x4xbf16>
    %233 = arith.index_cast %c9_i32 : i32 to index
    %c0_122 = arith.constant 0 : index
    %c0_123 = arith.constant 0 : index
    %234 = vector.load %arg9[%233, %c0_122, %c0_123] : memref<10x18x4xbf16, #tpu.memory_space<vmem>>, vector<1x18x4xbf16>
    tpu.vector_store %arg9[%233, %c0_122, %c0_123], %232 {strides = array<i32>} : memref<10x18x4xbf16, #tpu.memory_space<vmem>>, vector<1x18x4xbf16>,
    %c10_i32 = arith.constant 10 : i32
    %c0_124 = arith.constant 0 : index
    %c0_125 = arith.constant 0 : index
    %c0_126 = arith.constant 0 : index
    %235 = vector.load %arg9[%c0_124, %c0_125, %c0_126] : memref<10x18x4xbf16, #tpu.memory_space<vmem>>, vector<8x16x4xbf16>
    %236 = vector.shape_cast %235 : vector<8x16x4xbf16> to vector<128x4xbf16>
    %c0_127 = arith.constant 0 : index
    %c1 = arith.constant 1 : index
    %c0_128 = arith.constant 0 : index
    %237 = vector.load %arg9[%c0_127, %c1, %c0_128] : memref<10x18x4xbf16, #tpu.memory_space<vmem>>, vector<8x16x4xbf16>
    %238 = vector.shape_cast %237 : vector<8x16x4xbf16> to vector<128x4xbf16>
    %c0_129 = arith.constant 0 : index
    %c2 = arith.constant 2 : index
    %c0_130 = arith.constant 0 : index
    %239 = vector.load %arg9[%c0_129, %c2, %c0_130] : memref<10x18x4xbf16, #tpu.memory_space<vmem>>, vector<8x16x4xbf16>
    %240 = vector.shape_cast %239 : vector<8x16x4xbf16> to vector<128x4xbf16>
    %c1_131 = arith.constant 1 : index
    %c0_132 = arith.constant 0 : index
    %c0_133 = arith.constant 0 : index
    %241 = vector.load %arg9[%c1_131, %c0_132, %c0_133] : memref<10x18x4xbf16, #tpu.memory_space<vmem>>, vector<8x16x4xbf16>
    %242 = vector.shape_cast %241 : vector<8x16x4xbf16> to vector<128x4xbf16>
    %c1_134 = arith.constant 1 : index
    %c1_135 = arith.constant 1 : index
    %c0_136 = arith.constant 0 : index
    %243 = vector.load %arg9[%c1_134, %c1_135, %c0_136] : memref<10x18x4xbf16, #tpu.memory_space<vmem>>, vector<8x16x4xbf16>
    %244 = vector.shape_cast %243 : vector<8x16x4xbf16> to vector<128x4xbf16>
    %c1_137 = arith.constant 1 : index
    %c2_138 = arith.constant 2 : index
    %c0_139 = arith.constant 0 : index
    %245 = vector.load %arg9[%c1_137, %c2_138, %c0_139] : memref<10x18x4xbf16, #tpu.memory_space<vmem>>, vector<8x16x4xbf16>
    %246 = vector.shape_cast %245 : vector<8x16x4xbf16> to vector<128x4xbf16>
    %c2_140 = arith.constant 2 : index
    %c0_141 = arith.constant 0 : index
    %c0_142 = arith.constant 0 : index
    %247 = vector.load %arg9[%c2_140, %c0_141, %c0_142] : memref<10x18x4xbf16, #tpu.memory_space<vmem>>, vector<8x16x4xbf16>
    %248 = vector.shape_cast %247 : vector<8x16x4xbf16> to vector<128x4xbf16>
    %c2_143 = arith.constant 2 : index
    %c1_144 = arith.constant 1 : index
    %c0_145 = arith.constant 0 : index
    %249 = vector.load %arg9[%c2_143, %c1_144, %c0_145] : memref<10x18x4xbf16, #tpu.memory_space<vmem>>, vector<8x16x4xbf16>
    %250 = vector.shape_cast %249 : vector<8x16x4xbf16> to vector<128x4xbf16>
    %c2_146 = arith.constant 2 : index
    %c2_147 = arith.constant 2 : index
    %c0_148 = arith.constant 0 : index
    %251 = vector.load %arg9[%c2_146, %c2_147, %c0_148] : memref<10x18x4xbf16, #tpu.memory_space<vmem>>, vector<8x16x4xbf16>
    %252 = vector.shape_cast %251 : vector<8x16x4xbf16> to vector<128x4xbf16>
    %253 = tpu.concatenate %236, %238, %240, %242, %244, %246, %248, %250, %252 in 1 : vector<128x4xbf16>, vector<128x4xbf16>, vector<128x4xbf16>, vector<128x4xbf16>, vector<128x4xbf16>, vector<128x4xbf16>, vector<128x4xbf16>, vector<128x4xbf16>, vector<128x4xbf16> -> vector<128x36xbf16>
    %c0_149 = arith.constant 0 : index
    %c0_150 = arith.constant 0 : index
    %254 = vector.load %arg4[%c0_149, %c0_150] : memref<36x8xbf16, #tpu.memory_space<vmem>>, vector<36x8xbf16>
    %cst_151 = arith.constant dense<0.000000e+00> : vector<128x8xf32>
    %255 = tpu.matmul %253, %254, %cst_151 {dimension_numbers = #tpu.dot_dimension_numbers<[1], [0], [0], [1], [0, 0, 1, 1], [], []>} : vector<128x36xbf16>, vector<36x8xbf16>, vector<128x8xf32> -> vector<128x8xf32>
    %256 = vector.broadcast %3 : vector<1x8xf32> to vector<128x8xf32>
    %257 = arith.addf %255, %256 : vector<128x8xf32>
    %258 = vector.shape_cast %257 : vector<128x8xf32> to vector<1x8x16x8xf32>
    %c0_152 = arith.constant 0 : index
    %c0_153 = arith.constant 0 : index
    %c0_154 = arith.constant 0 : index
    %c0_155 = arith.constant 0 : index
    %259 = vector.load %arg7[%c0_152, %c0_153, %c0_154, %c0_155] : memref<1x8x16x8xf32, #tpu.memory_space<vmem>>, vector<1x8x16x8xf32>
    tpu.vector_store %arg7[%c0_152, %c0_153, %c0_154, %c0_155], %258 {strides = array<i32>} : memref<1x8x16x8xf32, #tpu.memory_space<vmem>>, vector<1x8x16x8xf32>,
    %cst_156 = arith.constant dense<0.000000e+00> : vector<8xf32>
    %260 = vector.multi_reduction <add>, %257, %cst_156 [0] : vector<128x8xf32> to vector<8xf32>
    %261 = vector.shape_cast %260 : vector<8xf32> to vector<1x8xf32>
    %262 = arith.mulf %257, %257 : vector<128x8xf32>
    %cst_157 = arith.constant dense<0.000000e+00> : vector<8xf32>
    %263 = vector.multi_reduction <add>, %262, %cst_157 [0] : vector<128x8xf32> to vector<8xf32>
    %264 = vector.shape_cast %263 : vector<8xf32> to vector<1x8xf32>
    %265 = tpu.concatenate %261, %264 in 0 : vector<1x8xf32>, vector<1x8xf32> -> vector<2x8xf32>
    %266 = vector.shape_cast %265 : vector<2x8xf32> to vector<1x1x2x8xf32>
    %c0_158 = arith.constant 0 : index
    %c0_159 = arith.constant 0 : index
    %c0_160 = arith.constant 0 : index
    %c0_161 = arith.constant 0 : index
    %267 = vector.load %arg8[%c0_158, %c0_159, %c0_160, %c0_161] : memref<1x1x2x8xf32, #tpu.memory_space<vmem>>, vector<1x1x2x8xf32>
    tpu.vector_store %arg8[%c0_158, %c0_159, %c0_160, %c0_161], %266 {strides = array<i32>} : memref<1x1x2x8xf32, #tpu.memory_space<vmem>>, vector<1x1x2x8xf32>,
    return
  }
  func.func @transform_0(%arg0: i32, %arg1: i32) -> (i32, i32) {
    %c0_i32 = arith.constant 0 : i32
    %c0_i32_0 = arith.constant 0 : i32
    %c0_i32_1 = arith.constant 0 : i32
    return %c0_i32, %c0_i32_0 : i32, i32
  }
  func.func @transform_1(%arg0: i32, %arg1: i32) -> (i32, i32) {
    %c0_i32 = arith.constant 0 : i32
    %c0_i32_0 = arith.constant 0 : i32
    %c0_i32_1 = arith.constant 0 : i32
    return %c0_i32, %c0_i32_0 : i32, i32
  }
  func.func @transform_2(%arg0: i32, %arg1: i32) -> (i32, i32) {
    %c0_i32 = arith.constant 0 : i32
    %c0_i32_0 = arith.constant 0 : i32
    %c0_i32_1 = arith.constant 0 : i32
    return %c0_i32, %c0_i32_0 : i32, i32
  }
  func.func @transform_3(%arg0: i32, %arg1: i32) -> (i32, i32) {
    %c0_i32 = arith.constant 0 : i32
    %c0_i32_0 = arith.constant 0 : i32
    %c0_i32_1 = arith.constant 0 : i32
    return %c0_i32, %c0_i32_0 : i32, i32
  }
  func.func @transform_4(%arg0: i32, %arg1: i32) -> (i32, i32, i32, i32) {
    %c0_i32 = arith.constant 0 : i32
    %c0_i32_0 = arith.constant 0 : i32
    %c0_i32_1 = arith.constant 0 : i32
    %c0_i32_2 = arith.constant 0 : i32
    return %arg0, %c0_i32, %c0_i32_0, %c0_i32_1 : i32, i32, i32, i32
  }
  func.func @transform_5(%arg0: i32, %arg1: i32) -> (i32, i32, i32, i32) {
    %c0_i32 = arith.constant 0 : i32
    %c0_i32_0 = arith.constant 0 : i32
    %c0_i32_1 = arith.constant 0 : i32
    return %arg0, %arg1, %c0_i32, %c0_i32_0 : i32, i32, i32, i32
  }
  func.func @transform_6(%arg0: i32, %arg1: i32) -> (i32, i32, i32, i32) {
    %c0_i32 = arith.constant 0 : i32
    %c0_i32_0 = arith.constant 0 : i32
    %c0_i32_1 = arith.constant 0 : i32
    return %arg0, %arg1, %c0_i32, %c0_i32_0 : i32, i32, i32, i32
  }
}

</mosaic_0001>

<bundles_post_ra>
// kernel: conv_block_pallas.2
= control target key start
LH: loop header
LB: loop body
LE: loop exit
PB: predicated region body
PF: predicated region fallthrough
CT: control target
= control target key end

     0   :  { %s3088_s21 = smov 0   ;;  %s3090_s22 = smov 0   ;;  %s4408_s0 = inlined_call_operand.vmem [shape: f32[1,4], index: 0, kind: input, shape index: {}]   ;;  %s4409_s1 = inlined_call_operand.vmem [shape: f32[1,4], index: 1, kind: input, shape index: {}]   ;;  %s4410_s2 = inlined_call_operand.vmem [shape: bf16[36,8], index: 2, kind: input, shape index: {}]   ;;  %s4411_s3 = inlined_call_operand.vmem [shape: f32[1,8], index: 3, kind: input, shape index: {}]   ;;  %s4412_s4 = inlined_call_operand.vmem [shape: f32[2,16,16,4], index: 4, kind: input, shape index: {}]   ;;  %s4413_s5 = inlined_call_operand.vmem [shape: f32[2,16,16,8], index: 5, kind: output, shape index: {0}]   ;;  %s4414_s6 = inlined_call_operand.vmem [shape: f32[2,2,2,8], index: 6, kind: output, shape index: {1}]  }
   0x1   :  { %s3092_s23 = smov 0   ;;  %s3094_s24 = smov 0  }
   0x2   :  { %s3096_s25 = smov 0  }
   0x3 LB: > { %s26_s26 = sadd.s32 1, %s3035_s23  ;;  %s29_s27 = sadd.s32 1, %s3039_s24  ;;  %s3043_s25 = sphi %s3096_s25, %s17_s25   ;;  %s3039_s24 = sphi %s3094_s24, %s4456_s24   ;;  %s3035_s23 = sphi %s3092_s23, %s4455_s23   ;;  %s3031_s22 = sphi %s3090_s22, %s4454_s22   ;;  %s3027_s21 = sphi %s3088_s21, %s4453_s21  }
   0x4   : > { %p27_p0 = scmp.ge.s32.totalorder %s26_s26, 2  ;;  %p2643_p1 = scmp.ge.s32.totalorder %s3043_s25, 1 }
   0x5   : > { %p231_p2 = scmp.lt.s32.totalorder %s3043_s25, 5 }
   0x6   : > { %s4458_s26 = smov (%p27_p0, %s26_s26), 0  ;;  %s4460_s27 = smov (!%p27_p0, %s29_s27), %s3039_s24 }
   0x7   : > { %p232_p3 = pnand %p2643_p1, %p231_p2  ;;  %p31_p4 = scmp.ge.s32.totalorder %s4460_s27, 2 }
   0x8   : > { %p274_p5 = scmp.lt.s32.totalorder (!%p232_p3), %s3031_s22, 1  ;;  %s3123_s28 = sshll.u32 (!%p232_p3), %s3027_s21, 3  ;;  %v3148_v0 = vld [vmem:[%s4408_s0] ss:$0 sm:$0xff] (!%p232_p3)  ;;  %vm346_vm0 = vcmask (!%p232_p3), 1040384   ;;  %vm365_vm3 = vcmask (!%p232_p3), 24576  }
   0x9   : > { %s4462_s27 = smov (%p31_p4, %s4460_s27), 0  ;;  %235 = sbr.rel (%p232_p3) target bundleno = 602 (0x25a), region = 40 }
   0xa   : > { %p367_p6 = scmp.ge.s32.totalorder (!%p232_p3), %s3123_s28, 0  ;;  %p368_p7 = scmp.lt.s32.totalorder (!%p232_p3), %s3123_s28, 16  ;;  %v3154_v1 = vld [vmem:[%s4409_s1] ss:$0 sm:$0xff] (!%p232_p3)  ;;  %vm347_vm1 = vsmask.f32 (!%p232_p3), 256 }
   0xb   : > { %p282_p8 = scmp.lt.s32.totalorder (!%p232_p3), %s3123_s28, 15  ;;  %p371_p9 = scmp.gt.s32.totalorder (!%p232_p3), %s3123_s28, 0  ;;  %vm3185_vm2 = vmand (!%p232_p3), %vm346_vm0, %vm347_vm1  ;;  %vm362_vm4 = vcmask (!%p232_p3), 27648   ;;  %vm1049_vm5 = vcmask (!%p232_p3), 1042432   ;;  %vm1050_vm6 = vcmask (!%p232_p3), 1046532   ;;  %vm2084_vm11 = vcmask (!%p232_p3), 31744  }
   0xc   : > { %p3135_p10 = pnand (!%p232_p3), %p368_p7, %p367_p6  ;;  %s414_s12 = sadd.s32 (!%p232_p3), 1, %s3123_s28  ;;  %vm3251_vm7 = vmor (!%p232_p3), %vm1049_vm5, %vm1050_vm6  ;;  %vm822_vm8 = vsmask.f32 (!%p232_p3), 3328  ;;  %vm823_vm9 = vsmask.f32 (!%p232_p3), 7440  ;;  %vm2109_vm12 = vcmask (!%p232_p3), 64512  }
   0xd   : > { %p415_p11 = scmp.ge.s32.totalorder (!%p232_p3), %s414_s12, 0  ;;  %p416_p12 = scmp.lt.s32.totalorder (!%p232_p3), %s414_s12, 16  ;;  %vm3449_vm10 = vmor (!%p232_p3), %vm822_vm8, %vm823_vm9  ;;  %vm2126_vm13 = vcmask (!%p232_p3), 97280   ;;  %vm2143_vm14 = vcmask (!%p232_p3), 130048   ;;  %vm2160_vm15 = vcmask (!%p232_p3), 162816   ;;  %vm2271_vm1 = vcmask (!%p232_p3), 1041408  }
   0xe   : > { %p419_p13 = scmp.gt.s32.totalorder (!%p232_p3), %s414_s12, 0  ;;  %p2676_p0 = scmp.lt.s32.totalorder (!%p232_p3), %s414_s12, 15  ;;  %vm2254_vm5 = vcmask (!%p232_p3), 293888   ;;  %vm2480_vm6 = vcmask (!%p232_p3), 58368  }
   0xf   : > { %p3158_p1 = pnand (!%p232_p3), %p416_p12, %p415_p11  ;;  %s3168_s30 = sadd.s32 (!%p232_p3), 3, %s3123_s28 }
  0x10   : > { %s4464_s22 = smov (!%p274_p5, %s3031_s22), 1  ;;  %s4468_s12 = smov (!%p419_p13, %s414_s12), 0 }
  0x11   : > { %s2866_s29 = sshll.u32 %s4464_s22, 8  ;;  %s4470_s12 = smov (!%p2676_p0, %s4468_s12), 15 }
  0x12   : > { %s3133_s8 = scalar_lea.vmem %s4412_s4, %s2866_s29  ;;  %s462_s29 = sadd.s32 2, %s3123_s28 }
  0x13   : > { %s372_s10 = scalar_select %p371_p9, %s3123_s28, 0 }
  0x14   : > { %s2672_s11 = scalar_select %p3135_p10, 0.0, 1.0 }
  0x15   : > { %s4466_s10 = smov (!%p282_p8, %s372_s10), 15  ;;  %s2681_s7 = sshll.u32 %s4470_s12, 4 }
  0x16   : > { %s2671_s15 = sshll.u32 %s4466_s10, 4  ;;  %v384_v6 = vstv %s2672_s11  ;;  %p463_p2 = scmp.ge.s32.totalorder %s462_s29, 0 }
  0x17   : > { %s376_s16 = scalar_lea.vmem %s3133_s8, %s2671_s15  ;;  %s424_s9 = scalar_lea.vmem %s3133_s8, %s2681_s7 }
  0x18   : > { %v377_v2 = vld [vmem:[%s376_s16] sm:$0xff]  ;;  %v378_v3 = vld [vmem:[%s376_s16 + $0x8] sm:$0xff]  ;;  %s2682_s20 = scalar_select %p3158_p1, 0.0, 1.0 }
  0x19   : > { %v379_v4 = vmul.f32 %v3148_v0, %v377_v2  ;;  %v380_v5 = vmul.f32 %v3148_v0, %v378_v3  ;;  %p464_p3 = scmp.lt.s32.totalorder %s462_s29, 16  ;;  %v425_v12 = vld [vmem:[%s424_s9] sm:$0xff]  ;;  %v426_v13 = vld [vmem:[%s424_s9 + $0x8] sm:$0xff]  ;;  %p467_p4 = scmp.gt.s32.totalorder %s462_s29, 0 }
  0x1a   : > { %p2686_p5 = scmp.lt.s32.totalorder %s462_s29, 15  ;;  %v427_v16 = vmul.f32 %v3148_v0, %v425_v12  ;;  %v428_v17 = vmul.f32 %v3148_v0, %v426_v13  ;;  %p511_p7 = scmp.ge.s32.totalorder %s3168_s30, 0  ;;  %v432_v18 = vstv %s2682_s20 }
  0x1b   : > { %v381_v7 = vadd.f32 %v3154_v1, %v379_v4  ;;  %v382_v8 = vadd.f32 %v3154_v1, %v380_v5  ;;  %p3174_p6 = pnand %p464_p3, %p463_p2  ;;  %p512_p9 = scmp.lt.s32.totalorder %s3168_s30, 16 }
  0x1c   : > { %s468_s11 = scalar_select %p467_p4, %s462_s29, 0  ;;  %v429_v20 = vadd.f32 %v3154_v1, %v427_v16  ;;  %v430_v21 = vadd.f32 %v3154_v1, %v428_v17 }
  0x1d   : > { %v385_v9 = vmul.f32 %v384_v6, %v381_v7  ;;  %v386_v10 = vmul.f32 %v384_v6, %v382_v8  ;;  %s2692_s12 = scalar_select %p3174_p6, 0.0, 1.0 }
  0x1e   : > { %s4472_s11 = smov (!%p2686_p5, %s468_s11), 15  ;;  %v433_v24 = vmul.f32 %v432_v18, %v429_v20  ;;  %v434_v25 = vmul.f32 %v432_v18, %v430_v21  ;;  %p515_p10 = scmp.gt.s32.totalorder %s3168_s30, 0 }
  0x1f   : > { %v387_v11 = vpack.c.bf16 %v386_v10, %v385_v9  ;;  %s2691_s13 = sshll.u32 %s4472_s11, 4  ;;  %p2696_p11 = scmp.lt.s32.totalorder %s3168_s30, 15  ;;  %v480_v38 = vstv %s2692_s12 }
  0x20   : > { %v435_v28 = vpack.c.bf16 %v434_v25, %v433_v24  ;;  %s472_s14 = scalar_lea.vmem %s3133_s8, %s2691_s13  ;;  %p3200_p12 = pnand %p512_p9, %p511_p7 }
  0x21   : > { %v389_v14 = vshrl.u32 %v387_v11, 16  ;;  %v392_v15 = vshll.u32 %v387_v11, 16  ;;  %v473_v32 = vld [vmem:[%s472_s14] sm:$0xff]  ;;  %v474_v33 = vld [vmem:[%s472_s14 + $0x8] sm:$0xff]  ;;  %s516_s16 = scalar_select %p515_p10, %s3168_s30, 0 }
  0x22   : > { %v437_v34 = vshrl.u32 %v435_v28, 16  ;;  %v440_v35 = vshll.u32 %v435_v28, 16  ;;  %v475_v36 = vmul.f32 %v3148_v0, %v473_v32  ;;  %v476_v37 = vmul.f32 %v3148_v0, %v474_v33  ;;  %s2702_s17 = scalar_select %p3200_p12, 0.0, 1.0 }
  0x23   : > { %v391_v19 = vrot.slane %v389_v14, 7  ;;  %s4474_s16 = smov (!%p2696_p11, %s516_s16), 15  ;;  %s3222_s20 = sadd.s32 4294967295, %s3123_s28 }
  0x24   : > { %v439_v39 = vrot.slane %v437_v34, 7  ;;  %v477_v40 = vadd.f32 %v3154_v1, %v475_v36  ;;  %v478_v41 = vadd.f32 %v3154_v1, %v476_v37  ;;  %s2701_s18 = sshll.u32 %s4474_s16, 4  ;;  %p304_p13 = scmp.ge.s32.totalorder %s3222_s20, 0  ;;  %v528_v55 = vstv %s2702_s17 }
  0x25   : > { %v394_v23 = vor.u32 %v392_v15, %v391_v19  ;;  %v398_v26 = vsel %vm3185_vm2, %v391_v19, 0  ;;  %s520_s19 = scalar_lea.vmem %s3133_s8, %s2701_s18  ;;  %p305_p0 = scmp.lt.s32.totalorder %s3222_s20, 16 }
  0x26   : > { %v2675_v29 = vcombine.low %v398_v26, %v398_v26  ;;  %v442_v42 = vor.u32 %v440_v35, %v439_v39  ;;  %v481_v43 = vmul.f32 %v480_v38, %v477_v40  ;;  %v482_v44 = vmul.f32 %v480_v38, %v478_v41  ;;  %v521_v46 = vld [vmem:[%s520_s19] sm:$0xff]  ;;  %v522_v47 = vld [vmem:[%s520_s19 + $0x8] sm:$0xff]  ;;  %p308_p1 = scmp.gt.s32.totalorder %s3222_s20, 0  ;;  %p2654_p2 = scmp.lt.s32.totalorder %s3222_s20, 15 }
  0x27   : > { %v397_v27 = vsel %vm3185_vm2, 0, %v394_v23  ;;  %v446_v45 = vsel %vm3185_vm2, %v439_v39, 0  ;;  %v523_v51 = vmul.f32 %v3148_v0, %v521_v46  ;;  %v524_v52 = vmul.f32 %v3148_v0, %v522_v47  ;;  %p3261_p3 = pnand %p305_p0, %p304_p13  ;;  %s4415_s7 = smov 12  }
  0x28   : > { %v2673_v30 = vcombine.low %v397_v27, %v397_v27  ;;  %v2674_v31 = vcombine.high %v397_v27, %v397_v27  ;;  %413 = vst.msk [vmem:[#allocation2 + $0x14] sm:$0x1] %vm365_vm3, %v2675_v29  ;;  %v2685_v48 = vcombine.low %v446_v45, %v446_v45  ;;  %v445_v49 = vsel %vm3185_vm2, 0, %v442_v42  ;;  %s309_s29 = scalar_select %p308_p1, %s3222_s20, 0 }
  0x29   : > { %v483_v50 = vpack.c.bf16 %v482_v44, %v481_v43  ;;  %v2683_v53 = vcombine.low %v445_v49, %v445_v49  ;;  %v2684_v54 = vcombine.high %v445_v49, %v445_v49  ;;  %v525_v61 = vadd.f32 %v3154_v1, %v523_v51  ;;  %s2662_s11 = scalar_select %p3261_p3, 0.0, 1.0 }
  0x2a   : > { %411 = vst.msk [vmem:[#allocation2 + $0xc] sm:$0xf] %vm362_vm4, %v2673_v30  ;;  %412 = vst.msk [vmem:[#allocation2 + $0x10] sm:$0xf] %vm362_vm4, %v2674_v31  ;;  %v526_v62 = vadd.f32 %v3154_v1, %v524_v52  ;;  %s4476_s29 = smov (!%p2654_p2, %s309_s29), 15  ;;  %s4425_s12 = smov 24  }
  0x2b   : > { %461 = vst.msk [vmem:[#allocation2 + $0x20] sm:$0x1] %vm365_vm3, %v2685_v48  ;;  %v485_v59 = vshrl.u32 %v483_v50, 16  ;;  %v488_v60 = vshll.u32 %v483_v50, 16  ;;  %v529_v8 = vmul.f32 %v528_v55, %v525_v61  ;;  %s2659_s9 = sshll.u32 %s4476_s29, 4  ;;  %s3047_s13 = smov 20  }
  0x2c   : > { %459 = vst.msk [vmem:[#allocation2 + $0x18] sm:$0xf] %vm362_vm4, %v2683_v53  ;;  %460 = vst.msk [vmem:[#allocation2 + $0x1c] sm:$0xf] %vm362_vm4, %v2684_v54  ;;  %v530_v9 = vmul.f32 %v528_v55, %v526_v62  ;;  %s3281_s10 = scalar_lea.vmem %s3133_s8, %s2659_s9  ;;  %s4417_s14 = smov 8  }
  0x2d   : > { %v3247_v7 = vrot.slane %v485_v59, 7  ;;  %v314_v34 = vld [vmem:[%s3281_s10] sm:$0xff]  ;;  %s4419_s15 = smov 32   ;;  %s3492_s16 = sadd.s32 4, %s3123_s28 }
  0x2e   : > { %v531_v19 = vpack.c.bf16 %v530_v9, %v529_v8  ;;  %v322_v41 = vmul.f32 %v3148_v0, %v314_v34  ;;  %p563_p4 = scmp.gt.s32.totalorder %s3492_s16, 0  ;;  %s4427_s17 = smov 4  }
  0x2f   : > { %v3231_v56 = vld [vmem:[#allocation2 + $0x14] sm:$0x1]  ;;  %v490_v18 = vor.u32 %v488_v60, %v3247_v7  ;;  %s3510_s18 = sadd.s32 5, %s3123_s28  ;;  %p2706_p5 = scmp.lt.s32.totalorder %s3492_s16, 15 }
  0x30   : > { %v1361_v20 = vrot.slane %v3231_v56, 5  ;;  %v533_v28 = vshrl.u32 %v531_v19, 16  ;;  %v536_v29 = vshll.u32 %v531_v19, 16  ;;  %v3302_v40 = vld [vmem:[#allocation2 + $0x14] sm:$0x1]  ;;  %v333_v19 = vstv %s2662_s11  ;;  %s564_s19 = scalar_select %p563_p4, %s3492_s16, 0 }
  0x31   : > { %v1108_v57 = vld [vmem:[#allocation2 + $0xc] sm:$0xf]  ;;  %v3235_v58 = vld [vmem:[#allocation2 + $0x10] sm:$0xf]  ;;  %v493_v27 = vsel %vm3185_vm2, 0, %v490_v18  ;;  %v1064_v8 = vrot.slane %v3302_v40, 5  ;;  %v330_v18 = vadd.f32 %v3154_v1, %v322_v41 }
  0x32   : > { %v1142_v63 = vshll.u32 %v3235_v58, 16  ;;  %v1146_v2 = vshrl.u32 %v3235_v58, 16  ;;  %v2804_v3 = vcombine.low %v1108_v57, %v3235_v58  ;;  %v1133_v4 = vshrl.u32 %v1108_v57, 16  ;;  %v1324_v5 = vld [vmem:[#allocation2 + $0xc] sm:$0xe]  ;;  %s4423_s20 = smov 16  }
  0x33   : > { %v1136_v6 = vshll.u32 %v1108_v57, 16  ;;  %v3255_v11 = vld [vmem:[#allocation2 + $0x10] sm:$0xf]  ;;  %v1018_v12 = vld [vmem:[#allocation2 + $0xc] sm:$0xe]  ;;  %v2764_v15 = vrot.slane %v1324_v5, 9  ;;  %v2693_v30 = vcombine.low %v493_v27, %v493_v27  ;;  %v2694_v31 = vcombine.high %v493_v27, %v493_v27 }
  0x34   : > { %v3265_v13 = vrot.slane %v1146_v2, 4  ;;  %1860 = vrot.lane.b32.xlu0 %v2804_v3, %s4415_s7  ;;  %v1135_v14 = vrot.slane %v1133_v4, 4  ;;  %v1358_v16 = vrot.slane %v3235_v58, 5  ;;  %v2757_v24 = vrot.slane %v1018_v12, 9  ;;  %v1110_v36 = vld [vmem:[#allocation2 + $0x18] sm:$0xf] }
  0x35   : > { %v1138_v17 = vrot.slane %v1136_v6, 5  ;;  %v1061_v25 = vrot.slane %v3255_v11, 5  ;;  %v3296_v37 = vld [vmem:[#allocation2 + $0x1c] sm:$0xf]  ;;  %v3298_v38 = vrot.slane %v533_v28, 7  ;;  %v1157_v45 = vshrl.u32 %v1110_v36, 16 }
  0x36   : > { %v3275_v21 = vsel %vm3251_vm7, %v2764_v15, %v1358_v16  ;;  %v1360_v23 = vrot.slane %v1358_v16, 4  ;;  %v1166_v42 = vshll.u32 %v3296_v37, 16  ;;  %v1170_v43 = vshrl.u32 %v3296_v37, 16  ;;  %v1412_v46 = vld [vmem:[#allocation2 + $0x18] sm:$0xf]  ;;  %v315_v3 = vld [vmem:[%s3281_s10 + $0x8] sm:$0xff] }
  0x37   : > { %v1139_v26 = vor.u32 %v1138_v17, %v1135_v14  ;;  %v3289_v33 = vsel %vm3251_vm7, %v2757_v24, %v1061_v25  ;;  %v2805_v44 = vcombine.low %v1110_v36, %v3296_v37  ;;  %507 = vst.msk [vmem:[#allocation2 + $0x24] sm:$0xf] %vm362_vm4, %v2693_v30  ;;  %508 = vst.msk [vmem:[#allocation2 + $0x28] sm:$0xf] %vm362_vm4, %v2694_v31  ;;  %v3310_v47 = vld [vmem:[#allocation2 + $0x20] sm:$0x1] }
  0x38   : > { %v3285_v32 = vsel %vm3251_vm7, %v1360_v23, %v1361_v20  ;;  %v1160_v48 = vshll.u32 %v1110_v36, 16  ;;  %v3312_v49 = vld [vmem:[#allocation2 + $0x1c] sm:$0xf]  ;;  %v1437_v50 = vshrl.u32 %v1412_v46, 16  ;;  %v1440_v51 = vshll.u32 %v1412_v46, 16  ;;  %p559_p6 = scmp.ge.s32.totalorder %s3492_s16, 0 }
  0x39   : > { %v3294_v35 = vrot.slane %v1139_v26, 4  ;;  %v2820_v39 = vcombine.low %v3275_v21, %v3285_v32  ;;  %v538_v52 = vor.u32 %v536_v29, %v3298_v38  ;;  %v3315_v53 = vrot.slane %v1170_v43, 4  ;;  %1862 = vrot.lane.b32.xlu1 %v2805_v44, %s4415_s7  ;;  %v1628_v59 = vld [vmem:[#allocation2 + $0x18] sm:$0xe]  ;;  %p560_p7 = scmp.lt.s32.totalorder %s3492_s16, 16  ;;  %p611_p9 = scmp.gt.s32.totalorder %s3510_s18, 0 }
  0x3a   : > { %v1159_v54 = vrot.slane %v1157_v45, 4  ;;  %v1450_v55 = vshrl.u32 %v3312_v49, 16  ;;  %v2828_v57 = vcombine.low %v1412_v46, %v3312_v49  ;;  %v1162_v60 = vrot.slane %v1160_v48, 5  ;;  %s4478_s19 = smov (!%p2706_p5, %s564_s19), 15  ;;  %p607_p10 = scmp.ge.s32.totalorder %s3510_s18, 0 }
  0x3b   : > { %v3320_v61 = vrot.slane %v1437_v50, 4  ;;  %v3322_v62 = vrot.slane %v1440_v51, 5  ;;  %v541_v2 = vsel %vm3185_vm2, 0, %v538_v52  ;;  %v1063_v6 = vrot.slane %v1061_v25, 4  ;;  %v1325_v52 = vld [vmem:[#allocation2 + $0x18] sm:$0xe]  ;;  %p3562_p13 = pnand %p560_p7, %p559_p6 }
  0x3c   : > { %1988 = vrot.lane.b32.xlu0 %v2828_v57, %s4425_s12  ;;  %v2703_v4 = vcombine.low %v541_v2, %v541_v2  ;;  %v2704_v5 = vcombine.high %v541_v2, %v541_v2  ;;  %v1163_v9 = vor.u32 %v1162_v60, %v1159_v54  ;;  %v2772_v12 = vrot.slane %v1628_v59, 9  ;;  %v3374_v60 = vld [vmem:[#allocation2 + $0x20] sm:$0x1]  ;;  %p608_p11 = scmp.lt.s32.totalorder %s3510_s18, 16  ;;  %p2716_p12 = scmp.lt.s32.totalorder %s3510_s18, 15 }
  0x3d   : > { %v1662_v14 = vrot.slane %v3312_v49, 5  ;;  %v1665_v15 = vrot.slane %v3310_v47, 5  ;;  %v3335_v16 = vsel %vm3251_vm7, %v1063_v6, %v1064_v8  ;;  %v323_v17 = vmul.f32 %v3148_v0, %v315_v3  ;;  %v3381_v6 = vld [vmem:[#allocation2 + $0x1c] sm:$0xf]  ;;  %s612_s29 = scalar_select %p611_p9, %s3510_s18, 0 }
  0x3e   : > { %555 = vst.msk [vmem:[#allocation2 + $0x30] sm:$0xf] %vm362_vm4, %v2703_v4  ;;  %556 = vst.msk [vmem:[#allocation2 + $0x34] sm:$0xf] %vm362_vm4, %v2704_v5  ;;  %v3342_v20 = vrot.slane %v1163_v9, 4  ;;  %v2797_v25 = vcombine.low %v3289_v33, %v3335_v16  ;;  %v494_v3 = vsel %vm3185_vm2, %v3247_v7, 0  ;;  %p3585_p0 = pnand %p608_p11, %p607_p10 }
  0x3f   : > { %v1414_v23 = vld [vmem:[#allocation2 + $0x24] sm:$0xf]  ;;  %v3344_v24 = vld [vmem:[#allocation2 + $0x28] sm:$0xf]  ;;  %v3350_v26 = vsel %vm3251_vm7, %v2772_v12, %v1662_v14  ;;  %v1664_v27 = vrot.slane %v1662_v14, 4  ;;  %v331_v44 = vadd.f32 %v3154_v1, %v323_v17  ;;  %v334_v1 = vmul.f32 %v333_v19, %v330_v18  ;;  %s2711_s9 = sshll.u32 %s4478_s19, 4 }
  0x40   : > { %v1461_v28 = vshrl.u32 %v1414_v23, 16  ;;  %v1464_v0 = vshll.u32 %v1414_v23, 16  ;;  %v1474_v29 = vshrl.u32 %v3344_v24, 16  ;;  %v2829_v30 = vcombine.low %v1414_v23, %v3344_v24  ;;  %v1112_v31 = vld [vmem:[#allocation2 + $0x24] sm:$0xf]  ;;  %s4480_s29 = smov (!%p2716_p12, %s612_s29), 15 }
  0x41   : > { %v3354_v34 = vld [vmem:[#allocation2 + $0x28] sm:$0xf]  ;;  %v1181_v36 = vshrl.u32 %v1112_v31, 16  ;;  %v1184_v41 = vshll.u32 %v1112_v31, 16  ;;  %v3358_v43 = vsel %vm3251_vm7, %v1664_v27, %v1665_v15  ;;  %v1629_v45 = vld [vmem:[#allocation2 + $0x24] sm:$0xe]  ;;  %v335_v2 = vmul.f32 %v333_v19, %v331_v44 }
  0x42   : > { %v3361_v46 = vrot.slane %v1461_v28, 4  ;;  %v3363_v48 = vrot.slane %v1464_v0, 5  ;;  %1990 = vrot.lane.b32.xlu1 %v2829_v30, %s4425_s12  ;;  %v1194_v50 = vshrl.u32 %v3354_v34, 16  ;;  %v2806_v51 = vcombine.low %v1112_v31, %v3354_v34  ;;  %v3386_v17 = vld [vmem:[#allocation2 + $0x20] sm:$0x1]  ;;  %s3602_s16 = sadd.s32 6, %s3123_s28 }
  0x43   : > { %v3368_v54 = vrot.slane %v1181_v36, 4  ;;  %v3370_v57 = vrot.slane %v1184_v41, 5  ;;  %v2844_v59 = vcombine.low %v3350_v26, %v3358_v43  ;;  %v2773_v4 = vrot.slane %v1629_v45, 9  ;;  %v1019_v27 = vld [vmem:[#allocation2 + $0x18] sm:$0xe]  ;;  %s4421_s18 = smov 28  }
  0x44   : > { %1864 = vrot.lane.b32.xlu0 %v2806_v51, %s4415_s7  ;;  %v1669_v5 = vrot.slane %v3344_v24, 5  ;;  %v2695_v12 = vcombine.low %v494_v3, %v494_v3  ;;  %v2765_v14 = vrot.slane %v1325_v52, 9  ;;  %v1365_v15 = vrot.slane %v3296_v37, 5  ;;  %v3401_v36 = vld [vmem:[#allocation2 + $0x28] sm:$0xf]  ;;  %p659_p1 = scmp.gt.s32.totalorder %s3602_s16, 0 }
  0x45   : > { %v1114_v8 = vld [vmem:[#allocation2 + $0x30] sm:$0xf]  ;;  %v3383_v9 = vld [vmem:[#allocation2 + $0x34] sm:$0xf]  ;;  %v1467_v18 = vor.u32 %v3363_v48, %v3361_v46  ;;  %v336_v28 = vpack.c.bf16 %v335_v2, %v334_v1  ;;  %v1020_v41 = vld [vmem:[#allocation2 + $0x24] sm:$0xe] }
  0x46   : > { %v1205_v7 = vshrl.u32 %v1114_v8, 16  ;;  %v1208_v19 = vshll.u32 %v1114_v8, 16  ;;  %v1218_v23 = vshrl.u32 %v3383_v9, 16  ;;  %v2807_v26 = vcombine.low %v1114_v8, %v3383_v9  ;;  %509 = vst.msk [vmem:[#allocation2 + $0x2c] sm:$0x1] %vm365_vm3, %v2695_v12  ;;  %p2726_p3 = scmp.lt.s32.totalorder %s3602_s16, 15 }
  0x47   : > { %v3395_v0 = vsel %vm3251_vm7, %v2773_v4, %v1669_v5  ;;  %v1671_v30 = vrot.slane %v1669_v5, 4  ;;  %v3399_v31 = vsel %vm3251_vm7, %v2765_v14, %v1365_v15  ;;  %v1367_v45 = vrot.slane %v1365_v15, 4  ;;  %v800_v4 = vld [vmem:[#allocation2 + $0xc] sm:$0xf]  ;;  %s2712_s11 = scalar_select %p3562_p13, 0.0, 1.0 }
  0x48   : > { %v3403_v43 = vrot.slane %v1205_v7, 4  ;;  %v3405_v44 = vrot.slane %v1208_v19, 5  ;;  %1866 = vrot.lane.b32.xlu1 %v2807_v26, %s4415_s7  ;;  %1940 = vrot.lane.b32.xlu0 %v2820_v39, %s3047_s13  ;;  %v1368_v51 = vrot.slane %v3374_v60, 5  ;;  %v338_v52 = vshrl.u32 %v336_v28, 16  ;;  %s3627_s7 = sadd.s32 7, %s3123_s28  ;;  %p655_p6 = scmp.ge.s32.totalorder %s3602_s16, 0 }
  0x49   : > { %v341_v1 = vshll.u32 %v336_v28, 16  ;;  %v2758_v2 = vrot.slane %v1019_v27, 9  ;;  %v1068_v3 = vrot.slane %v3381_v6, 5  ;;  %v1071_v8 = vrot.slane %v3386_v17, 5  ;;  %p707_p2 = scmp.gt.s32.totalorder %s3627_s7, 0  ;;  %p2736_p5 = scmp.lt.s32.totalorder %s3627_s7, 15 }
  0x4a   : > { %v3416_v5 = vsel %vm3251_vm7, %v1367_v45, %v1368_v51  ;;  %v2759_v12 = vrot.slane %v1020_v41, 9  ;;  %v1075_v14 = vrot.slane %v3401_v36, 5  ;;  %v340_v21 = vrot.slane %v338_v52, 7  ;;  %p656_p9 = scmp.lt.s32.totalorder %s3602_s16, 16  ;;  %p703_p10 = scmp.ge.s32.totalorder %s3627_s7, 0 }
  0x4b   : > { %v2821_v32 = vcombine.low %v3399_v31, %v3416_v5  ;;  %v3424_v39 = vsel %vm3251_vm7, %v2758_v2, %v1068_v3  ;;  %v1070_v15 = vrot.slane %v1068_v3, 4  ;;  %v850_v26 = vshrl.u32 %v800_v4, 16  ;;  %p704_p11 = scmp.lt.s32.totalorder %s3627_s7, 16  ;;  %s4451_s10 = smov 4  }
  0x4c   : > { %1814 = vrot.lane.b32.xlu1 %v2797_v25, %s4417_s14  ;;  %2068 = vrot.lane.b32.xlu0 %v2844_v59, %s4419_s15  ;;  %v3433_v7 = vsel %vm3251_vm7, %v2759_v12, %v1075_v14  ;;  %v1077_v19 = vrot.slane %v1075_v14, 4  ;;  %v853_v27 = vshll.u32 %v800_v4, 16  ;;  %v343_v28 = vor.u32 %v341_v1, %v340_v21  ;;  %p3785_p12 = pnand %p656_p9, %p655_p6 }
  0x4d   : > { %v350_v41 = vsel %vm3185_vm2, %v340_v21, 0  ;;  %v1072_v45 = vsel %vm3251_vm7, %v1070_v15, %v1071_v8  ;;  %v859_v33 = vshll.u32 %v3255_v11, 16  ;;  %v1429_v25 = vld [vmem:[#allocation2 + $0x2c] sm:$0x1]  ;;  %v852_v52 = vrot.slane %v850_v26, 4  ;;  %p3798_p13 = pnand %p704_p11, %p703_p10 }
  0x4e   : > { %v2665_v16 = vcombine.low %v350_v41, %v350_v41  ;;  %v2798_v59 = vcombine.low %v3424_v39, %v1072_v45  ;;  %v3441_v51 = vld [vmem:[#allocation2 + $0x2c] sm:$0x1]  ;;  %v855_v2 = vrot.slane %v853_v27, 5  ;;  %v349_v3 = vsel %vm3185_vm2, 0, %v343_v28 }
  0x4f   : > { %v1672_v1 = vrot.slane %v1429_v25, 5  ;;  %v1078_v4 = vrot.slane %v3441_v51, 5  ;;  %v861_v12 = vrot.slane %v859_v33, 5  ;;  %v2663_v14 = vcombine.low %v349_v3, %v349_v3  ;;  %s2742_s30 = scalar_select %p3798_p13, 0.0, 1.0 }
  0x50   : > { %v2664_v21 = vcombine.high %v349_v3, %v349_v3  ;;  %366 = vst.msk [vmem:[#allocation2 + $0x8] sm:$0x1] %vm365_vm3, %v2665_v16  ;;  %v856_v39 = vor.u32 %v855_v2, %v852_v52  ;;  %v863_v15 = vshrl.u32 %v3255_v11, 16  ;;  %v869_v28 = vshll.u32 %v3302_v40, 16 }
  0x51   : > { %v1673_v26 = vsel %vm3251_vm7, %v1671_v30, %v1672_v1  ;;  %v3458_v27 = vsel %vm3251_vm7, %v1077_v19, %v1078_v4  ;;  %v1168_v41 = vrot.slane %v1166_v42, 5  ;;  %363 = vst.msk [vmem:[#allocation2] sm:$0xf] %vm362_vm4, %v2663_v14  ;;  %v1176_v37 = vshll.u32 %v3374_v60, 16 }
  0x52   : > { %364 = vst.msk [vmem:[#allocation2 + $0x4] sm:$0xf] %vm362_vm4, %v2664_v21  ;;  %v2845_v45 = vcombine.low %v3395_v0, %v1673_v26  ;;  %v2799_v11 = vcombine.low %v3433_v7, %v3458_v27  ;;  %v857_v33 = vrot.slane %v856_v39, 4  ;;  %v865_v30 = vrot.slane %v863_v15, 4 }
  0x53   : > { %v871_v16 = vrot.slane %v869_v28, 5  ;;  %v1169_v19 = vsel %vm3449_vm10, %v3342_v20, %v1168_v41  ;;  %v1173_v40 = vor.u32 %v3315_v53, %v1168_v41  ;;  %v1144_v52 = vrot.slane %v1142_v63, 5 }
  0x54   : > { %2070 = vrot.lane.b32.xlu0 %v2845_v45, %s4419_s15  ;;  %v862_v42 = vsel %vm3449_vm10, %v857_v33, %v861_v12  ;;  %v866_v0 = vor.u32 %v865_v30, %v861_v12  ;;  %v1152_v2 = vshll.u32 %v3231_v56, 16  ;;  %v1178_v1 = vrot.slane %v1176_v37, 5  ;;  %v802_v37 = vld [vmem:[#allocation2 + $0x18] sm:$0xf] }
  0x55   : > { %v1174_v3 = vrot.slane %v1173_v40, 4  ;;  %v1468_v53 = vrot.slane %v1467_v18, 4  ;;  %v1470_v20 = vshll.u32 %v3344_v24, 16  ;;  %v1145_v4 = vsel %vm3449_vm10, %v3294_v35, %v1144_v52 }
  0x56   : > { %v867_v60 = vrot.slane %v866_v0, 4  ;;  %v1149_v12 = vor.u32 %v3265_v13, %v1144_v52  ;;  %v1154_v58 = vrot.slane %v1152_v2, 5  ;;  %v1476_v21 = vrot.slane %v1474_v29, 4 }
  0x57   : > { %v814_v14 = vld [vmem:[#allocation2 + $0x8] sm:$0x1]  ;;  %v1179_v56 = vsel %vm3449_vm10, %v1174_v3, %v1178_v1  ;;  %v1472_v63 = vrot.slane %v1470_v20, 5  ;;  %v1480_v46 = vshll.u32 %v1429_v25, 16 }
  0x58   : > { %v1057_v48 = vrot.slane %v814_v14, 5  ;;  %1816 = vrot.lane.b32.xlu0 %v2798_v59, %s4417_s14  ;;  %v872_v35 = vsel %vm3449_vm10, %v867_v60, %v871_v16  ;;  %v3497_v13 = vcombine.low %v1169_v19, %v1179_v56  ;;  %v1150_v18 = vrot.slane %v1149_v12, 4  ;;  %v1017_v15 = vld [vmem:[#allocation2] sm:$0xe] }
  0x59   : > { %v799_v39 = vld [vmem:[#allocation2 + $0x4] sm:$0xf]  ;;  %v2789_v26 = vcombine.low %v862_v42, %v872_v35  ;;  %v1473_v24 = vsel %vm3449_vm10, %v1468_v53, %v1472_v63  ;;  %v1477_v29 = vor.u32 %v1476_v21, %v1472_v63  ;;  %v1482_v25 = vrot.slane %v1480_v46, 5  ;;  %v798_v59 = vld [vmem:[#allocation2] sm:$0xf] }
  0x5a   : > { %v2756_v28 = vrot.slane %v1017_v15, 9  ;;  %v1054_v41 = vrot.slane %v799_v39, 5  ;;  %v1155_v45 = vsel %vm3449_vm10, %v1150_v18, %v1154_v58  ;;  %v835_v33 = vshll.u32 %v799_v39, 16 }
  0x5b   : > { %v2812_v30 = vcombine.low %v1145_v4, %v1155_v45  ;;  %v1478_v16 = vrot.slane %v1477_v29, 4  ;;  %v826_v19 = vshrl.u32 %v798_v59, 16  ;;  %v829_v40 = vshll.u32 %v798_v59, 16 }
  0x5c   : > { %v1055_v42 = vsel %vm3251_vm7, %v2756_v28, %v1054_v41  ;;  %v1056_v0 = vrot.slane %v1054_v41, 4  ;;  %1774 = vrot.lane.b32.xlu0 %v2789_v26, %s4427_s17  ;;  %v837_v52 = vrot.slane %v835_v33, 5  ;;  %v839_v2 = vshrl.u32 %v799_v39, 16  ;;  %v804_v41 = vld [vmem:[#allocation2 + $0x24] sm:$0xf] }
  0x5d   : > { %v1483_v3 = vsel %vm3449_vm10, %v1478_v16, %v1482_v25  ;;  %v828_v1 = vrot.slane %v826_v19, 4  ;;  %v831_v53 = vrot.slane %v829_v40, 5  ;;  %v845_v20 = vshll.u32 %v814_v14, 16 }
  0x5e   : > { %v1058_v60 = vsel %vm3251_vm7, %v1056_v0, %v1057_v48  ;;  %v3514_v4 = vcombine.low %v1473_v24, %v1483_v3  ;;  %v841_v12 = vrot.slane %v839_v2, 4  ;;  %v874_v58 = vshrl.u32 %v802_v37, 16 }
  0x5f   : > { %v2796_v56 = vcombine.low %v1055_v42, %v1058_v60  ;;  %v832_v63 = vor.u32 %v831_v53, %v828_v1  ;;  %v847_v21 = vrot.slane %v845_v20, 5  ;;  %v877_v46 = vshll.u32 %v802_v37, 16 }
  0x60   : > { %1900 = vrot.lane.b32.xlu0 %v2812_v30, %s4423_s20  ;;  %v842_v14 = vor.u32 %v841_v12, %v837_v52  ;;  %v876_v35 = vrot.slane %v874_v58, 4  ;;  %v883_v48 = vshll.u32 %v3381_v6, 16  ;;  %v887_v18 = vshrl.u32 %v3381_v6, 16  ;;  %v3576_v58 = vld [vmem:[#allocation2 + $0x2c] sm:$0x1] }
  0x61   : > { %1812 = vrot.lane.b32.xlu1 %v2796_v56, %s4417_s14  ;;  %v833_v39 = vrot.slane %v832_v63, 4  ;;  %v879_v15 = vrot.slane %v877_v46, 5  ;;  %v893_v26 = vshll.u32 %v3386_v17, 16  ;;  %v1443_v24 = vor.u32 %v3322_v62, %v3320_v61 }
  0x62   : > { %v843_v29 = vrot.slane %v842_v14, 4  ;;  %v885_v25 = vrot.slane %v883_v48, 5  ;;  %v889_v28 = vrot.slane %v887_v18, 4  ;;  %v1446_v6 = vshll.u32 %v3312_v49, 16  ;;  %v1326_v48 = vld [vmem:[#allocation2 + $0x24] sm:$0xe] }
  0x63   : > { %v838_v45 = vsel %vm3449_vm10, %v833_v39, %v837_v52  ;;  %v880_v59 = vor.u32 %v879_v15, %v876_v35  ;;  %v895_v17 = vrot.slane %v893_v26, 5  ;;  %v1444_v33 = vrot.slane %v1443_v24, 4 }
  0x64   : > { %v848_v61 = vsel %vm3449_vm10, %v843_v29, %v847_v21  ;;  %v890_v62 = vor.u32 %v889_v28, %v885_v25  ;;  %v1448_v30 = vrot.slane %v1446_v6, 5  ;;  %v1452_v16 = vrot.slane %v1450_v55, 4 }
  0x65   : > { %1942 = vrot.lane.b32.xlu1 %v2821_v32, %s3047_s13  ;;  %v2788_v19 = vcombine.low %v838_v45, %v848_v61  ;;  %v881_v40 = vrot.slane %v880_v59, 4  ;;  %v1456_v37 = vshll.u32 %v3310_v47, 16  ;;  %v898_v42 = vshrl.u32 %v804_v41, 16  ;;  %v3632_v59 = vld [vmem:[#allocation2 + $0x30] sm:$0xf] }
  0x66   : > { %v891_v0 = vrot.slane %v890_v62, 4  ;;  %v1449_v49 = vsel %vm3449_vm10, %v1444_v33, %v1448_v30  ;;  %v1453_v55 = vor.u32 %v1452_v16, %v1448_v30  ;;  %v901_v52 = vshll.u32 %v804_v41, 16  ;;  %v3647_v62 = vld [vmem:[#allocation2 + $0x34] sm:$0xf] }
  0x67   : > { %1772 = vrot.lane.b32.xlu0 %v2788_v19, %s4427_s17  ;;  %v886_v31 = vsel %vm3449_vm10, %v881_v40, %v885_v25  ;;  %v1458_v5 = vrot.slane %v1456_v37, 5  ;;  %v900_v47 = vrot.slane %v898_v42, 4  ;;  %v907_v32 = vshll.u32 %v3401_v36, 16 }
  0x68   : > { %v896_v2 = vsel %vm3449_vm10, %v891_v0, %v895_v17  ;;  %v1454_v3 = vrot.slane %v1453_v55, 4  ;;  %v903_v1 = vrot.slane %v901_v52, 5  ;;  %v911_v53 = vshrl.u32 %v3401_v36, 16 }
  0x69   : > { %1818 = vrot.lane.b32.xlu1 %v2799_v11, %s4417_s14  ;;  %v3573_v20 = vcombine.low %v886_v31, %v896_v2  ;;  %v909_v60 = vrot.slane %v907_v32, 5  ;;  %v917_v12 = vshll.u32 %v3441_v51, 16  ;;  %v1187_v56 = vor.u32 %v3370_v57, %v3368_v54  ;;  %s2721_s14 = sshll.u32 %s4480_s29, 4  ;;  %s568_s29 = scalar_lea.vmem %s3133_s8, %s2711_s9 }
  0x6a   : > { %v1459_v36 = vsel %vm3449_vm10, %v1454_v3, %v1458_v5  ;;  %v904_v7 = vor.u32 %v903_v1, %v900_v47  ;;  %v913_v27 = vrot.slane %v911_v53, 4  ;;  %v1190_v51 = vshll.u32 %v3354_v34, 16  ;;  %s3650_s19 = scalar_lea.vmem %s3133_s8, %s2721_s14  ;;  %s3658_s9 = sadd.s32 8, %s3123_s28  ;;  %v570_v55 = vld [vmem:[%s568_s29 + $0x8] sm:$0xff] }
  0x6b   : > { %v2836_v11 = vcombine.low %v1449_v49, %v1459_v36  ;;  %v919_v54 = vrot.slane %v917_v12, 5  ;;  %v1188_v57 = vrot.slane %v1187_v56, 4  ;;  %v1196_v63 = vrot.slane %v1194_v50, 4  ;;  %v569_v49 = vld [vmem:[%s568_s29] sm:$0xff]  ;;  %s660_s14 = scalar_select %p659_p1, %s3602_s16, 0 }
  0x6c   : > { %v905_v21 = vrot.slane %v904_v7, 4  ;;  %v914_v46 = vor.u32 %v913_v27, %v909_v60  ;;  %v1192_v14 = vrot.slane %v1190_v51, 5  ;;  %v1200_v35 = vshll.u32 %v3576_v58, 16  ;;  %v617_v53 = vld [vmem:[%s3650_s19] sm:$0xff]  ;;  %p755_p4 = scmp.gt.s32.totalorder %s3658_s9, 0  ;;  %p2746_p7 = scmp.lt.s32.totalorder %s3658_s9, 15 }
  0x6d   : > { %1902 = vrot.lane.b32.xlu1 %v3497_v13, %s4423_s20  ;;  %2028 = vrot.lane.b32.xlu0 %v2836_v11, %s4421_s18  ;;  %v542_v50 = vsel %vm3185_vm2, %v3298_v38, 0  ;;  %v1211_v18 = vor.u32 %v3405_v44, %v3403_v43  ;;  %v1214_v39 = vshll.u32 %v3383_v9, 16  ;;  %v1220_v15 = vrot.slane %v1218_v23, 4  ;;  %v1327_v23 = vld [vmem:[#allocation2 + $0x30] sm:$0xe]  ;;  %v2992_v36 = vld [vmem:[%s4410_s2] sm:$0xff]  }
  0x6e   : > { %v910_v13 = vsel %vm3449_vm10, %v905_v21, %v909_v60  ;;  %v915_v26 = vrot.slane %v914_v46, 4  ;;  %v1193_v38 = vsel %vm3449_vm10, %v1188_v57, %v1192_v14  ;;  %v1197_v24 = vor.u32 %v1196_v63, %v1192_v14  ;;  %v3686_v12 = vld [vmem:[%s4408_s0] ss:$0 sm:$0xff]  ;;  %s4482_s14 = smov (!%p2726_p3, %s660_s14), 15  ;;  %2898 = vmatprep.subr.bf16.mxu0 %v2992_v36  ;;  %2920 = vmatprep.subr.bf16.mxu1 %v2992_v36  ;;  %s4443_s29 = smov 16  }
  0x6f   : > { %v1202_v43 = vrot.slane %v1200_v35, 5  ;;  %v2705_v44 = vcombine.low %v542_v50, %v542_v50  ;;  %v3622_v29 = vrot.slane %v1211_v18, 4  ;;  %v3624_v25 = vrot.slane %v1214_v39, 5  ;;  %v3710_v63 = vld [vmem:[%s4409_s1] ss:$0 sm:$0xff]  ;;  %s3726_s12 = scalar_select %p755_p4, %s3658_s9, 0  ;;  %2899 = vmatpush3.bf16.msra.mxu0 %v2992_v36  ;;  %2923 = vmatpush3.bf16.msra.mxu1 %v2992_v36 }
  0x70   : > { %v920_v28 = vsel %vm3449_vm10, %v915_v26, %v919_v54  ;;  %v1198_v6 = vrot.slane %v1197_v24, 4  ;;  %v2766_v41 = vrot.slane %v1326_v48, 9  ;;  %v1372_v45 = vrot.slane %v3354_v34, 5  ;;  %v2993_v54 = vld [vmem:[%s4410_s2 + $0x8] sm:$0xff]   ;;  %s2731_s15 = sshll.u32 %s4482_s14, 4  ;;  %s4446_s16 = smov 28  }
  0x71   : > { %2030 = vrot.lane.b32.xlu1 %v3514_v4, %s4421_s18  ;;  %v2791_v17 = vcombine.low %v910_v13, %v920_v28  ;;  %557 = vst.msk [vmem:[#allocation2 + $0x38] sm:$0x1] %vm365_vm3, %v2705_v44  ;;  %v1217_v33 = vsel %vm3449_vm10, %v3622_v29, %v3624_v25  ;;  %v1221_v34 = vor.u32 %v1220_v15, %v3624_v25  ;;  %v1375_v61 = vrot.slane %v3576_v58, 5  ;;  %s3696_s18 = scalar_select %p707_p2, %s3627_s7, 0 }
  0x72   : > { %v1203_v4 = vsel %vm3449_vm10, %v1198_v6, %v1202_v43  ;;  %v1373_v30 = vsel %vm3251_vm7, %v2766_v41, %v1372_v45  ;;  %v1374_v16 = vrot.slane %v1372_v45, 4  ;;  %v2767_v19 = vrot.slane %v1327_v23, 9  ;;  %v3732_v43 = vld [vmem:[#allocation2 + $0x30] sm:$0xf]  ;;  %v3738_v41 = vld [vmem:[#allocation2 + $0x34] sm:$0xf]  ;;  %2900 = vmatprep.subr.bf16.mxu0 %v2993_v54  ;;  %2921 = vmatprep.subr.bf16.mxu1 %v2993_v54 }
  0x73   : > { %v2814_v40 = vcombine.low %v1193_v38, %v1203_v4  ;;  %v3660_v37 = vrot.slane %v1221_v34, 4  ;;  %v1379_v42 = vrot.slane %v3383_v9, 5  ;;  %v1485_v0 = vshrl.u32 %v3632_v59, 16  ;;  %v1630_v9 = vld [vmem:[#allocation2 + $0x30] sm:$0xe]  ;;  %s4484_s18 = smov (!%p2736_p5, %s3696_s18), 15  ;;  %2901 = vmatpush3.bf16.msra.mxu0 %v2993_v54  ;;  %2924 = vmatpush3.bf16.msra.mxu1 %v2993_v54 }
  0x74   : > { %v1376_v52 = vsel %vm3251_vm7, %v1374_v16, %v1375_v61  ;;  %v1488_v31 = vshll.u32 %v3632_v59, 16  ;;  %v1498_v5 = vshrl.u32 %v3647_v62, 16  ;;  %v2830_v47 = vcombine.low %v3632_v59, %v3647_v62  ;;  %v3748_v4 = vld [vmem:[#allocation2 + $0x30] sm:$0xe]  ;;  %s4486_s12 = smov (!%p2746_p7, %s3726_s12), 15  ;;  %s2741_s14 = sshll.u32 %s4484_s18, 4 }
  0x75   : > { %1776 = vrot.lane.b32.xlu1 %v3573_v20, %s4427_s17  ;;  %1904 = vrot.lane.b32.xlu0 %v2814_v40, %s4423_s20  ;;  %v2822_v32 = vcombine.low %v1373_v30, %v1376_v52  ;;  %v3679_v2 = vsel %vm3251_vm7, %v2767_v19, %v1379_v42  ;;  %v1381_v3 = vrot.slane %v1379_v42, 4  ;;  %v1487_v1 = vrot.slane %v1485_v0, 4  ;;  %s4442_s20 = smov 24   ;;  %p752_p1 = scmp.lt.s32.totalorder %s3658_s9, 16 }
  0x76   : > { %v1490_v60 = vrot.slane %v1488_v31, 5  ;;  %v571_v20 = vmul.f32 %v3686_v12, %v569_v49  ;;  %v572_v58 = vmul.f32 %v3686_v12, %v570_v55  ;;  %v576_v56 = vstv %s2712_s11  ;;  %s664_s11 = scalar_lea.vmem %s3133_s8, %s2731_s15  ;;  %s712_s15 = scalar_lea.vmem %s3133_s8, %s2741_s14 }
  0x77   : > { %v1494_v7 = vshll.u32 %v3647_v62, 16  ;;  %v1500_v27 = vrot.slane %v1498_v5, 4  ;;  %v2774_v51 = vrot.slane %v1630_v9, 9  ;;  %v1676_v11 = vrot.slane %v3647_v62, 5  ;;  %s2732_s7 = scalar_select %p3785_p12, 0.0, 1.0 }
  0x78   : > { %v1127_v57 = vld [vmem:[#allocation2 + $0x38] sm:$0x1]  ;;  %v573_v21 = vadd.f32 %v3710_v63, %v571_v20  ;;  %v574_v46 = vadd.f32 %v3710_v63, %v572_v58  ;;  %v1491_v35 = vor.u32 %v1490_v60, %v1487_v1  ;;  %v3715_v48 = vmul.f32 %v3686_v12, %v617_v53  ;;  %v618_v20 = vld [vmem:[%s3650_s19 + $0x8] sm:$0xff]  ;;  %s4448_s14 = scalar_select %p3585_p0, 0.0, 1.0 }
  0x79   : > { %v1430_v14 = vld [vmem:[#allocation2 + $0x38] sm:$0x1]  ;;  %1778 = vrot.lane.b32.xlu1 %v2791_v17, %s4427_s17  ;;  %v1224_v50 = vshll.u32 %v1127_v57, 16  ;;  %1944 = vrot.lane.b32.xlu0 %v2822_v32, %s3047_s13  ;;  %v1382_v18 = vrot.slane %v1127_v57, 5  ;;  %v1496_v39 = vrot.slane %v1494_v7, 5  ;;  %v3730_v24 = vsel %vm3251_vm7, %v2774_v51, %v1676_v11  ;;  %s2751_s17 = sshll.u32 %s4486_s12, 4 }
  0x7a   : > { %v1504_v15 = vshll.u32 %v1430_v14, 16  ;;  %v577_v13 = vmul.f32 %v576_v56, %v573_v21  ;;  %v578_v26 = vmul.f32 %v576_v56, %v574_v46  ;;  %v1492_v38 = vrot.slane %v1491_v35, 4  ;;  %v818_v49 = vld [vmem:[#allocation2 + $0x38] sm:$0x1]  ;;  %v665_v7 = vld [vmem:[%s664_s11] sm:$0xff]  ;;  %v666_v35 = vld [vmem:[%s664_s11 + $0x8] sm:$0xff]  ;;  %s760_s19 = scalar_lea.vmem %s3133_s8, %s2751_s17 }
  0x7b   : > { %v1226_v44 = vrot.slane %v1224_v50, 5  ;;  %v1383_v23 = vsel %vm3251_vm7, %v1381_v3, %v1382_v18  ;;  %v1501_v28 = vor.u32 %v1500_v27, %v1496_v39  ;;  %v1678_v61 = vrot.slane %v1676_v11, 4  ;;  %v713_v50 = vld [vmem:[%s712_s15] sm:$0xff]  ;;  %s4447_s12 = smov 32   ;;  %p751_p0 = scmp.ge.s32.totalorder %s3658_s9, 0 }
  0x7c   : > { %v1506_v6 = vrot.slane %v1504_v15, 5  ;;  %v2823_v45 = vcombine.low %v3679_v2, %v1383_v23  ;;  %v579_v17 = vpack.c.bf16 %v578_v26, %v577_v13  ;;  %v1497_v34 = vsel %vm3449_vm10, %v1492_v38, %v1496_v39  ;;  %v714_v26 = vld [vmem:[%s712_s15 + $0x8] sm:$0xff]  ;;  %s4449_s8 = smov 8   ;;  %s4452_s11 = smov 12  }
  0x7d   : > { %v1227_v30 = vsel %vm3449_vm10, %v3660_v37, %v1226_v44  ;;  %1992 = vrot.lane.b32.xlu0 %v2830_v47, %s4442_s20  ;;  %v1502_v16 = vrot.slane %v1501_v28, 4  ;;  %v1679_v19 = vrot.slane %v1430_v14, 5  ;;  %v922_v40 = vshrl.u32 %v3732_v43, 16  ;;  %p3917_p2 = pnand %p752_p1, %p751_p0  ;;  %s4488_s28 = smov (!%p282_p8, %s3123_s28), 15 }
  0x7e   : > { %v2815_v42 = vcombine.low %v1217_v33, %v1227_v30  ;;  %v581_v0 = vshrl.u32 %v579_v17, 16  ;;  %v584_v37 = vshll.u32 %v579_v17, 16  ;;  %v925_v59 = vshll.u32 %v3732_v43, 16  ;;  %v761_v17 = vld [vmem:[%s760_s19] sm:$0xff]  ;;  %p292_p8 = scmp.lt.s32.totalorder %s3027_s21, 1 }
  0x7f   : > { %v1507_v62 = vsel %vm3449_vm10, %v1502_v16, %v1506_v6  ;;  %v1680_v55 = vsel %vm3251_vm7, %v1678_v61, %v1679_v19  ;;  %v924_v29 = vrot.slane %v922_v40, 4  ;;  %v931_v25 = vshll.u32 %v3738_v41, 16  ;;  %s2752_s9 = scalar_select %p3917_p2, 0.0, 1.0 }
  0x80   : > { %1906 = vrot.lane.b32.xlu1 %v2815_v42, %s4443_s29  ;;  %v583_v33 = vrot.slane %v581_v0, 7  ;;  %v2838_v52 = vcombine.low %v1497_v34, %v1507_v62  ;;  %v2846_v31 = vcombine.low %v3730_v24, %v1680_v55  ;;  %v927_v5 = vrot.slane %v925_v59, 5  ;;  %s4490_s21 = smov (!%p292_p8, %s3027_s21), 1 }
  0x81   : > { %v3790_v47 = vrot.slane %v931_v25, 5  ;;  %v935_v9 = vshrl.u32 %v3738_v41, 16  ;;  %v941_v32 = vshll.u32 %v818_v49, 16  ;;  %v2760_v2 = vrot.slane %v3748_v4, 9 }
  0x82   : > { %v586_v3 = vor.u32 %v584_v37, %v583_v33  ;;  %2032 = vrot.lane.b32.xlu0 %v2838_v52, %s4446_s16  ;;  %v590_v1 = vsel %vm3185_vm2, %v583_v33, 0  ;;  %v928_v53 = vor.u32 %v927_v5, %v924_v29  ;;  %v1082_v60 = vrot.slane %v3738_v41, 5 }
  0x83   : > { %v2715_v58 = vcombine.low %v590_v1, %v590_v1  ;;  %v937_v56 = vrot.slane %v935_v9, 4  ;;  %v1085_v36 = vrot.slane %v818_v49, 5  ;;  %v943_v11 = vrot.slane %v941_v32, 5  ;;  %v762_v49 = vld [vmem:[%s760_s19 + $0x8] sm:$0xff] }
  0x84   : > { %1946 = vrot.lane.b32.xlu1 %v2823_v45, %s3047_s13  ;;  %v589_v27 = vsel %vm3185_vm2, 0, %v586_v3  ;;  %v929_v51 = vrot.slane %v928_v53, 4  ;;  %v1084_v54 = vrot.slane %v1082_v60, 4  ;;  %v620_v14 = vmul.f32 %v3686_v12, %v618_v20 }
  0x85   : > { %v2713_v57 = vcombine.low %v589_v27, %v589_v27  ;;  %v2714_v21 = vcombine.high %v589_v27, %v589_v27  ;;  %605 = vst.msk [vmem:[#allocation2 + $0x44] sm:$0x1] %vm365_vm3, %v2715_v58  ;;  %v938_v46 = vor.u32 %v937_v56, %v3790_v47  ;;  %v3824_v39 = vsel %vm3251_vm7, %v2760_v2, %v1082_v60 }
  0x86   : > { %2072 = vrot.lane.b32.xlu0 %v2846_v31, %s4447_s12  ;;  %v934_v18 = vsel %vm3449_vm10, %v929_v51, %v3790_v47  ;;  %v621_v15 = vadd.f32 %v3710_v63, %v3715_v48  ;;  %v624_v13 = vstv %s4448_s14  ;;  %v3837_v24 = vsel %vm3251_vm7, %v1084_v54, %v1085_v36 }
  0x87   : > { %603 = vst.msk [vmem:[#allocation2 + $0x3c] sm:$0xf] %vm362_vm4, %v2713_v57  ;;  %604 = vst.msk [vmem:[#allocation2 + $0x40] sm:$0xf] %vm362_vm4, %v2714_v21  ;;  %v939_v38 = vrot.slane %v938_v46, 4  ;;  %v622_v44 = vadd.f32 %v3710_v63, %v620_v14  ;;  %v667_v23 = vmul.f32 %v3686_v12, %v665_v7  ;;  %v668_v28 = vmul.f32 %v3686_v12, %v666_v35 }
  0x88   : > { %v625_v48 = vmul.f32 %v624_v13, %v621_v15  ;;  %v672_v6 = vstv %s2732_s7  ;;  %v715_v45 = vmul.f32 %v3686_v12, %v713_v50  ;;  %v716_v30 = vmul.f32 %v3686_v12, %v714_v26 }
  0x89   : > { %v944_v34 = vsel %vm3449_vm10, %v939_v38, %v943_v11  ;;  %v626_v61 = vmul.f32 %v624_v13, %v622_v44  ;;  %v669_v4 = vadd.f32 %v3710_v63, %v667_v23  ;;  %v670_v16 = vadd.f32 %v3710_v63, %v668_v28 }
  0x8a   : > { %v717_v19 = vadd.f32 %v3710_v63, %v715_v45  ;;  %v720_v40 = vstv %s2742_s30  ;;  %v2800_v42 = vcombine.low %v3824_v39, %v3837_v24  ;;  %v718_v37 = vadd.f32 %v3710_v63, %v716_v30 }
  0x8b   : > { %v673_v0 = vmul.f32 %v672_v6, %v669_v4  ;;  %v763_v59 = vmul.f32 %v3686_v12, %v761_v17  ;;  %v3853_v55 = vcombine.low %v934_v18, %v944_v34  ;;  %v3857_v25 = vpack.c.bf16 %v626_v61, %v625_v48 }
  0x8c   : > { %v1431_v62 = vld [vmem:[#allocation2 + $0x44] sm:$0x1]  ;;  %v674_v33 = vmul.f32 %v672_v6, %v670_v16  ;;  %v3859_v52 = vmul.f32 %v720_v40, %v717_v19  ;;  %v3865_v53 = vmul.f32 %v720_v40, %v718_v37  ;;  %v764_v60 = vmul.f32 %v3686_v12, %v762_v49 }
  0x8d   : > { %v3855_v29 = vld [vmem:[#allocation2 + $0x44] sm:$0x1]  ;;  %v1528_v31 = vshll.u32 %v1431_v62, 16  ;;  %v1686_v5 = vrot.slane %v1431_v62, 5  ;;  %v3869_v20 = vadd.f32 %v3710_v63, %v763_v59 }
  0x8e   : > { %v965_v47 = vshll.u32 %v3855_v29, 16  ;;  %v1092_v9 = vrot.slane %v3855_v29, 5  ;;  %v1418_v32 = vld [vmem:[#allocation2 + $0x3c] sm:$0xf]  ;;  %v1419_v2 = vld [vmem:[#allocation2 + $0x40] sm:$0xf]  ;;  %v3863_v1 = vpack.c.bf16 %v674_v33, %v673_v0 }
  0x8f   : > { %v1631_v3 = vld [vmem:[#allocation2 + $0x3c] sm:$0xe]  ;;  %v1509_v58 = vshrl.u32 %v1418_v32, 16  ;;  %v1512_v56 = vshll.u32 %v1418_v32, 16  ;;  %v1522_v36 = vshrl.u32 %v1419_v2, 16  ;;  %v2831_v7 = vcombine.low %v1418_v32, %v1419_v2 }
  0x90   : > { %v3871_v27 = vld [vmem:[#allocation2 + $0x3c] sm:$0xf]  ;;  %v1518_v51 = vshll.u32 %v1419_v2, 16  ;;  %v1530_v11 = vrot.slane %v1528_v31, 5  ;;  %v2775_v54 = vrot.slane %v1631_v3, 9  ;;  %v1683_v57 = vrot.slane %v1419_v2, 5 }
  0x91   : > { %v3873_v21 = vld [vmem:[#allocation2 + $0x40] sm:$0xf]  ;;  %v1511_v46 = vrot.slane %v1509_v58, 4  ;;  %v1514_v14 = vrot.slane %v1512_v56, 5  ;;  %1994 = vrot.lane.b32.xlu1 %v2831_v7, %s4442_s20  ;;  %v1524_v12 = vrot.slane %v1522_v36, 4  ;;  %v946_v35 = vshrl.u32 %v3871_v27, 16 }
  0x92   : > { %v1520_v50 = vrot.slane %v1518_v51, 5  ;;  %v1684_v18 = vsel %vm3251_vm7, %v2775_v54, %v1683_v57  ;;  %v1685_v15 = vrot.slane %v1683_v57, 4  ;;  %v949_v13 = vshll.u32 %v3871_v27, 16  ;;  %v1022_v48 = vld [vmem:[#allocation2 + $0x3c] sm:$0xe] }
  0x93   : > { %v1515_v26 = vor.u32 %v1514_v14, %v1511_v46  ;;  %v948_v38 = vrot.slane %v946_v35, 4  ;;  %v955_v44 = vshll.u32 %v3873_v21, 16  ;;  %v959_v23 = vshrl.u32 %v3873_v21, 16  ;;  %v1116_v34 = vld [vmem:[#allocation2 + $0x3c] sm:$0xf] }
  0x94   : > { %v1525_v28 = vor.u32 %v1524_v12, %v1520_v50  ;;  %v1687_v6 = vsel %vm3251_vm7, %v1685_v15, %v1686_v5  ;;  %v951_v45 = vrot.slane %v949_v13, 5  ;;  %v967_v17 = vrot.slane %v965_v47, 5  ;;  %v1117_v62 = vld [vmem:[#allocation2 + $0x40] sm:$0xf]  ;;  %v1128_v54 = vld [vmem:[#allocation2 + $0x44] sm:$0x1] }
  0x95   : > { %v1516_v61 = vrot.slane %v1515_v26, 4  ;;  %v2847_v4 = vcombine.low %v1684_v18, %v1687_v6  ;;  %v957_v30 = vrot.slane %v955_v44, 5  ;;  %v961_v16 = vrot.slane %v959_v23, 4  ;;  %v1328_v57 = vld [vmem:[#allocation2 + $0x3c] sm:$0xe] }
  0x96   : > { %v1526_v19 = vrot.slane %v1525_v28, 4  ;;  %v952_v40 = vor.u32 %v951_v45, %v948_v38  ;;  %v2761_v0 = vrot.slane %v1022_v48, 9  ;;  %v1089_v37 = vrot.slane %v3873_v21, 5 }
  0x97   : > { %v1521_v49 = vsel %vm3449_vm10, %v1516_v61, %v1520_v50  ;;  %2074 = vrot.lane.b32.xlu0 %v2847_v4, %s4447_s12  ;;  %v962_v59 = vor.u32 %v961_v16, %v957_v30  ;;  %v1229_v33 = vshrl.u32 %v1116_v34, 16  ;;  %v1232_v31 = vshll.u32 %v1116_v34, 16 }
  0x98   : > { %v1531_v5 = vsel %vm3449_vm10, %v1526_v19, %v1530_v11  ;;  %v953_v47 = vrot.slane %v952_v40, 4  ;;  %v3892_v32 = vsel %vm3251_vm7, %v2761_v0, %v1089_v37  ;;  %v1091_v2 = vrot.slane %v1089_v37, 4 }
  0x99   : > { %v2839_v3 = vcombine.low %v1521_v49, %v1531_v5  ;;  %v963_v58 = vrot.slane %v962_v59, 4  ;;  %v1231_v56 = vrot.slane %v1229_v33, 4  ;;  %v1234_v36 = vrot.slane %v1232_v31, 5 }
  0x9a   : > { %v958_v7 = vsel %vm3449_vm10, %v953_v47, %v957_v30  ;;  %v1093_v51 = vsel %vm3251_vm7, %v1091_v2, %v1092_v9  ;;  %v1242_v11 = vshrl.u32 %v1117_v62, 16  ;;  %v766_v46 = vadd.f32 %v3710_v63, %v764_v60 }
  0x9b   : > { %2034 = vrot.lane.b32.xlu1 %v2839_v3, %s4446_s16  ;;  %v968_v14 = vsel %vm3449_vm10, %v963_v58, %v967_v17  ;;  %1820 = vrot.lane.b32.xlu0 %v2800_v42, %s4449_s8  ;;  %v2808_v29 = vcombine.low %v1116_v34, %v1117_v62  ;;  %v629_v12 = vshrl.u32 %v3857_v25, 16  ;;  %v632_v9 = vshll.u32 %v3857_v25, 16 }
  0x9c   : > { %v2801_v35 = vcombine.low %v3892_v32, %v1093_v51  ;;  %v1235_v50 = vor.u32 %v1234_v36, %v1231_v56  ;;  %v1238_v18 = vshll.u32 %v1117_v62, 16  ;;  %v1244_v63 = vrot.slane %v1242_v11, 4 }
  0x9d   : > { %v631_v60 = vrot.slane %v629_v12, 7  ;;  %v1248_v15 = vshll.u32 %v1128_v54, 16  ;;  %v2768_v39 = vrot.slane %v1328_v57, 9  ;;  %v1386_v24 = vrot.slane %v1117_v62, 5 }
  0x9e   : > { %v2793_v42 = vcombine.low %v958_v7, %v968_v14  ;;  %v1236_v13 = vrot.slane %v1235_v50, 4  ;;  %v1240_v26 = vrot.slane %v1238_v18, 5  ;;  %v677_v25 = vshrl.u32 %v3863_v1, 16 }
  0x9f   : > { %1780 = vrot.lane.b32.xlu1 %v3853_v55, %s4451_s10  ;;  %1868 = vrot.lane.b32.xlu0 %v2808_v29, %s4452_s11  ;;  %v634_v38 = vor.u32 %v632_v9, %v631_v60  ;;  %v1250_v44 = vrot.slane %v1248_v15, 5  ;;  %v638_v23 = vsel %vm3185_vm2, %v631_v60, 0  ;;  %v1389_v48 = vrot.slane %v1128_v54, 5 }
  0xa0   : > { %v1245_v28 = vor.u32 %v1244_v63, %v1240_v26  ;;  %v2725_v6 = vcombine.low %v638_v23, %v638_v23  ;;  %v1387_v45 = vsel %vm3251_vm7, %v2768_v39, %v1386_v24  ;;  %v1388_v17 = vrot.slane %v1386_v24, 4 }
  0xa1   : > { %v637_v34 = vsel %vm3185_vm2, 0, %v634_v38  ;;  %v679_v55 = vrot.slane %v677_v25, 7  ;;  %v680_v61 = vshll.u32 %v3863_v1, 16  ;;  %v723_v4 = vpack.c.bf16 %v3865_v53, %v3859_v52 }
  0xa2   : > { %v2723_v30 = vcombine.low %v637_v34, %v637_v34  ;;  %v2724_v16 = vcombine.high %v637_v34, %v637_v34  ;;  %v1241_v19 = vsel %vm3449_vm10, %v1236_v13, %v1240_v26  ;;  %v1246_v40 = vrot.slane %v1245_v28, 4  ;;  %653 = vst.msk [vmem:[#allocation2 + $0x50] sm:$0x1] %vm365_vm3, %v2725_v6 }
  0xa3   : > { %1782 = vrot.lane.b32.xlu1 %v2793_v42, %s4451_s10  ;;  %v1390_v0 = vsel %vm3251_vm7, %v1388_v17, %v1389_v48  ;;  %v682_v37 = vor.u32 %v680_v61, %v679_v55  ;;  %v686_v1 = vsel %vm3185_vm2, %v679_v55, 0  ;;  %v725_v49 = vshrl.u32 %v723_v4, 16 }
  0xa4   : > { %651 = vst.msk [vmem:[#allocation2 + $0x48] sm:$0xf] %vm362_vm4, %v2723_v30  ;;  %652 = vst.msk [vmem:[#allocation2 + $0x4c] sm:$0xf] %vm362_vm4, %v2724_v16  ;;  %v1251_v52 = vsel %vm3449_vm10, %v1246_v40, %v1250_v44  ;;  %v2735_v53 = vcombine.low %v686_v1, %v686_v1  ;;  %v768_v59 = vstv %s2752_s9  ;;  %v2824_v5 = vcombine.low %v1387_v45, %v1390_v0 }
  0xa5   : > { %v2816_v62 = vcombine.low %v1241_v19, %v1251_v52  ;;  %v685_v33 = vsel %vm3185_vm2, 0, %v682_v37  ;;  %v727_v31 = vrot.slane %v725_v49, 7  ;;  %v728_v2 = vshll.u32 %v723_v4, 16 }
  0xa6   : > { %v2733_v47 = vcombine.low %v685_v33, %v685_v33  ;;  %v2734_v32 = vcombine.high %v685_v33, %v685_v33  ;;  %701 = vst.msk [vmem:[#allocation2 + $0x5c] sm:$0x1] %vm365_vm3, %v2735_v53  ;;  %v769_v58 = vmul.f32 %v768_v59, %v3869_v20  ;;  %v770_v56 = vmul.f32 %v768_v59, %v766_v46  ;;  %v3965_v20 = vpop.permute.xlu0 %1860 }
  0xa7   : > { %1822 = vrot.lane.b32.xlu1 %v2801_v35, %s4449_s8  ;;  %1908 = vrot.lane.b32.xlu0 %v2816_v62, %s4443_s29  ;;  %v734_v3 = vsel %vm3185_vm2, %v727_v31, 0  ;;  %v2784_v11 = vcombine.low %v3732_v43, %v3738_v41  ;;  %v3968_v35 = vor.u32 %v728_v2, %v727_v31  ;;  %v2785_v18 = vcombine.low %v3871_v27, %v3873_v21 }
  0xa8   : > { %699 = vst.msk [vmem:[#allocation2 + $0x54] sm:$0xf] %vm362_vm4, %v2733_v47  ;;  %700 = vst.msk [vmem:[#allocation2 + $0x58] sm:$0xf] %vm362_vm4, %v2734_v32  ;;  %v2745_v36 = vcombine.low %v734_v3, %v734_v3  ;;  %v3970_v50 = vpack.c.bf16 %v770_v56, %v769_v58 }
  0xa9   : > { %v1129_v7 = vld [vmem:[#allocation2 + $0x50] sm:$0x1] }
  0xaa   : > { %v3958_v51 = vld [vmem:[#allocation2 + $0x50] sm:$0x1]  ;;  %v1272_v54 = vshll.u32 %v1129_v7, 16  ;;  %v1396_v57 = vrot.slane %v1129_v7, 5  ;;  %749 = vst.msk [vmem:[#allocation2 + $0x68] sm:$0x1] %vm365_vm3, %v2745_v36 }
  0xab   : > { %v1552_v14 = vshll.u32 %v3958_v51, 16  ;;  %v1693_v29 = vrot.slane %v3958_v51, 5  ;;  %v1118_v46 = vld [vmem:[#allocation2 + $0x48] sm:$0xf]  ;;  %v1119_v12 = vld [vmem:[#allocation2 + $0x4c] sm:$0xf]  ;;  %1948 = vrot.lane.b32.xlu0 %v2824_v5, %s3047_s13 }
  0xac   : > { %v1329_v9 = vld [vmem:[#allocation2 + $0x48] sm:$0xe]  ;;  %v1253_v63 = vshrl.u32 %v1118_v46, 16  ;;  %v1256_v60 = vshll.u32 %v1118_v46, 16  ;;  %v1266_v15 = vshrl.u32 %v1119_v12, 16  ;;  %v2809_v39 = vcombine.low %v1118_v46, %v1119_v12 }
  0xad   : > { %v1420_v24 = vld [vmem:[#allocation2 + $0x48] sm:$0xf]  ;;  %v1262_v42 = vshll.u32 %v1119_v12, 16  ;;  %v1274_v13 = vrot.slane %v1272_v54, 5  ;;  %v2769_v26 = vrot.slane %v1329_v9, 9  ;;  %v1393_v25 = vrot.slane %v1119_v12, 5 }
  0xae   : > { %v1421_v38 = vld [vmem:[#allocation2 + $0x4c] sm:$0xf]  ;;  %v1255_v44 = vrot.slane %v1253_v63, 4  ;;  %v1258_v23 = vrot.slane %v1256_v60, 5  ;;  %1870 = vrot.lane.b32.xlu1 %v2809_v39, %s4452_s11  ;;  %v1268_v48 = vrot.slane %v1266_v15, 4  ;;  %v1533_v28 = vshrl.u32 %v1420_v24, 16  ;;  %v3983_v40 = vpop.permute.xlu0 %1988 }
  0xaf   : > { %v1264_v6 = vrot.slane %v1262_v42, 5  ;;  %v3977_v45 = vsel %vm3251_vm7, %v2769_v26, %v1393_v25  ;;  %v1395_v17 = vrot.slane %v1393_v25, 4  ;;  %v1536_v34 = vshll.u32 %v1420_v24, 16  ;;  %v3979_v55 = vld [vmem:[#allocation2 + $0x54] sm:$0xf] }
  0xb0   : > { %v1259_v61 = vor.u32 %v1258_v23, %v1255_v44  ;;  %v1535_v4 = vrot.slane %v1533_v28, 4  ;;  %v1546_v30 = vshrl.u32 %v1421_v38, 16  ;;  %v2832_v16 = vcombine.low %v1420_v24, %v1421_v38  ;;  %v3981_v19 = vld [vmem:[#allocation2 + $0x58] sm:$0xf]  ;;  %v3994_v32 = vld [vmem:[#allocation2 + $0x5c] sm:$0x1] }
  0xb1   : > { %v1269_v0 = vor.u32 %v1268_v48, %v1264_v6  ;;  %v1397_v37 = vsel %vm3251_vm7, %v1395_v17, %v1396_v57  ;;  %v1538_v1 = vrot.slane %v1536_v34, 5  ;;  %v1557_v49 = vshrl.u32 %v3979_v55, 16  ;;  %v1632_v36 = vld [vmem:[#allocation2 + $0x48] sm:$0xe]  ;;  %v4009_v23 = vld [vmem:[#allocation2 + $0x4c] sm:$0xf] }
  0xb2   : > { %v1260_v52 = vrot.slane %v1259_v61, 4  ;;  %v2825_v53 = vcombine.low %v3977_v45, %v1397_v37  ;;  %1996 = vrot.lane.b32.xlu0 %v2832_v16, %s4442_s20  ;;  %v1560_v59 = vshll.u32 %v3979_v55, 16  ;;  %v1570_v62 = vshrl.u32 %v3981_v19, 16  ;;  %v4001_v12 = vld [vmem:[#allocation2 + $0x48] sm:$0xf] }
  0xb3   : > { %v1270_v33 = vrot.slane %v1269_v0, 4  ;;  %v1559_v31 = vrot.slane %v1557_v49, 4  ;;  %v2833_v5 = vcombine.low %v3979_v55, %v3981_v19  ;;  %v1539_v47 = vor.u32 %v1538_v1, %v1535_v4  ;;  %v4014_v34 = vld [vmem:[#allocation2 + $0x50] sm:$0x1]  ;;  %v4033_v51 = vld [vmem:[#allocation2 + $0x54] sm:$0xf] }
  0xb4   : > { %v1265_v2 = vsel %vm3449_vm10, %v1260_v52, %v1264_v6  ;;  %v1562_v3 = vrot.slane %v1560_v59, 5  ;;  %v1542_v58 = vshll.u32 %v1421_v38, 16  ;;  %v1548_v56 = vrot.slane %v1546_v30, 4  ;;  %v1633_v52 = vld [vmem:[#allocation2 + $0x54] sm:$0xe]  ;;  %v4027_v59 = vpop.permute.xlu1 %1862 }
  0xb5   : > { %v1275_v7 = vsel %vm3449_vm10, %v1270_v33, %v1274_v13  ;;  %v1540_v54 = vrot.slane %v1539_v47, 4  ;;  %v1554_v57 = vrot.slane %v1552_v14, 5  ;;  %v1566_v46 = vshll.u32 %v3981_v19, 16 }
  0xb6   : > { %v2817_v9 = vcombine.low %v1265_v2, %v1275_v7  ;;  %v1544_v63 = vrot.slane %v1542_v58, 5  ;;  %v1563_v60 = vor.u32 %v1562_v3, %v1559_v31  ;;  %v1572_v15 = vrot.slane %v1570_v62, 4  ;;  %v4003_v39 = vpop.permute.xlu0 %1864 }
  0xb7   : > { %v1568_v24 = vrot.slane %v1566_v46, 5  ;;  %v1576_v42 = vshll.u32 %v3994_v32, 16  ;;  %v2776_v26 = vrot.slane %v1632_v36, 9  ;;  %v1690_v25 = vrot.slane %v1421_v38, 5 }
  0xb8   : > { %1910 = vrot.lane.b32.xlu1 %v2817_v9, %s4443_s29  ;;  %v1545_v14 = vsel %vm3449_vm10, %v1540_v54, %v1544_v63  ;;  %v1549_v13 = vor.u32 %v1548_v56, %v1544_v63  ;;  %v1564_v44 = vrot.slane %v1563_v60, 4  ;;  %v970_v48 = vshrl.u32 %v4001_v12, 16  ;;  %v4037_v56 = vld [vmem:[#allocation2 + $0x58] sm:$0xf]  ;;  %v821_v63 = vld [vmem:[#allocation2 + $0x5c] sm:$0x1] }
  0xb9   : > { %v1573_v28 = vor.u32 %v1572_v15, %v1568_v24  ;;  %v1578_v6 = vrot.slane %v1576_v42, 5  ;;  %v1691_v45 = vsel %vm3251_vm7, %v2776_v26, %v1690_v25  ;;  %v1692_v17 = vrot.slane %v1690_v25, 4  ;;  %v1023_v25 = vld [vmem:[#allocation2 + $0x48] sm:$0xe] }
  0xba   : > { %v1550_v38 = vrot.slane %v1549_v13, 4  ;;  %v1569_v61 = vsel %vm3449_vm10, %v1564_v44, %v1568_v24  ;;  %v972_v4 = vrot.slane %v970_v48, 4  ;;  %v973_v30 = vshll.u32 %v4001_v12, 16  ;;  %v4019_v16 = vpop.permute.xlu0 %1940 }
  0xbb   : > { %v1574_v0 = vrot.slane %v1573_v28, 4  ;;  %v1694_v37 = vsel %vm3251_vm7, %v1692_v17, %v1693_v29  ;;  %v979_v1 = vshll.u32 %v4009_v23, 16  ;;  %v983_v49 = vshrl.u32 %v4009_v23, 16  ;;  %v4054_v28 = vpop.permute.xlu1 %1990 }
  0xbc   : > { %1950 = vrot.lane.b32.xlu1 %v2825_v53, %s3047_s13  ;;  %v1555_v62 = vsel %vm3449_vm10, %v1550_v38, %v1554_v57  ;;  %v2848_v33 = vcombine.low %v1691_v45, %v1694_v37  ;;  %v975_v31 = vrot.slane %v973_v30, 5  ;;  %v989_v47 = vshll.u32 %v4014_v34, 16  ;;  %v1024_v45 = vld [vmem:[#allocation2 + $0x54] sm:$0xe] }
  0xbd   : > { %v2840_v2 = vcombine.low %v1545_v14, %v1555_v62  ;;  %v1579_v29 = vsel %vm3449_vm10, %v1574_v0, %v1578_v6  ;;  %v981_v3 = vrot.slane %v979_v1, 5  ;;  %v985_v58 = vrot.slane %v983_v49, 4  ;;  %v1120_v49 = vld [vmem:[#allocation2 + $0x54] sm:$0xf] }
  0xbe   : > { %v2841_v36 = vcombine.low %v1569_v61, %v1579_v29  ;;  %v976_v7 = vor.u32 %v975_v31, %v972_v4  ;;  %v991_v53 = vrot.slane %v989_v47, 5  ;;  %v2777_v54 = vrot.slane %v1633_v52, 9  ;;  %v4050_v14 = vpop.permute.xlu0 %2068 }
  0xbf   : > { %2036 = vrot.lane.b32.xlu0 %v2840_v2, %s4446_s16  ;;  %v986_v57 = vor.u32 %v985_v58, %v981_v3  ;;  %v1697_v46 = vrot.slane %v3981_v19, 5  ;;  %v1700_v9 = vrot.slane %v3994_v32, 5  ;;  %v994_v60 = vshrl.u32 %v4033_v51, 16 }
  0xc0   : > { %1998 = vrot.lane.b32.xlu1 %v2833_v5, %s4442_s20  ;;  %v977_v15 = vrot.slane %v976_v7, 4  ;;  %v997_v24 = vshll.u32 %v4033_v51, 16  ;;  %v1003_v42 = vshll.u32 %v4037_v56, 16  ;;  %v1007_v26 = vshrl.u32 %v4037_v56, 16 }
  0xc1   : > { %v987_v13 = vrot.slane %v986_v57, 4  ;;  %v1698_v32 = vsel %vm3251_vm7, %v2777_v54, %v1697_v46  ;;  %v1699_v44 = vrot.slane %v1697_v46, 4  ;;  %v996_v48 = vrot.slane %v994_v60, 4  ;;  %v4072_v46 = vpop.permute.xlu1 %1866 }
  0xc2   : > { %v982_v55 = vsel %vm3449_vm10, %v977_v15, %v981_v3  ;;  %v999_v19 = vrot.slane %v997_v24, 5  ;;  %v1005_v5 = vrot.slane %v1003_v42, 5  ;;  %v1009_v6 = vrot.slane %v1007_v26, 4 }
  0xc3   : > { %2076 = vrot.lane.b32.xlu0 %v2848_v33, %s4447_s12  ;;  %v992_v17 = vsel %vm3449_vm10, %v987_v13, %v991_v53  ;;  %v1701_v38 = vsel %vm3251_vm7, %v1699_v44, %v1700_v9  ;;  %v1013_v61 = vshll.u32 %v821_v63, 16  ;;  %v2762_v4 = vrot.slane %v1023_v25, 9  ;;  %v1121_v53 = vld [vmem:[#allocation2 + $0x58] sm:$0xf]  ;;  %v1130_v25 = vld [vmem:[#allocation2 + $0x5c] sm:$0x1] }
  0xc4   : > { %2038 = vrot.lane.b32.xlu1 %v2841_v36, %s4446_s16  ;;  %v2794_v30 = vcombine.low %v982_v55, %v992_v17  ;;  %v2849_v0 = vcombine.low %v1698_v32, %v1701_v38  ;;  %v1000_v37 = vor.u32 %v999_v19, %v996_v48  ;;  %v1010_v1 = vor.u32 %v1009_v6, %v1005_v5  ;;  %v1330_v17 = vld [vmem:[#allocation2 + $0x54] sm:$0xe] }
  0xc5   : > { %v1015_v52 = vrot.slane %v1013_v61, 5  ;;  %v1096_v62 = vrot.slane %v4009_v23, 5  ;;  %v1099_v33 = vrot.slane %v4014_v34, 5  ;;  %v2763_v31 = vrot.slane %v1024_v45, 9 }
  0xc6   : > { %v1001_v47 = vrot.slane %v1000_v37, 4  ;;  %v1011_v2 = vrot.slane %v1010_v1, 4  ;;  %v1103_v29 = vrot.slane %v4037_v56, 5  ;;  %v1106_v3 = vrot.slane %v821_v63, 5  ;;  %v4067_v58 = vpop.permute.xlu0 %2070 }
  0xc7   : > { %2078 = vrot.lane.b32.xlu0 %v2849_v0, %s4447_s12  ;;  %v1097_v36 = vsel %vm3251_vm7, %v2762_v4, %v1096_v62  ;;  %v1098_v7 = vrot.slane %v1096_v62, 4  ;;  %v1277_v54 = vshrl.u32 %v1120_v49, 16  ;;  %v1280_v57 = vshll.u32 %v1120_v49, 16  ;;  %v4092_v0 = vld [vmem:[#allocation2 + $0x68] sm:$0x1] }
  0xc8   : > { %1784 = vrot.lane.b32.xlu1 %v2794_v30, %s4451_s10  ;;  %v1006_v34 = vsel %vm3449_vm10, %v1001_v47, %v1005_v5  ;;  %v1016_v9 = vsel %vm3449_vm10, %v1011_v2, %v1015_v52  ;;  %v1104_v63 = vsel %vm3251_vm7, %v2763_v31, %v1103_v29  ;;  %v1105_v60 = vrot.slane %v1103_v29, 4 }
  0xc9   : > { %v2795_v15 = vcombine.low %v1006_v34, %v1016_v9  ;;  %v1100_v24 = vsel %vm3251_vm7, %v1098_v7, %v1099_v33  ;;  %v1279_v42 = vrot.slane %v1277_v54, 4  ;;  %v1282_v26 = vrot.slane %v1280_v57, 5  ;;  %v2997_v7 = vld [vmem:[#allocation2 + $0x10] sm:$0xf]  ;;  %v2998_v54 = vld [vmem:[#allocation2 + $0xc] sm:$0xf] }
  0xca   : > { %v2802_v13 = vcombine.low %v1097_v36, %v1100_v24  ;;  %v1107_v32 = vsel %vm3251_vm7, %v1105_v60, %v1106_v3  ;;  %v1290_v44 = vshrl.u32 %v1121_v53, 16  ;;  %v2810_v48 = vcombine.low %v1120_v49, %v1121_v53  ;;  %v4085_v55 = vpop.permute.xlu0 %1816  ;;  %v4094_v49 = vpop.permute.xlu1 %1814  ;;  %v4102_v36 = vld [vmem:[#allocation2 + $0x68] sm:$0x1] }
  0xcb   : > { %v2803_v19 = vcombine.low %v1104_v63, %v1107_v32  ;;  %v733_v5 = vsel %vm3185_vm2, 0, %v3968_v35  ;;  %v1283_v6 = vor.u32 %v1282_v26, %v1279_v42  ;;  %v1286_v45 = vshll.u32 %v1121_v53, 16  ;;  %v4112_v42 = vld [vmem:[#allocation2 + $0x4] sm:$0xf]  ;;  %v4114_v26 = vld [vmem:[#allocation2] sm:$0xf] }
  0xcc   : > { %1786 = vrot.lane.b32.xlu1 %v2795_v15, %s4451_s10  ;;  %1824 = vrot.lane.b32.xlu0 %v2802_v13, %s4449_s8  ;;  %v2743_v38 = vcombine.low %v733_v5, %v733_v5  ;;  %v2744_v61 = vcombine.high %v733_v5, %v733_v5  ;;  %v1292_v4 = vrot.slane %v1290_v44, 4  ;;  %v1296_v30 = vshll.u32 %v1130_v25, 16 }
  0xcd   : > { %v1284_v37 = vrot.slane %v1283_v6, 4  ;;  %v1288_v1 = vrot.slane %v1286_v45, 5  ;;  %v2770_v35 = vrot.slane %v1330_v17, 9  ;;  %v1400_v52 = vrot.slane %v1121_v53, 5 }
  0xce   : > { %747 = vst.msk [vmem:[#allocation2 + $0x60] sm:$0xf] %vm362_vm4, %v2743_v38  ;;  %748 = vst.msk [vmem:[#allocation2 + $0x64] sm:$0xf] %vm362_vm4, %v2744_v61  ;;  %v1403_v62 = vrot.slane %v1130_v25, 5  ;;  %v1298_v31 = vrot.slane %v1296_v30, 5  ;;  %v1775_v29 = vpop.permute.xlu0 %1774  ;;  %v2781_v57 = vcombine.low %v2998_v54, %v2997_v7  ;;  %v2780_v25 = vcombine.low %v4114_v26, %v4112_v42 }
  0xcf   : > { %v1293_v33 = vor.u32 %v1292_v4, %v1288_v1  ;;  %v1320_v47 = vshll.u32 %v4092_v0, 16  ;;  %v773_v2 = vshrl.u32 %v3970_v50, 16  ;;  %v1402_v3 = vrot.slane %v1400_v52, 4 }
  0xd0   : > { %1826 = vrot.lane.b32.xlu1 %v2803_v19, %s4449_s8  ;;  %1872 = vrot.lane.b32.xlu0 %v2810_v48, %s4452_s11  ;;  %v1289_v53 = vsel %vm3449_vm10, %v1284_v37, %v1288_v1  ;;  %v776_v63 = vshll.u32 %v3970_v50, 16  ;;  %v1401_v60 = vsel %vm3251_vm7, %v2770_v35, %v1400_v52  ;;  %v1410_v24 = vrot.slane %v4092_v0, 5 }
  0xd1   : > { %v1294_v34 = vrot.slane %v1293_v33, 4  ;;  %v775_v9 = vrot.slane %v773_v2, 7  ;;  %v1404_v15 = vsel %vm3251_vm7, %v1402_v3, %v1403_v62  ;;  %v4120_v32 = vrot.slane %v1320_v47, 5 }
  0xd2   : > { %v1600_v50 = vshll.u32 %v4102_v36, 16  ;;  %v1707_v6 = vrot.slane %v4102_v36, 5  ;;  %v2090_v45 = vsel %vm2084_vm11, %v2781_v57, %v1775_v29  ;;  %v2826_v61 = vcombine.low %v1401_v60, %v1404_v15  ;;  %v4129_v0 = vpop.permute.xlu0 %1900 }
  0xd3   : > { %v1299_v13 = vsel %vm3449_vm10, %v1294_v34, %v1298_v31  ;;  %v782_v44 = vsel %vm3185_vm2, %v775_v9, 0  ;;  %v4125_v48 = vpop.permute.xlu1 %1812  ;;  %v778_v30 = vor.u32 %v776_v63, %v775_v9  ;;  %v2786_v37 = vcombine.low %v4001_v12, %v4009_v23 }
  0xd4   : > { %v2818_v19 = vcombine.low %v1289_v53, %v1299_v13  ;;  %v2755_v5 = vcombine.low %v782_v44, %v782_v44  ;;  %v2787_v1 = vcombine.low %v4033_v51, %v4037_v56  ;;  %v2113_v13 = vsel %vm2109_vm12, %v2090_v45, %v4094_v49  ;;  %v4299_v51 = vld [vmem:[%s4411_s3] ss:$0 sm:$0xff] }
  0xd5   : > { %v1122_v17 = vld [vmem:[#allocation2 + $0x60] sm:$0xf]  ;;  %v1123_v38 = vld [vmem:[#allocation2 + $0x64] sm:$0xf] }
  0xd6   : > { %v1331_v4 = vld [vmem:[#allocation2 + $0x60] sm:$0xe]  ;;  %v1301_v35 = vshrl.u32 %v1122_v17, 16  ;;  %v1304_v52 = vshll.u32 %v1122_v17, 16  ;;  %v1314_v62 = vshrl.u32 %v1123_v38, 16  ;;  %v2811_v33 = vcombine.low %v1122_v17, %v1123_v38  ;;  %1912 = vrot.lane.b32.xlu0 %v2818_v19, %s4443_s29 }
  0xd7   : > { %v1424_v31 = vld [vmem:[#allocation2 + $0x60] sm:$0xf]  ;;  %797 = vst.msk [vmem:[#allocation2 + $0x74] sm:$0x1] %vm365_vm3, %v2755_v5  ;;  %v1310_v47 = vshll.u32 %v1123_v38, 16  ;;  %v2771_v2 = vrot.slane %v1331_v4, 9  ;;  %v4137_v54 = vpop.permute.xlu1 %1942 }
  0xd8   : > { %v1407_v29 = vrot.slane %v1123_v38, 5  ;;  %v1425_v3 = vld [vmem:[#allocation2 + $0x64] sm:$0xf]  ;;  %v1581_v7 = vshrl.u32 %v1424_v31, 16  ;;  %v1303_v57 = vrot.slane %v1301_v35, 4  ;;  %v1306_v53 = vrot.slane %v1304_v52, 5  ;;  %1874 = vrot.lane.b32.xlu1 %v2811_v33, %s4452_s11 }
  0xd9   : > { %v1316_v34 = vrot.slane %v1314_v62, 4  ;;  %v1584_v9 = vshll.u32 %v1424_v31, 16  ;;  %v1312_v63 = vrot.slane %v1310_v47, 5  ;;  %v1594_v5 = vshrl.u32 %v1425_v3, 16  ;;  %v1634_v62 = vld [vmem:[#allocation2 + $0x60] sm:$0xe]  ;;  %v1773_v47 = vpop.permute.xlu0 %1772 }
  0xda   : > { %v1409_v60 = vrot.slane %v1407_v29, 4  ;;  %v1583_v15 = vrot.slane %v1581_v7, 4  ;;  %v1307_v44 = vor.u32 %v1306_v53, %v1303_v57  ;;  %1952 = vrot.lane.b32.xlu0 %v2826_v61, %s3047_s13  ;;  %v2834_v17 = vcombine.low %v1424_v31, %v1425_v3 }
  0xdb   : > { %v1586_v19 = vrot.slane %v1584_v9, 5  ;;  %v1317_v38 = vor.u32 %v1316_v34, %v1312_v63  ;;  %v1408_v4 = vsel %vm3251_vm7, %v2771_v2, %v1407_v29  ;;  %v781_v35 = vsel %vm3185_vm2, 0, %v778_v30  ;;  %v4147_v33 = vpop.permute.xlu1 %1818 }
  0xdc   : > { %v1590_v52 = vshll.u32 %v1425_v3, 16  ;;  %v1308_v7 = vrot.slane %v1307_v44, 4  ;;  %v1411_v49 = vsel %vm3251_vm7, %v1409_v60, %v1410_v24  ;;  %v2753_v45 = vcombine.low %v781_v35, %v781_v35  ;;  %v2994_v44 = vld [vmem:[%s4410_s2 + $0x10] ss:$0 sps:$4 sm:$0x33]  }
  0xdd   : > { %v2754_v61 = vcombine.high %v781_v35, %v781_v35  ;;  %v1318_v57 = vrot.slane %v1317_v38, 4  ;;  %v1587_v31 = vor.u32 %v1586_v19, %v1583_v15  ;;  %v1596_v34 = vrot.slane %v1594_v5, 4  ;;  %2926 = vmatprep.subr.msk.bf16.mxu0 %vm2271_vm1, %v2994_v44  ;;  %2927 = vmatprep.subr.msk.bf16.mxu1 %vm2271_vm1, %v2994_v44 }
  0xde   : > { %v1592_v53 = vrot.slane %v1590_v52, 5  ;;  %v1313_v2 = vsel %vm3449_vm10, %v1308_v7, %v1312_v63  ;;  %2000 = vrot.lane.b32.xlu0 %v2834_v17, %s4442_s20  ;;  %795 = vst.msk [vmem:[#allocation2 + $0x6c] sm:$0xf] %vm362_vm4, %v2753_v45  ;;  %v2778_v22 = vrot.slane %v1634_v62, 9  ;;  %v1704_v30 = vrot.slane %v1425_v3, 5 }
  0xdf   : > { %796 = vst.msk [vmem:[#allocation2 + $0x70] sm:$0xf] %vm362_vm4, %v2754_v61  ;;  %v2130_v24 = vsel %vm2126_vm13, %v2113_v13, %v4027_v59  ;;  %v1323_v29 = vsel %vm3449_vm10, %v1318_v57, %v4120_v32  ;;  %v1588_v9 = vrot.slane %v1587_v31, 4  ;;  %v1602_v63 = vrot.slane %v1600_v50, 5  ;;  %v1903_v15 = vpop.permute.xlu1 %1902  ;;  %v2029_v17 = vpop.permute.xlu0 %2028  ;;  %v4174_v38 = vld [vmem:[#allocation2 + $0x74] sm:$0x1] }
  0xe0   : > { %v1597_v60 = vor.u32 %v1596_v34, %v1592_v53  ;;  %v2819_v19 = vcombine.low %v1313_v2, %v1323_v29  ;;  %v2827_v5 = vcombine.low %v1408_v4, %v1411_v49  ;;  %v1706_v3 = vrot.slane %v1704_v30, 4 }
  0xe1   : > { %v1593_v59 = vsel %vm3449_vm10, %v1588_v9, %v1592_v53  ;;  %v2147_v32 = vsel %vm2143_vm14, %v2130_v24, %v1903_v15  ;;  %v2087_v50 = vsel %vm2084_vm11, %v2780_v25, %v1773_v47  ;;  %v1705_v4 = vsel %vm3251_vm7, %v2778_v22, %v1704_v30  ;;  %v3001_v15 = vld [vmem:[#allocation2 + $0x1c] sm:$0xf] }
  0xe2   : > { %v1598_v13 = vrot.slane %v1597_v60, 4  ;;  %1914 = vrot.lane.b32.xlu1 %v2819_v19, %s4443_s29  ;;  %v1708_v35 = vsel %vm3251_vm7, %v1706_v3, %v1707_v6  ;;  %v2111_v52 = vsel %vm2109_vm12, %v2087_v50, %v4125_v48  ;;  %vm2177_vm2 = vcmask 195584  }
  0xe3   : > { %v2128_v26 = vsel %vm2126_vm13, %v2111_v52, %v3965_v20  ;;  %v2164_v62 = vsel %vm2160_vm15, %v2147_v32, %v4137_v54  ;;  %v2273_v6 = vsel %vm2271_vm1, %v2994_v44, 0  ;;  %v1624_v7 = vshll.u32 %v4174_v38, 16  ;;  %v2031_v45 = vpop.permute.xlu1 %2030  ;;  %v3002_v44 = vld [vmem:[#allocation2 + $0x18] sm:$0xf] }
  0xe4   : > { %v1603_v42 = vsel %vm3449_vm10, %v1598_v13, %v1602_v63  ;;  %v2145_v36 = vsel %vm2143_vm14, %v2128_v26, %v4129_v0  ;;  %v2850_v49 = vcombine.low %v1705_v4, %v1708_v35  ;;  %vm2194_vm3 = vcmask 228352   ;;  %2903 = vmatpush3.bf16.msra.mxu0 %v2273_v6  ;;  %2925 = vmatpush3.bf16.msra.mxu1 %v2273_v6 }
  0xe5   : > { %v2842_v25 = vcombine.low %v1593_v59, %v1603_v42  ;;  %v1426_v47 = vld [vmem:[#allocation2 + $0x6c] sm:$0xf]  ;;  %v2162_v20 = vsel %vm2160_vm15, %v2145_v36, %v4019_v16  ;;  %v2181_v34 = vsel %vm2177_vm2, %v2164_v62, %v4054_v28  ;;  %v1626_v60 = vrot.slane %v1624_v7, 5 }
  0xe6   : > { %v1427_v48 = vld [vmem:[#allocation2 + $0x70] sm:$0xf]  ;;  %1954 = vrot.lane.b32.xlu1 %v2827_v5, %s3047_s13  ;;  %v1605_v54 = vshrl.u32 %v1426_v47, 16  ;;  %v1608_v61 = vshll.u32 %v1426_v47, 16  ;;  %v2179_v2 = vsel %vm2177_vm2, %v2162_v20, %v3983_v40  ;;  %v1635_v29 = vld [vmem:[#allocation2 + $0x6c] sm:$0xe]  ;;  %v2782_v19 = vcombine.low %v3002_v44, %v3001_v15 }
  0xe7   : > { %v1618_v57 = vshrl.u32 %v1427_v48, 16  ;;  %v2835_v0 = vcombine.low %v1426_v47, %v1427_v48  ;;  %2040 = vrot.lane.b32.xlu0 %v2842_v25, %s4446_s16  ;;  %v1614_v31 = vshll.u32 %v1427_v48, 16  ;;  %v1711_v53 = vrot.slane %v1427_v48, 5  ;;  %v1905_v22 = vpop.permute.xlu0 %1904  ;;  %v1777_v32 = vpop.permute.xlu1 %1776  ;;  %s2647_s13 = sshll.u32 %s4488_s28, 1  ;;  %s2650_s28 = sshll.u32 %s4464_s22, 1 }
  0xe8   : > { %v1607_v16 = vrot.slane %v1605_v54, 4  ;;  %v1610_v30 = vrot.slane %v1608_v61, 5  ;;  %v1714_v63 = vrot.slane %v4174_v38, 5  ;;  %v2198_v28 = vsel %vm2194_vm3, %v2181_v34, %v2031_v45  ;;  %v3003_v61 = vld [vmem:[#allocation2 + $0x28] sm:$0xf]  ;;  %s295_s8 = sadd.s32 %s2650_s28, %s4490_s21 }
  0xe9   : > { %v1620_v24 = vrot.slane %v1618_v57, 4  ;;  %v1616_v9 = vrot.slane %v1614_v31, 5  ;;  %v2196_v40 = vsel %vm2194_vm3, %v2179_v2, %v2029_v17  ;;  %vm2211_vm4 = vcmask 261120   ;;  %s2651_s17 = sshll.u32 %s295_s8, 1 }
  0xea   : > { %2002 = vrot.lane.b32.xlu1 %v2835_v0, %s4442_s20  ;;  %v1611_v5 = vor.u32 %v1610_v30, %v1607_v16  ;;  %v2779_v59 = vrot.slane %v1635_v29, 9  ;;  %v1713_v13 = vrot.slane %v1711_v53, 4  ;;  %v2213_v50 = vsel %vm2211_vm4, %v2196_v40, %v4050_v14  ;;  %s2648_s20 = sshll.u32 %s4464_s22, 5  ;;  %s297_s9 = scalar_lea.vmem %s4414_s6, %s2651_s17 }
  0xeb   : > { %2080 = vrot.lane.b32.xlu0 %v2850_v49, %s4447_s12  ;;  %v1621_v3 = vor.u32 %v1620_v24, %v1616_v9  ;;  %v1945_v38 = vpop.permute.xlu0 %1944  ;;  %2904 = vmatprep.mubr.msk.bf16.mxu0 %vm2254_vm5, %v2213_v50  ;;  %v2215_v52 = vsel %vm2211_vm4, %v2198_v28, %v4067_v58  ;;  %v2093_v42 = vsel %vm2084_vm11, %v2782_v19, %v1777_v32  ;;  %v1779_v8 = vpop.permute.xlu1 %1778  ;;  %s286_s29 = sadd.s32 %s2648_s20, %s2647_s13 }
  0xec   : > { %v1612_v4 = vrot.slane %v1611_v5, 4  ;;  %2905 = vmatmul.mubr.msk.bf16.vlgmr.msra.gmra.mrb[0].mxu0 %vm2254_vm5, %v2215_v52  ;;  %v1712_v14 = vsel %vm3251_vm7, %v2779_v59, %v1711_v53  ;;  %v1715_v25 = vsel %vm3251_vm7, %v1713_v13, %v1714_v63  ;;  %v2115_v58 = vsel %vm2109_vm12, %v2093_v42, %v4085_v55 }
  0xed   : > { %v1622_v35 = vrot.slane %v1621_v3, 4  ;;  %v2851_v6 = vcombine.low %v1712_v14, %v1715_v25  ;;  %v2132_v47 = vsel %vm2126_vm13, %v2115_v58, %v4003_v39  ;;  %v3004_v39 = vld [vmem:[#allocation2 + $0x24] sm:$0xf] }
  0xee   : > { %v1617_v17 = vsel %vm3449_vm10, %v1612_v4, %v1616_v9  ;;  %v2149_v7 = vsel %vm2143_vm14, %v2132_v47, %v1905_v22  ;;  %v2783_v57 = vcombine.low %v3004_v39, %v3003_v61 }
  0xef   : > { %v1627_v26 = vsel %vm3449_vm10, %v1622_v35, %v1626_v60  ;;  %v1993_v62 = vpop.permute.xlu0 %1992  ;;  %v2166_v10 = vsel %vm2160_vm15, %v2149_v7, %v1945_v38 }
  0xf0   : > { %v2843_v36 = vcombine.low %v1617_v17, %v1627_v26  ;;  %v2183_v49 = vsel %vm2177_vm2, %v2166_v10, %v1993_v62  ;;  %v2096_v31 = vsel %vm2084_vm11, %v2783_v57, %v1779_v8 }
  0xf1   : > { %v2117_v53 = vsel %vm2109_vm12, %v2096_v31, %v4147_v33 }
  0xf2   : > { %2042 = vrot.lane.b32.xlu1 %v2843_v36, %s4446_s16  ;;  %v1907_v54 = vpop.permute.xlu1 %1906  ;;  %v2134_v2 = vsel %vm2126_vm13, %v2117_v53, %v4072_v46  ;;  %s2649_s16 = sshll.u32 %s286_s29, 3 }
  0xf3   : > { %v2151_v22 = vsel %vm2143_vm14, %v2134_v2, %v1907_v54  ;;  %s4304_s30 = scalar_lea.vmem %s4413_s5, %s2649_s16 }
  0xf4   : > { %v2033_v48 = vpop.permute.xlu0 %2032 }
  0xf5   : > { %v2200_v45 = vsel %vm2194_vm3, %v2183_v49, %v2033_v48 }
  0xf6   : > { %2082 = vrot.lane.b32.xlu1 %v2851_v6, %s4447_s12  ;;  %v1947_v0 = vpop.permute.xlu1 %1946 }
  0xf7   : > { %v2168_v16 = vsel %vm2160_vm15, %v2151_v22, %v1947_v0 }
  0xf8   : > { %v2073_v20 = vpop.permute.xlu0 %2072 }
  0xf9   : > { %v2217_v55 = vsel %vm2211_vm4, %v2200_v45, %v2073_v20 }
  0xfa   : > { %2908 = vmatprep.mubr.msk.bf16.mxu0 %vm2254_vm5, %v2217_v55 }
 0x103   : > { %v1995_v34 = vpop.permute.xlu1 %1994 }
 0x104   : > { %v2185_v24 = vsel %vm2177_vm2, %v2168_v16, %v1995_v34 }
 0x109   : > { %v2075_v30 = vpop.permute.xlu0 %2074 }
 0x10d   : > { %v2035_v29 = vpop.permute.xlu1 %2034  ;;  %v1821_v33 = vpop.permute.xlu0 %1820 }
 0x10e   : > { %v2202_v9 = vsel %vm2194_vm3, %v2185_v24, %v2035_v29 }
 0x10f   : > { %v2219_v60 = vsel %vm2211_vm4, %v2202_v9, %v2075_v30 }
 0x110   : > { %2909 = vmatmul.mubr.msk.bf16.gmra.mrb[4].mxu0 %vm2254_vm5, %v2219_v60 }
 0x111   : > { %v1781_v63 = vpop.permute.xlu1 %1780  ;;  %v1869_v44 = vpop.permute.xlu0 %1868 }
 0x112   : > { %v2099_v13 = vsel %vm2084_vm11, %v2784_v11, %v1781_v63 }
 0x113   : > { %v2119_v32 = vsel %vm2109_vm12, %v2099_v13, %v1821_v33 }
 0x114   : > { %v2136_v50 = vsel %vm2126_vm13, %v2119_v32, %v1869_v44 }
 0x115   : > { %v1783_v15 = vpop.permute.xlu1 %1782 }
 0x116   : > { %v2102_v52 = vsel %vm2084_vm11, %v2785_v18, %v1783_v15 }
 0x119   : > { %v1823_v19 = vpop.permute.xlu1 %1822  ;;  %v1909_v46 = vpop.permute.xlu0 %1908 }
 0x11a   : > { %v2153_v4 = vsel %vm2143_vm14, %v2136_v50, %v1909_v46  ;;  %v2121_v42 = vsel %vm2109_vm12, %v2102_v52, %v1823_v19 }
 0x11d   : > { %v1949_v28 = vpop.permute.xlu0 %1948 }
 0x11e   : > { %v2170_v17 = vsel %vm2160_vm15, %v2153_v4, %v1949_v28 }
 0x120   : > { %v1871_v5 = vpop.permute.xlu1 %1870 }
 0x121   : > { %v2138_v41 = vsel %vm2126_vm13, %v2121_v42, %v1871_v5 }
 0x124   : > { %v1997_v3 = vpop.permute.xlu0 %1996 }
 0x125   : > { %v2187_v43 = vsel %vm2177_vm2, %v2170_v17, %v1997_v3 }
 0x12a   : > { %v1911_v40 = vpop.permute.xlu1 %1910 }
 0x12b   : > { %v2155_v14 = vsel %vm2143_vm14, %v2138_v41, %v1911_v40 }
 0x12e   : > { %v1951_v59 = vpop.permute.xlu1 %1950 }
 0x12f   : > { %v2172_v27 = vsel %vm2160_vm15, %v2155_v14, %v1951_v59 }
 0x131   : > { %v2037_v38 = vpop.permute.xlu0 %2036 }
 0x132   : > { %v1999_v35 = vpop.permute.xlu1 %1998  ;;  %v2204_v11 = vsel %vm2194_vm3, %v2187_v43, %v2037_v38 }
 0x133   : > { %v2189_v21 = vsel %vm2177_vm2, %v2172_v27, %v1999_v35 }
 0x135   : > { %v2077_v26 = vpop.permute.xlu0 %2076 }
 0x136   : > { %v2039_v25 = vpop.permute.xlu1 %2038  ;;  %v2221_v62 = vsel %vm2211_vm4, %v2204_v11, %v2077_v26 }
 0x137   : > { %2912 = vmatprep.mubr.msk.bf16.mxu1 %vm2254_vm5, %v2221_v62  ;;  %v2206_v18 = vsel %vm2194_vm3, %v2189_v21, %v2039_v25 }
 0x139   : > { %v2079_v36 = vpop.permute.xlu0 %2078 }
 0x13a   : > { %v2223_v58 = vsel %vm2211_vm4, %v2206_v18, %v2079_v36  ;;  %v1785_v6 = vpop.permute.xlu1 %1784 }
 0x13b   : > { %2913 = vmatmul.mubr.msk.bf16.vlgmr.msra.gmra.mrb[0].mxu1 %vm2254_vm5, %v2223_v58  ;;  %v2105_v54 = vsel %vm2084_vm11, %v2786_v37, %v1785_v6 }
 0x13e   : > { %v1825_v47 = vpop.permute.xlu0 %1824  ;;  %v1787_v48 = vpop.permute.xlu1 %1786 }
 0x13f   : > { %v2123_v61 = vsel %vm2109_vm12, %v2105_v54, %v1825_v47  ;;  %v2108_v37 = vsel %vm2084_vm11, %v2787_v1, %v1787_v48 }
 0x142   : > { %v1873_v8 = vpop.permute.xlu0 %1872  ;;  %v1827_v7 = vpop.permute.xlu1 %1826 }
 0x143   : > { %v2140_v39 = vsel %vm2126_vm13, %v2123_v61, %v1873_v8  ;;  %v2125_v16 = vsel %vm2109_vm12, %v2108_v37, %v1827_v7 }
 0x148   : > { %v1913_v10 = vpop.permute.xlu0 %1912 }
 0x149   : > { %v2157_v31 = vsel %vm2143_vm14, %v2140_v39, %v1913_v10 }
 0x14a   : > { %v1875_v45 = vpop.permute.xlu1 %1874 }
 0x14b   : > { %v2142_v30 = vsel %vm2126_vm13, %v2125_v16, %v1875_v45 }
 0x14c   : > { %v1953_v49 = vpop.permute.xlu0 %1952 }
 0x14d   : > { %v2174_v53 = vsel %vm2160_vm15, %v2157_v31, %v1953_v49 }
 0x150   : > { %v2001_v20 = vpop.permute.xlu0 %2000 }
 0x151   : > { %v2191_v34 = vsel %vm2177_vm2, %v2174_v53, %v2001_v20 }
 0x154   : > { %v1915_v55 = vpop.permute.xlu1 %1914 }
 0x155   : > { %v2159_v29 = vsel %vm2143_vm14, %v2142_v30, %v1915_v55 }
 0x158   : > { %v1955_v57 = vpop.permute.xlu1 %1954 }
 0x159   : > { %v2041_v0 = vpop.permute.xlu0 %2040  ;;  %v2176_v9 = vsel %vm2160_vm15, %v2159_v29, %v1955_v57 }
 0x15a   : > { %v2208_v2 = vsel %vm2194_vm3, %v2191_v34, %v2041_v0 }
 0x15c   : > { %v2003_v23 = vpop.permute.xlu1 %2002 }
 0x15d   : > { %v2081_v22 = vpop.permute.xlu0 %2080  ;;  %v2193_v60 = vsel %vm2177_vm2, %v2176_v9, %v2003_v23 }
 0x15e   : > { %v2225_v12 = vsel %vm2211_vm4, %v2208_v2, %v2081_v22 }
 0x15f   : > { %2916 = vmatprep.mubr.msk.bf16.mxu1 %vm2254_vm5, %v2225_v12 }
 0x164   : > { %v2043_v24 = vpop.permute.xlu1 %2042 }
 0x165   : > { %v2210_v63 = vsel %vm2194_vm3, %v2193_v60, %v2043_v24 }
 0x168   : > { %v2083_v33 = vpop.permute.xlu1 %2082 }
 0x169   : > { %v2227_v15 = vsel %vm2211_vm4, %v2210_v63, %v2083_v33 }
 0x16a   : > { %2917 = vmatmul.mubr.msk.bf16.gmra.mrb[4].mxu1 %vm2254_vm5, %v2227_v15 }
 0x1bf   : > { %v2906_v56 = vpop.f32.mrb[0].mxu0 }
 0x1c0   : > { %v2318_v1 = vadd.f32 %v2906_v56, %v4299_v51  ;;  %v2309_v44 = vpop.f32.mrb[1].mxu0 }
 0x1c1   : > { %v2310_v19 = vadd.f32 %v4299_v51, %v2309_v44  ;;  %v2907_v46 = vpop.f32.mrb[2].mxu0 }
 0x1c2   : > { %2374 = vst.msk [vmem:[%s4304_s30 + $0x10] sm:$0xff] %vm2109_vm12, %v2318_v1  ;;  %v2321_v5 = vadd.f32 %v2907_v46, %v4299_v51  ;;  %v2312_v28 = vpop.f32.mrb[3].mxu0  ;;  %v2427_v59 = vmul.f32 %v2318_v1, %v2318_v1  ;;  %v2391_v4 = vsel %vm2109_vm12, %v2318_v1, 0.0 }
 0x1c3   : > { %2372 = vst.msk [vmem:[%s4304_s30] sm:$0xff] %vm2109_vm12, %v2310_v19  ;;  %v2425_v40 = vmul.f32 %v2310_v19, %v2310_v19  ;;  %v2313_v3 = vadd.f32 %v4299_v51, %v2312_v28  ;;  %v2388_v13 = vsel %vm2109_vm12, %v2310_v19, 0.0 }
 0x1c4   : > { %2375 = vst.msk [vmem:[%s4304_s30 + $0x18] sm:$0xff] %vm2109_vm12, %v2321_v5  ;;  %v2428_v52 = vmul.f32 %v2321_v5, %v2321_v5  ;;  %v2444_v41 = vsel %vm2109_vm12, %v2427_v59, 0.0  ;;  %v2393_v11 = vsel %vm2109_vm12, %v2321_v5, 0.0 }
 0x1c5   : > { %2373 = vst.msk [vmem:[%s4304_s30 + $0x8] sm:$0xff] %vm2109_vm12, %v2313_v3  ;;  %v2389_v32 = vsel %vm2109_vm12, %v2313_v3, 0.0  ;;  %v2426_v50 = vmul.f32 %v2313_v3, %v2313_v3  ;;  %v2441_v35 = vsel %vm2109_vm12, %v2425_v40, 0.0 }
 0x1c6   : > { %v2390_v38 = vadd.f32 %v2389_v32, %v2388_v13  ;;  %v2446_v25 = vsel %vm2109_vm12, %v2428_v52, 0.0 }
 0x1c7   : > { %v2442_v17 = vsel %vm2109_vm12, %v2426_v50, 0.0 }
 0x1c8   : > { %v2392_v42 = vadd.f32 %v2391_v4, %v2390_v38  ;;  %v2443_v43 = vadd.f32 %v2442_v17, %v2441_v35 }
 0x1ca   : > { %v2445_v26 = vadd.f32 %v2444_v41, %v2443_v43  ;;  %v2394_v14 = vadd.f32 %v2393_v11, %v2392_v42 }
 0x1cc   : > { %v2447_v62 = vadd.f32 %v2446_v25, %v2445_v26 }
 0x1e3   : > { %v2910_v27 = vpop.f32.mrb[4].mxu0 }
 0x1e4   : > { %v2334_v21 = vadd.f32 %v2910_v27, %v4299_v51  ;;  %v2325_v18 = vpop.f32.mrb[5].mxu0 }
 0x1e5   : > { %v2326_v36 = vadd.f32 %v4299_v51, %v2325_v18  ;;  %v2911_v58 = vpop.f32.mrb[6].mxu0 }
 0x1e6   : > { %2378 = vst.msk [vmem:[%s4304_s30 + $0x30] sm:$0xff] %vm2109_vm12, %v2334_v21  ;;  %v2337_v6 = vadd.f32 %v2911_v58, %v4299_v51  ;;  %v2328_v47 = vpop.f32.mrb[7].mxu0  ;;  %v2431_v49 = vmul.f32 %v2334_v21, %v2334_v21  ;;  %v2399_v39 = vsel %vm2109_vm12, %v2334_v21, 0.0 }
 0x1e7   : > { %2376 = vst.msk [vmem:[%s4304_s30 + $0x20] sm:$0xff] %vm2109_vm12, %v2326_v36  ;;  %v2395_v48 = vsel %vm2109_vm12, %v2326_v36, 0.0  ;;  %v2429_v8 = vmul.f32 %v2326_v36, %v2326_v36  ;;  %v2329_v7 = vadd.f32 %v4299_v51, %v2328_v47 }
 0x1e8   : > { %v2396_v10 = vadd.f32 %v2395_v48, %v2394_v14  ;;  %2379 = vst.msk [vmem:[%s4304_s30 + $0x38] sm:$0xff] %vm2109_vm12, %v2337_v6  ;;  %v2432_v57 = vmul.f32 %v2337_v6, %v2337_v6  ;;  %v2452_v34 = vsel %vm2109_vm12, %v2431_v49, 0.0  ;;  %v2401_v2 = vsel %vm2109_vm12, %v2337_v6, 0.0 }
 0x1e9   : > { %v2448_v45 = vsel %vm2109_vm12, %v2429_v8, 0.0  ;;  %2377 = vst.msk [vmem:[%s4304_s30 + $0x28] sm:$0xff] %vm2109_vm12, %v2329_v7  ;;  %v2397_v20 = vsel %vm2109_vm12, %v2329_v7, 0.0  ;;  %v2430_v55 = vmul.f32 %v2329_v7, %v2329_v7 }
 0x1ea   : > { %v2449_v54 = vadd.f32 %v2448_v45, %v2447_v62  ;;  %v2398_v61 = vadd.f32 %v2397_v20, %v2396_v10  ;;  %v2454_v23 = vsel %vm2109_vm12, %v2432_v57, 0.0 }
 0x1eb   : > { %v2450_v0 = vsel %vm2109_vm12, %v2430_v55, 0.0 }
 0x1ec   : > { %v2400_v31 = vadd.f32 %v2399_v39, %v2398_v61  ;;  %v2451_v53 = vadd.f32 %v2450_v0, %v2449_v54 }
 0x1ee   : > { %v2453_v22 = vadd.f32 %v2452_v34, %v2451_v53  ;;  %v2402_v12 = vadd.f32 %v2401_v2, %v2400_v31 }
 0x1f0   : > { %v2455_v37 = vadd.f32 %v2454_v23, %v2453_v22 }
 0x20e   : > { %v2914_v16 = vpop.f32.mrb[0].mxu1 }
 0x20f   : > { %v2350_v30 = vadd.f32 %v2914_v16, %v4299_v51  ;;  %v2341_v24 = vpop.f32.mrb[1].mxu1 }
 0x210   : > { %v2342_v29 = vadd.f32 %v4299_v51, %v2341_v24  ;;  %v2915_v9 = vpop.f32.mrb[2].mxu1 }
 0x211   : > { %2382 = vst.msk [vmem:[%s4304_s30 + $0x50] sm:$0xff] %vm2109_vm12, %v2350_v30  ;;  %v2353_v60 = vadd.f32 %v2915_v9, %v4299_v51  ;;  %v2344_v63 = vpop.f32.mrb[3].mxu1  ;;  %v2435_v44 = vmul.f32 %v2350_v30, %v2350_v30  ;;  %v2407_v3 = vsel %vm2109_vm12, %v2350_v30, 0.0 }
 0x212   : > { %2380 = vst.msk [vmem:[%s4304_s30 + $0x40] sm:$0xff] %vm2109_vm12, %v2342_v29  ;;  %v2403_v33 = vsel %vm2109_vm12, %v2342_v29, 0.0  ;;  %v2433_v15 = vmul.f32 %v2342_v29, %v2342_v29  ;;  %v2345_v56 = vadd.f32 %v4299_v51, %v2344_v63 }
 0x213   : > { %v2404_v1 = vadd.f32 %v2403_v33, %v2402_v12  ;;  %2383 = vst.msk [vmem:[%s4304_s30 + $0x58] sm:$0xff] %vm2109_vm12, %v2353_v60  ;;  %v2436_v59 = vmul.f32 %v2353_v60, %v2353_v60  ;;  %v2460_v38 = vsel %vm2109_vm12, %v2435_v44, 0.0  ;;  %v2409_v4 = vsel %vm2109_vm12, %v2353_v60, 0.0 }
 0x214   : > { %v2456_v19 = vsel %vm2109_vm12, %v2433_v15, 0.0  ;;  %2381 = vst.msk [vmem:[%s4304_s30 + $0x48] sm:$0xff] %vm2109_vm12, %v2345_v56  ;;  %v2405_v46 = vsel %vm2109_vm12, %v2345_v56, 0.0  ;;  %v2434_v5 = vmul.f32 %v2345_v56, %v2345_v56 }
 0x215   : > { %v2457_v28 = vadd.f32 %v2456_v19, %v2455_v37  ;;  %v2406_v40 = vadd.f32 %v2405_v46, %v2404_v1  ;;  %v2462_v17 = vsel %vm2109_vm12, %v2436_v59, 0.0 }
 0x216   : > { %v2458_v13 = vsel %vm2109_vm12, %v2434_v5, 0.0 }
 0x217   : > { %v2408_v32 = vadd.f32 %v2407_v3, %v2406_v40  ;;  %v2459_v50 = vadd.f32 %v2458_v13, %v2457_v28 }
 0x219   : > { %v2461_v35 = vadd.f32 %v2460_v38, %v2459_v50  ;;  %v2410_v52 = vadd.f32 %v2409_v4, %v2408_v32 }
 0x21b   : > { %v2463_v42 = vadd.f32 %v2462_v17, %v2461_v35 }
 0x23d   : > { %v2918_v43 = vpop.f32.mrb[4].mxu1 }
 0x23e   : > { %v2366_v41 = vadd.f32 %v2918_v43, %v4299_v51  ;;  %v2357_v11 = vpop.f32.mrb[5].mxu1 }
 0x23f   : > { %v2358_v26 = vadd.f32 %v4299_v51, %v2357_v11  ;;  %v2919_v14 = vpop.f32.mrb[6].mxu1 }
 0x240   : > { %2386 = vst.msk [vmem:[%s4304_s30 + $0x70] sm:$0xff] %vm2109_vm12, %v2366_v41  ;;  %v2369_v25 = vadd.f32 %v2919_v14, %v4299_v51  ;;  %v2360_v62 = vpop.f32.mrb[7].mxu1  ;;  %v2439_v58 = vmul.f32 %v2366_v41, %v2366_v41  ;;  %v2415_v10 = vsel %vm2109_vm12, %v2366_v41, 0.0 }
 0x241   : > { %2384 = vst.msk [vmem:[%s4304_s30 + $0x60] sm:$0xff] %vm2109_vm12, %v2358_v26  ;;  %v2411_v27 = vsel %vm2109_vm12, %v2358_v26, 0.0  ;;  %v2437_v21 = vmul.f32 %v2358_v26, %v2358_v26  ;;  %v2361_v18 = vadd.f32 %v4299_v51, %v2360_v62 }
 0x242   : > { %v2412_v36 = vadd.f32 %v2411_v27, %v2410_v52  ;;  %2387 = vst.msk [vmem:[%s4304_s30 + $0x78] sm:$0xff] %vm2109_vm12, %v2369_v25  ;;  %v2440_v49 = vmul.f32 %v2369_v25, %v2369_v25  ;;  %v2468_v55 = vsel %vm2109_vm12, %v2439_v58, 0.0  ;;  %v2417_v54 = vsel %vm2109_vm12, %v2369_v25, 0.0 }
 0x243   : > { %v2464_v6 = vsel %vm2109_vm12, %v2437_v21, 0.0  ;;  %2385 = vst.msk [vmem:[%s4304_s30 + $0x68] sm:$0xff] %vm2109_vm12, %v2361_v18  ;;  %v2413_v47 = vsel %vm2109_vm12, %v2361_v18, 0.0  ;;  %v2438_v48 = vmul.f32 %v2361_v18, %v2361_v18 }
 0x244   : > { %v2465_v8 = vadd.f32 %v2464_v6, %v2463_v42  ;;  %v2414_v7 = vadd.f32 %v2413_v47, %v2412_v36  ;;  %v2470_v57 = vsel %vm2109_vm12, %v2440_v49, 0.0 }
 0x245   : > { %v2466_v51 = vsel %vm2109_vm12, %v2438_v48, 0.0 }
 0x246   : > { %v2416_v45 = vadd.f32 %v2415_v10, %v2414_v7  ;;  %v2467_v20 = vadd.f32 %v2466_v51, %v2465_v8 }
 0x248   : > { %v2418_v61 = vadd.f32 %v2417_v54, %v2416_v45  ;;  %v2469_v39 = vadd.f32 %v2468_v55, %v2467_v20 }
 0x24a   : > { %v2419_v0 = vrot.slane %v2418_v61, 4  ;;  %v2471_v31 = vadd.f32 %v2470_v57, %v2469_v39 }
 0x24c   : > { %v2420_v53 = vadd.f32 %v2419_v0, %v2418_v61  ;;  %v2472_v34 = vrot.slane %v2471_v31, 4 }
 0x24e   : > { %v2421_v2 = vrot.slane %v2420_v53, 2  ;;  %v2473_v22 = vadd.f32 %v2472_v34, %v2471_v31 }
 0x250   : > { %v2422_v12 = vadd.f32 %v2421_v2, %v2420_v53  ;;  %v2474_v23 = vrot.slane %v2473_v22, 2 }
 0x252   : > { %v2423_v37 = vrot.slane %v2422_v12, 1  ;;  %v2475_v16 = vadd.f32 %v2474_v23, %v2473_v22 }
 0x254   : > { %v2476_v30 = vrot.slane %v2475_v16, 1  ;;  %v2424_v24 = vadd.f32 %v2423_v37, %v2422_v12 }
 0x256   : > { %v2477_v29 = vadd.f32 %v2476_v30, %v2475_v16 }
 0x258   : > { %v2479_v9 = vsel %vm346_vm0, %v2424_v24, %v2477_v29 }
 0x259   : > { %2481 = vst.msk [vmem:[%s297_s9] sm:$0x3] %vm2480_vm6, %v2479_v9 }
 0x25a PF: > { %s17_s25 = sadd.s32 1, %s3043_s25   ;;  %s4453_s21 = smov %s3035_s23 }
 0x25b   : > { %p14_p3 = scmp.ge.s32.totalorder %s17_s25, 6   ;;  %s4454_s22 = smov %s3039_s24 }
 0x25c   : > { %s4455_s23 = smov %s4458_s26  ;;  %s4456_s24 = smov %s4462_s27 }
 0x25d   :  { %16 = sbr.rel (!%p14_p3) target bundleno = 3 (0x3), region = 101 }

// kernel: conv_block_pallas.3
= control target key start
LH: loop header
LB: loop body
LE: loop exit
PB: predicated region body
PF: predicated region fallthrough
CT: control target
= control target key end

     0   :  { %s3118_s21 = smov 0   ;;  %s3120_s22 = smov 0   ;;  %s4465_s0 = inlined_call_operand.vmem [shape: f32[1,8], index: 0, kind: input, shape index: {}]   ;;  %s4466_s1 = inlined_call_operand.vmem [shape: f32[1,8], index: 1, kind: input, shape index: {}]   ;;  %s4467_s2 = inlined_call_operand.vmem [shape: bf16[72,8], index: 2, kind: input, shape index: {}]   ;;  %s4468_s3 = inlined_call_operand.vmem [shape: f32[1,8], index: 3, kind: input, shape index: {}]   ;;  %s4469_s4 = inlined_call_operand.vmem [shape: f32[2,16,16,8], index: 4, kind: input, shape index: {}]   ;;  %s4470_s5 = inlined_call_operand.vmem [shape: f32[2,16,16,8], index: 5, kind: output, shape index: {0}]   ;;  %s4471_s6 = inlined_call_operand.vmem [shape: f32[2,2,2,8], index: 6, kind: output, shape index: {1}]  }
   0x1   :  { %s3122_s23 = smov 0   ;;  %s3124_s24 = smov 0  }
   0x2   :  { %s3126_s25 = smov 0  }
   0x3 LB: > { %s26_s26 = sadd.s32 1, %s3065_s23  ;;  %s29_s27 = sadd.s32 1, %s3069_s24  ;;  %s3073_s25 = sphi %s3126_s25, %s17_s25   ;;  %s3069_s24 = sphi %s3124_s24, %s4513_s24   ;;  %s3065_s23 = sphi %s3122_s23, %s4512_s23   ;;  %s3061_s22 = sphi %s3120_s22, %s4511_s22   ;;  %s3057_s21 = sphi %s3118_s21, %s4510_s21  }
   0x4   : > { %p27_p0 = scmp.ge.s32.totalorder %s26_s26, 2  ;;  %p2659_p1 = scmp.ge.s32.totalorder %s3073_s25, 1 }
   0x5   : > { %p231_p2 = scmp.lt.s32.totalorder %s3073_s25, 5 }
   0x6   : > { %s4515_s26 = smov (%p27_p0, %s26_s26), 0  ;;  %s4517_s27 = smov (!%p27_p0, %s29_s27), %s3069_s24 }
   0x7   : > { %p232_p3 = pnand %p2659_p1, %p231_p2  ;;  %p31_p4 = scmp.ge.s32.totalorder %s4517_s27, 2 }
   0x8   : > { %p274_p5 = scmp.lt.s32.totalorder (!%p232_p3), %s3061_s22, 1  ;;  %s3153_s28 = sshll.u32 (!%p232_p3), %s3057_s21, 3  ;;  %v3178_v0 = vld [vmem:[%s4465_s0] ss:$0 sm:$0xff] (!%p232_p3)  ;;  %vm346_vm0 = vcmask (!%p232_p3), 1040384   ;;  %vm365_vm3 = vcmask (!%p232_p3), 57344  }
   0x9   : > { %s4519_s27 = smov (%p31_p4, %s4517_s27), 0  ;;  %235 = sbr.rel (%p232_p3) target bundleno = 602 (0x25a), region = 40 }
   0xa   : > { %p367_p6 = scmp.ge.s32.totalorder (!%p232_p3), %s3153_s28, 0  ;;  %p368_p7 = scmp.lt.s32.totalorder (!%p232_p3), %s3153_s28, 16  ;;  %v3184_v1 = vld [vmem:[%s4466_s1] ss:$0 sm:$0xff] (!%p232_p3)  ;;  %vm347_vm1 = vsmask.f32 (!%p232_p3), 256 }
   0xb   : > { %p282_p8 = scmp.lt.s32.totalorder (!%p232_p3), %s3153_s28, 15  ;;  %p371_p9 = scmp.gt.s32.totalorder (!%p232_p3), %s3153_s28, 0  ;;  %vm3215_vm2 = vmand (!%p232_p3), %vm346_vm0, %vm347_vm1  ;;  %vm362_vm4 = vcmask (!%p232_p3), 60416   ;;  %vm1049_vm5 = vcmask (!%p232_p3), 1042432   ;;  %vm1050_vm6 = vcmask (!%p232_p3), 1046532   ;;  %vm2084_vm11 = vcmask (!%p232_p3), 64512  }
   0xc   : > { %p3165_p10 = pnand (!%p232_p3), %p368_p7, %p367_p6  ;;  %s414_s12 = sadd.s32 (!%p232_p3), 1, %s3153_s28  ;;  %vm3281_vm7 = vmor (!%p232_p3), %vm1049_vm5, %vm1050_vm6  ;;  %vm822_vm8 = vsmask.f32 (!%p232_p3), 3328  ;;  %vm823_vm9 = vsmask.f32 (!%p232_p3), 7440  ;;  %vm2109_vm12 = vcmask (!%p232_p3), 130048  }
   0xd   : > { %p415_p11 = scmp.ge.s32.totalorder (!%p232_p3), %s414_s12, 0  ;;  %p416_p12 = scmp.lt.s32.totalorder (!%p232_p3), %s414_s12, 16  ;;  %vm3479_vm10 = vmor (!%p232_p3), %vm822_vm8, %vm823_vm9  ;;  %vm2126_vm13 = vcmask (!%p232_p3), 195584   ;;  %vm2143_vm14 = vcmask (!%p232_p3), 261120   ;;  %vm2160_vm15 = vcmask (!%p232_p3), 326656   ;;  %vm2287_vm1 = vcmask (!%p232_p3), 1043456  }
   0xe   : > { %p419_p13 = scmp.gt.s32.totalorder (!%p232_p3), %s414_s12, 0  ;;  %p2692_p0 = scmp.lt.s32.totalorder (!%p232_p3), %s414_s12, 15  ;;  %vm2270_vm5 = vcmask (!%p232_p3), 588800   ;;  %vm2496_vm6 = vcmask (!%p232_p3), 58368  }
   0xf   : > { %p3188_p1 = pnand (!%p232_p3), %p416_p12, %p415_p11  ;;  %s3198_s30 = sadd.s32 (!%p232_p3), 3, %s3153_s28 }
  0x10   : > { %s4521_s22 = smov (!%p274_p5, %s3061_s22), 1  ;;  %s4525_s12 = smov (!%p419_p13, %s414_s12), 0 }
  0x11   : > { %s2884_s29 = sshll.u32 %s4521_s22, 8  ;;  %s4527_s12 = smov (!%p2692_p0, %s4525_s12), 15 }
  0x12   : > { %s3163_s8 = scalar_lea.vmem %s4469_s4, %s2884_s29  ;;  %s462_s29 = sadd.s32 2, %s3153_s28 }
  0x13   : > { %s372_s10 = scalar_select %p371_p9, %s3153_s28, 0 }
  0x14   : > { %s2688_s11 = scalar_select %p3165_p10, 0.0, 1.0 }
  0x15   : > { %s4523_s10 = smov (!%p282_p8, %s372_s10), 15  ;;  %s2697_s7 = sshll.u32 %s4527_s12, 4 }
  0x16   : > { %s2687_s15 = sshll.u32 %s4523_s10, 4  ;;  %v384_v6 = vstv %s2688_s11  ;;  %p463_p2 = scmp.ge.s32.totalorder %s462_s29, 0 }
  0x17   : > { %s376_s16 = scalar_lea.vmem %s3163_s8, %s2687_s15  ;;  %s424_s9 = scalar_lea.vmem %s3163_s8, %s2697_s7 }
  0x18   : > { %v377_v2 = vld [vmem:[%s376_s16] sm:$0xff]  ;;  %v378_v3 = vld [vmem:[%s376_s16 + $0x8] sm:$0xff]  ;;  %s2698_s20 = scalar_select %p3188_p1, 0.0, 1.0 }
  0x19   : > { %v379_v4 = vmul.f32 %v3178_v0, %v377_v2  ;;  %v380_v5 = vmul.f32 %v3178_v0, %v378_v3  ;;  %p464_p3 = scmp.lt.s32.totalorder %s462_s29, 16  ;;  %v425_v12 = vld [vmem:[%s424_s9] sm:$0xff]  ;;  %v426_v13 = vld [vmem:[%s424_s9 + $0x8] sm:$0xff]  ;;  %p467_p4 = scmp.gt.s32.totalorder %s462_s29, 0 }
  0x1a   : > { %p2702_p5 = scmp.lt.s32.totalorder %s462_s29, 15  ;;  %v427_v16 = vmul.f32 %v3178_v0, %v425_v12  ;;  %v428_v17 = vmul.f32 %v3178_v0, %v426_v13  ;;  %p511_p7 = scmp.ge.s32.totalorder %s3198_s30, 0  ;;  %v432_v18 = vstv %s2698_s20 }
  0x1b   : > { %v381_v7 = vadd.f32 %v3184_v1, %v379_v4  ;;  %v382_v8 = vadd.f32 %v3184_v1, %v380_v5  ;;  %p3204_p6 = pnand %p464_p3, %p463_p2  ;;  %p512_p9 = scmp.lt.s32.totalorder %s3198_s30, 16 }
  0x1c   : > { %s468_s11 = scalar_select %p467_p4, %s462_s29, 0  ;;  %v429_v20 = vadd.f32 %v3184_v1, %v427_v16  ;;  %v430_v21 = vadd.f32 %v3184_v1, %v428_v17 }
  0x1d   : > { %v385_v9 = vmul.f32 %v384_v6, %v381_v7  ;;  %v386_v10 = vmul.f32 %v384_v6, %v382_v8  ;;  %s2708_s12 = scalar_select %p3204_p6, 0.0, 1.0 }
  0x1e   : > { %s4529_s11 = smov (!%p2702_p5, %s468_s11), 15  ;;  %v433_v24 = vmul.f32 %v432_v18, %v429_v20  ;;  %v434_v25 = vmul.f32 %v432_v18, %v430_v21  ;;  %p515_p10 = scmp.gt.s32.totalorder %s3198_s30, 0 }
  0x1f   : > { %v387_v11 = vpack.c.bf16 %v386_v10, %v385_v9  ;;  %s2707_s13 = sshll.u32 %s4529_s11, 4  ;;  %p2712_p11 = scmp.lt.s32.totalorder %s3198_s30, 15  ;;  %v480_v38 = vstv %s2708_s12 }
  0x20   : > { %v435_v28 = vpack.c.bf16 %v434_v25, %v433_v24  ;;  %s472_s14 = scalar_lea.vmem %s3163_s8, %s2707_s13  ;;  %p3230_p12 = pnand %p512_p9, %p511_p7 }
  0x21   : > { %v389_v14 = vshrl.u32 %v387_v11, 16  ;;  %v392_v15 = vshll.u32 %v387_v11, 16  ;;  %v473_v32 = vld [vmem:[%s472_s14] sm:$0xff]  ;;  %v474_v33 = vld [vmem:[%s472_s14 + $0x8] sm:$0xff]  ;;  %s516_s16 = scalar_select %p515_p10, %s3198_s30, 0 }
  0x22   : > { %v437_v34 = vshrl.u32 %v435_v28, 16  ;;  %v440_v35 = vshll.u32 %v435_v28, 16  ;;  %v475_v36 = vmul.f32 %v3178_v0, %v473_v32  ;;  %v476_v37 = vmul.f32 %v3178_v0, %v474_v33  ;;  %s2718_s17 = scalar_select %p3230_p12, 0.0, 1.0 }
  0x23   : > { %v391_v19 = vrot.slane %v389_v14, 7  ;;  %s4531_s16 = smov (!%p2712_p11, %s516_s16), 15  ;;  %s3252_s20 = sadd.s32 4294967295, %s3153_s28 }
  0x24   : > { %v439_v39 = vrot.slane %v437_v34, 7  ;;  %v477_v40 = vadd.f32 %v3184_v1, %v475_v36  ;;  %v478_v41 = vadd.f32 %v3184_v1, %v476_v37  ;;  %s2717_s18 = sshll.u32 %s4531_s16, 4  ;;  %p304_p13 = scmp.ge.s32.totalorder %s3252_s20, 0  ;;  %v528_v55 = vstv %s2718_s17 }
  0x25   : > { %v394_v23 = vor.u32 %v392_v15, %v391_v19  ;;  %v398_v26 = vsel %vm3215_vm2, %v391_v19, 0  ;;  %s520_s19 = scalar_lea.vmem %s3163_s8, %s2717_s18  ;;  %p305_p0 = scmp.lt.s32.totalorder %s3252_s20, 16 }
  0x26   : > { %v2691_v29 = vcombine.low %v398_v26, %v398_v26  ;;  %v442_v42 = vor.u32 %v440_v35, %v439_v39  ;;  %v481_v43 = vmul.f32 %v480_v38, %v477_v40  ;;  %v482_v44 = vmul.f32 %v480_v38, %v478_v41  ;;  %v521_v46 = vld [vmem:[%s520_s19] sm:$0xff]  ;;  %v522_v47 = vld [vmem:[%s520_s19 + $0x8] sm:$0xff]  ;;  %p308_p1 = scmp.gt.s32.totalorder %s3252_s20, 0  ;;  %p2670_p2 = scmp.lt.s32.totalorder %s3252_s20, 15 }
  0x27   : > { %v397_v27 = vsel %vm3215_vm2, 0, %v394_v23  ;;  %v446_v45 = vsel %vm3215_vm2, %v439_v39, 0  ;;  %v523_v51 = vmul.f32 %v3178_v0, %v521_v46  ;;  %v524_v52 = vmul.f32 %v3178_v0, %v522_v47  ;;  %p3291_p3 = pnand %p305_p0, %p304_p13  ;;  %s4472_s7 = smov 24  }
  0x28   : > { %v2689_v30 = vcombine.low %v397_v27, %v397_v27  ;;  %v2690_v31 = vcombine.high %v397_v27, %v397_v27  ;;  %413 = vst.msk [vmem:[#allocation2 + $0x14] sm:$0x1] %vm365_vm3, %v2691_v29  ;;  %v2701_v48 = vcombine.low %v446_v45, %v446_v45  ;;  %v445_v49 = vsel %vm3215_vm2, 0, %v442_v42  ;;  %s309_s29 = scalar_select %p308_p1, %s3252_s20, 0 }
  0x29   : > { %v483_v50 = vpack.c.bf16 %v482_v44, %v481_v43  ;;  %v2699_v53 = vcombine.low %v445_v49, %v445_v49  ;;  %v2700_v54 = vcombine.high %v445_v49, %v445_v49  ;;  %v525_v61 = vadd.f32 %v3184_v1, %v523_v51  ;;  %s2678_s11 = scalar_select %p3291_p3, 0.0, 1.0 }
  0x2a   : > { %411 = vst.msk [vmem:[#allocation2 + $0xc] sm:$0xf] %vm362_vm4, %v2689_v30  ;;  %412 = vst.msk [vmem:[#allocation2 + $0x10] sm:$0xf] %vm362_vm4, %v2690_v31  ;;  %v526_v62 = vadd.f32 %v3184_v1, %v524_v52  ;;  %s4533_s29 = smov (!%p2670_p2, %s309_s29), 15  ;;  %s4482_s12 = smov 48  }
  0x2b   : > { %461 = vst.msk [vmem:[#allocation2 + $0x20] sm:$0x1] %vm365_vm3, %v2701_v48  ;;  %v485_v59 = vshrl.u32 %v483_v50, 16  ;;  %v488_v60 = vshll.u32 %v483_v50, 16  ;;  %v529_v8 = vmul.f32 %v528_v55, %v525_v61  ;;  %s2675_s9 = sshll.u32 %s4533_s29, 4  ;;  %s3077_s13 = smov 40  }
  0x2c   : > { %459 = vst.msk [vmem:[#allocation2 + $0x18] sm:$0xf] %vm362_vm4, %v2699_v53  ;;  %460 = vst.msk [vmem:[#allocation2 + $0x1c] sm:$0xf] %vm362_vm4, %v2700_v54  ;;  %v530_v9 = vmul.f32 %v528_v55, %v526_v62  ;;  %s3311_s10 = scalar_lea.vmem %s3163_s8, %s2675_s9  ;;  %s4474_s14 = smov 16  }
  0x2d   : > { %v3277_v7 = vrot.slane %v485_v59, 7  ;;  %v314_v34 = vld [vmem:[%s3311_s10] sm:$0xff]  ;;  %s4476_s15 = smov 64   ;;  %s3522_s16 = sadd.s32 4, %s3153_s28 }
  0x2e   : > { %v531_v19 = vpack.c.bf16 %v530_v9, %v529_v8  ;;  %v322_v41 = vmul.f32 %v3178_v0, %v314_v34  ;;  %p563_p4 = scmp.gt.s32.totalorder %s3522_s16, 0  ;;  %s4484_s17 = smov 8  }
  0x2f   : > { %v3261_v56 = vld [vmem:[#allocation2 + $0x14] sm:$0x1]  ;;  %v490_v18 = vor.u32 %v488_v60, %v3277_v7  ;;  %s3540_s18 = sadd.s32 5, %s3153_s28  ;;  %p2722_p5 = scmp.lt.s32.totalorder %s3522_s16, 15 }
  0x30   : > { %v1361_v20 = vrot.slane %v3261_v56, 5  ;;  %v533_v28 = vshrl.u32 %v531_v19, 16  ;;  %v536_v29 = vshll.u32 %v531_v19, 16  ;;  %v3332_v40 = vld [vmem:[#allocation2 + $0x14] sm:$0x1]  ;;  %v333_v19 = vstv %s2678_s11  ;;  %s564_s19 = scalar_select %p563_p4, %s3522_s16, 0 }
  0x31   : > { %v1108_v57 = vld [vmem:[#allocation2 + $0xc] sm:$0xf]  ;;  %v3265_v58 = vld [vmem:[#allocation2 + $0x10] sm:$0xf]  ;;  %v493_v27 = vsel %vm3215_vm2, 0, %v490_v18  ;;  %v1064_v8 = vrot.slane %v3332_v40, 5  ;;  %v330_v18 = vadd.f32 %v3184_v1, %v322_v41 }
  0x32   : > { %v1142_v63 = vshll.u32 %v3265_v58, 16  ;;  %v1146_v2 = vshrl.u32 %v3265_v58, 16  ;;  %v2820_v3 = vcombine.low %v1108_v57, %v3265_v58  ;;  %v1133_v4 = vshrl.u32 %v1108_v57, 16  ;;  %v1324_v5 = vld [vmem:[#allocation2 + $0xc] sm:$0xe]  ;;  %s4480_s20 = smov 32  }
  0x33   : > { %v1136_v6 = vshll.u32 %v1108_v57, 16  ;;  %v3285_v11 = vld [vmem:[#allocation2 + $0x10] sm:$0xf]  ;;  %v1018_v12 = vld [vmem:[#allocation2 + $0xc] sm:$0xe]  ;;  %v2780_v15 = vrot.slane %v1324_v5, 9  ;;  %v2709_v30 = vcombine.low %v493_v27, %v493_v27  ;;  %v2710_v31 = vcombine.high %v493_v27, %v493_v27 }
  0x34   : > { %v3295_v13 = vrot.slane %v1146_v2, 4  ;;  %1860 = vrot.lane.b32.xlu0 %v2820_v3, %s4472_s7  ;;  %v1135_v14 = vrot.slane %v1133_v4, 4  ;;  %v1358_v16 = vrot.slane %v3265_v58, 5  ;;  %v2773_v24 = vrot.slane %v1018_v12, 9  ;;  %v1110_v36 = vld [vmem:[#allocation2 + $0x18] sm:$0xf] }
  0x35   : > { %v1138_v17 = vrot.slane %v1136_v6, 5  ;;  %v1061_v25 = vrot.slane %v3285_v11, 5  ;;  %v3326_v37 = vld [vmem:[#allocation2 + $0x1c] sm:$0xf]  ;;  %v3328_v38 = vrot.slane %v533_v28, 7  ;;  %v1157_v45 = vshrl.u32 %v1110_v36, 16 }
  0x36   : > { %v3305_v21 = vsel %vm3281_vm7, %v2780_v15, %v1358_v16  ;;  %v1360_v23 = vrot.slane %v1358_v16, 4  ;;  %v1166_v42 = vshll.u32 %v3326_v37, 16  ;;  %v1170_v43 = vshrl.u32 %v3326_v37, 16  ;;  %v1412_v46 = vld [vmem:[#allocation2 + $0x18] sm:$0xf]  ;;  %v315_v3 = vld [vmem:[%s3311_s10 + $0x8] sm:$0xff] }
  0x37   : > { %v1139_v26 = vor.u32 %v1138_v17, %v1135_v14  ;;  %v3319_v33 = vsel %vm3281_vm7, %v2773_v24, %v1061_v25  ;;  %v2821_v44 = vcombine.low %v1110_v36, %v3326_v37  ;;  %507 = vst.msk [vmem:[#allocation2 + $0x24] sm:$0xf] %vm362_vm4, %v2709_v30  ;;  %508 = vst.msk [vmem:[#allocation2 + $0x28] sm:$0xf] %vm362_vm4, %v2710_v31  ;;  %v3340_v47 = vld [vmem:[#allocation2 + $0x20] sm:$0x1] }
  0x38   : > { %v3315_v32 = vsel %vm3281_vm7, %v1360_v23, %v1361_v20  ;;  %v1160_v48 = vshll.u32 %v1110_v36, 16  ;;  %v3342_v49 = vld [vmem:[#allocation2 + $0x1c] sm:$0xf]  ;;  %v1437_v50 = vshrl.u32 %v1412_v46, 16  ;;  %v1440_v51 = vshll.u32 %v1412_v46, 16  ;;  %p559_p6 = scmp.ge.s32.totalorder %s3522_s16, 0 }
  0x39   : > { %v3324_v35 = vrot.slane %v1139_v26, 4  ;;  %v2836_v39 = vcombine.low %v3305_v21, %v3315_v32  ;;  %v538_v52 = vor.u32 %v536_v29, %v3328_v38  ;;  %v3345_v53 = vrot.slane %v1170_v43, 4  ;;  %1862 = vrot.lane.b32.xlu1 %v2821_v44, %s4472_s7  ;;  %v1628_v59 = vld [vmem:[#allocation2 + $0x18] sm:$0xe]  ;;  %p560_p7 = scmp.lt.s32.totalorder %s3522_s16, 16  ;;  %p611_p9 = scmp.gt.s32.totalorder %s3540_s18, 0 }
  0x3a   : > { %v1159_v54 = vrot.slane %v1157_v45, 4  ;;  %v1450_v55 = vshrl.u32 %v3342_v49, 16  ;;  %v2844_v57 = vcombine.low %v1412_v46, %v3342_v49  ;;  %v1162_v60 = vrot.slane %v1160_v48, 5  ;;  %s4535_s19 = smov (!%p2722_p5, %s564_s19), 15  ;;  %p607_p10 = scmp.ge.s32.totalorder %s3540_s18, 0 }
  0x3b   : > { %v3350_v61 = vrot.slane %v1437_v50, 4  ;;  %v3352_v62 = vrot.slane %v1440_v51, 5  ;;  %v541_v2 = vsel %vm3215_vm2, 0, %v538_v52  ;;  %v1063_v6 = vrot.slane %v1061_v25, 4  ;;  %v1325_v52 = vld [vmem:[#allocation2 + $0x18] sm:$0xe]  ;;  %p3592_p13 = pnand %p560_p7, %p559_p6 }
  0x3c   : > { %1988 = vrot.lane.b32.xlu0 %v2844_v57, %s4482_s12  ;;  %v2719_v4 = vcombine.low %v541_v2, %v541_v2  ;;  %v2720_v5 = vcombine.high %v541_v2, %v541_v2  ;;  %v1163_v9 = vor.u32 %v1162_v60, %v1159_v54  ;;  %v2788_v12 = vrot.slane %v1628_v59, 9  ;;  %v3404_v60 = vld [vmem:[#allocation2 + $0x20] sm:$0x1]  ;;  %p608_p11 = scmp.lt.s32.totalorder %s3540_s18, 16  ;;  %p2732_p12 = scmp.lt.s32.totalorder %s3540_s18, 15 }
  0x3d   : > { %v1662_v14 = vrot.slane %v3342_v49, 5  ;;  %v1665_v15 = vrot.slane %v3340_v47, 5  ;;  %v3365_v16 = vsel %vm3281_vm7, %v1063_v6, %v1064_v8  ;;  %v323_v17 = vmul.f32 %v3178_v0, %v315_v3  ;;  %v3411_v6 = vld [vmem:[#allocation2 + $0x1c] sm:$0xf]  ;;  %s612_s29 = scalar_select %p611_p9, %s3540_s18, 0 }
  0x3e   : > { %555 = vst.msk [vmem:[#allocation2 + $0x30] sm:$0xf] %vm362_vm4, %v2719_v4  ;;  %556 = vst.msk [vmem:[#allocation2 + $0x34] sm:$0xf] %vm362_vm4, %v2720_v5  ;;  %v3372_v20 = vrot.slane %v1163_v9, 4  ;;  %v2813_v25 = vcombine.low %v3319_v33, %v3365_v16  ;;  %v494_v3 = vsel %vm3215_vm2, %v3277_v7, 0  ;;  %p3615_p0 = pnand %p608_p11, %p607_p10 }
  0x3f   : > { %v1414_v23 = vld [vmem:[#allocation2 + $0x24] sm:$0xf]  ;;  %v3374_v24 = vld [vmem:[#allocation2 + $0x28] sm:$0xf]  ;;  %v3380_v26 = vsel %vm3281_vm7, %v2788_v12, %v1662_v14  ;;  %v1664_v27 = vrot.slane %v1662_v14, 4  ;;  %v331_v44 = vadd.f32 %v3184_v1, %v323_v17  ;;  %v334_v1 = vmul.f32 %v333_v19, %v330_v18  ;;  %s2727_s9 = sshll.u32 %s4535_s19, 4 }
  0x40   : > { %v1461_v28 = vshrl.u32 %v1414_v23, 16  ;;  %v1464_v0 = vshll.u32 %v1414_v23, 16  ;;  %v1474_v29 = vshrl.u32 %v3374_v24, 16  ;;  %v2845_v30 = vcombine.low %v1414_v23, %v3374_v24  ;;  %v1112_v31 = vld [vmem:[#allocation2 + $0x24] sm:$0xf]  ;;  %s4537_s29 = smov (!%p2732_p12, %s612_s29), 15 }
  0x41   : > { %v3384_v34 = vld [vmem:[#allocation2 + $0x28] sm:$0xf]  ;;  %v1181_v36 = vshrl.u32 %v1112_v31, 16  ;;  %v1184_v41 = vshll.u32 %v1112_v31, 16  ;;  %v3388_v43 = vsel %vm3281_vm7, %v1664_v27, %v1665_v15  ;;  %v1629_v45 = vld [vmem:[#allocation2 + $0x24] sm:$0xe]  ;;  %v335_v2 = vmul.f32 %v333_v19, %v331_v44 }
  0x42   : > { %v3391_v46 = vrot.slane %v1461_v28, 4  ;;  %v3393_v48 = vrot.slane %v1464_v0, 5  ;;  %1990 = vrot.lane.b32.xlu1 %v2845_v30, %s4482_s12  ;;  %v1194_v50 = vshrl.u32 %v3384_v34, 16  ;;  %v2822_v51 = vcombine.low %v1112_v31, %v3384_v34  ;;  %v3416_v17 = vld [vmem:[#allocation2 + $0x20] sm:$0x1]  ;;  %s3632_s16 = sadd.s32 6, %s3153_s28 }
  0x43   : > { %v3398_v54 = vrot.slane %v1181_v36, 4  ;;  %v3400_v57 = vrot.slane %v1184_v41, 5  ;;  %v2860_v59 = vcombine.low %v3380_v26, %v3388_v43  ;;  %v2789_v4 = vrot.slane %v1629_v45, 9  ;;  %v1019_v27 = vld [vmem:[#allocation2 + $0x18] sm:$0xe]  ;;  %s4478_s18 = smov 56  }
  0x44   : > { %1864 = vrot.lane.b32.xlu0 %v2822_v51, %s4472_s7  ;;  %v1669_v5 = vrot.slane %v3374_v24, 5  ;;  %v2711_v12 = vcombine.low %v494_v3, %v494_v3  ;;  %v2781_v14 = vrot.slane %v1325_v52, 9  ;;  %v1365_v15 = vrot.slane %v3326_v37, 5  ;;  %v3431_v36 = vld [vmem:[#allocation2 + $0x28] sm:$0xf]  ;;  %p659_p1 = scmp.gt.s32.totalorder %s3632_s16, 0 }
  0x45   : > { %v1114_v8 = vld [vmem:[#allocation2 + $0x30] sm:$0xf]  ;;  %v3413_v9 = vld [vmem:[#allocation2 + $0x34] sm:$0xf]  ;;  %v1467_v18 = vor.u32 %v3393_v48, %v3391_v46  ;;  %v336_v28 = vpack.c.bf16 %v335_v2, %v334_v1  ;;  %v1020_v41 = vld [vmem:[#allocation2 + $0x24] sm:$0xe] }
  0x46   : > { %v1205_v7 = vshrl.u32 %v1114_v8, 16  ;;  %v1208_v19 = vshll.u32 %v1114_v8, 16  ;;  %v1218_v23 = vshrl.u32 %v3413_v9, 16  ;;  %v2823_v26 = vcombine.low %v1114_v8, %v3413_v9  ;;  %509 = vst.msk [vmem:[#allocation2 + $0x2c] sm:$0x1] %vm365_vm3, %v2711_v12  ;;  %p2742_p3 = scmp.lt.s32.totalorder %s3632_s16, 15 }
  0x47   : > { %v3425_v0 = vsel %vm3281_vm7, %v2789_v4, %v1669_v5  ;;  %v1671_v30 = vrot.slane %v1669_v5, 4  ;;  %v3429_v31 = vsel %vm3281_vm7, %v2781_v14, %v1365_v15  ;;  %v1367_v45 = vrot.slane %v1365_v15, 4  ;;  %v800_v4 = vld [vmem:[#allocation2 + $0xc] sm:$0xf]  ;;  %s2728_s11 = scalar_select %p3592_p13, 0.0, 1.0 }
  0x48   : > { %v3433_v43 = vrot.slane %v1205_v7, 4  ;;  %v3435_v44 = vrot.slane %v1208_v19, 5  ;;  %1866 = vrot.lane.b32.xlu1 %v2823_v26, %s4472_s7  ;;  %1940 = vrot.lane.b32.xlu0 %v2836_v39, %s3077_s13  ;;  %v1368_v51 = vrot.slane %v3404_v60, 5  ;;  %v338_v52 = vshrl.u32 %v336_v28, 16  ;;  %s3657_s7 = sadd.s32 7, %s3153_s28  ;;  %p655_p6 = scmp.ge.s32.totalorder %s3632_s16, 0 }
  0x49   : > { %v341_v1 = vshll.u32 %v336_v28, 16  ;;  %v2774_v2 = vrot.slane %v1019_v27, 9  ;;  %v1068_v3 = vrot.slane %v3411_v6, 5  ;;  %v1071_v8 = vrot.slane %v3416_v17, 5  ;;  %p707_p2 = scmp.gt.s32.totalorder %s3657_s7, 0  ;;  %p2752_p5 = scmp.lt.s32.totalorder %s3657_s7, 15 }
  0x4a   : > { %v3446_v5 = vsel %vm3281_vm7, %v1367_v45, %v1368_v51  ;;  %v2775_v12 = vrot.slane %v1020_v41, 9  ;;  %v1075_v14 = vrot.slane %v3431_v36, 5  ;;  %v340_v21 = vrot.slane %v338_v52, 7  ;;  %p656_p9 = scmp.lt.s32.totalorder %s3632_s16, 16  ;;  %p703_p10 = scmp.ge.s32.totalorder %s3657_s7, 0 }
  0x4b   : > { %v2837_v32 = vcombine.low %v3429_v31, %v3446_v5  ;;  %v3454_v39 = vsel %vm3281_vm7, %v2774_v2, %v1068_v3  ;;  %v1070_v15 = vrot.slane %v1068_v3, 4  ;;  %v850_v26 = vshrl.u32 %v800_v4, 16  ;;  %p704_p11 = scmp.lt.s32.totalorder %s3657_s7, 16 }
  0x4c   : > { %1814 = vrot.lane.b32.xlu1 %v2813_v25, %s4474_s14  ;;  %2068 = vrot.lane.b32.xlu0 %v2860_v59, %s4476_s15  ;;  %v3463_v7 = vsel %vm3281_vm7, %v2775_v12, %v1075_v14  ;;  %v1077_v19 = vrot.slane %v1075_v14, 4  ;;  %v853_v27 = vshll.u32 %v800_v4, 16  ;;  %v343_v28 = vor.u32 %v341_v1, %v340_v21  ;;  %p3832_p12 = pnand %p656_p9, %p655_p6 }
  0x4d   : > { %v350_v41 = vsel %vm3215_vm2, %v340_v21, 0  ;;  %v1072_v45 = vsel %vm3281_vm7, %v1070_v15, %v1071_v8  ;;  %v859_v33 = vshll.u32 %v3285_v11, 16  ;;  %v1429_v25 = vld [vmem:[#allocation2 + $0x2c] sm:$0x1]  ;;  %v852_v52 = vrot.slane %v850_v26, 4  ;;  %p3848_p13 = pnand %p704_p11, %p703_p10 }
  0x4e   : > { %v2681_v16 = vcombine.low %v350_v41, %v350_v41  ;;  %v2814_v59 = vcombine.low %v3454_v39, %v1072_v45  ;;  %v3471_v51 = vld [vmem:[#allocation2 + $0x2c] sm:$0x1]  ;;  %v855_v2 = vrot.slane %v853_v27, 5  ;;  %v349_v3 = vsel %vm3215_vm2, 0, %v343_v28 }
  0x4f   : > { %v1672_v1 = vrot.slane %v1429_v25, 5  ;;  %v1078_v4 = vrot.slane %v3471_v51, 5  ;;  %v861_v12 = vrot.slane %v859_v33, 5  ;;  %v2679_v14 = vcombine.low %v349_v3, %v349_v3 }
  0x50   : > { %v2680_v21 = vcombine.high %v349_v3, %v349_v3  ;;  %366 = vst.msk [vmem:[#allocation2 + $0x8] sm:$0x1] %vm365_vm3, %v2681_v16  ;;  %v856_v39 = vor.u32 %v855_v2, %v852_v52  ;;  %v863_v15 = vshrl.u32 %v3285_v11, 16  ;;  %v869_v28 = vshll.u32 %v3332_v40, 16 }
  0x51   : > { %v1673_v26 = vsel %vm3281_vm7, %v1671_v30, %v1672_v1  ;;  %v3488_v27 = vsel %vm3281_vm7, %v1077_v19, %v1078_v4  ;;  %v1168_v41 = vrot.slane %v1166_v42, 5  ;;  %363 = vst.msk [vmem:[#allocation2] sm:$0xf] %vm362_vm4, %v2679_v14  ;;  %v1176_v37 = vshll.u32 %v3404_v60, 16 }
  0x52   : > { %364 = vst.msk [vmem:[#allocation2 + $0x4] sm:$0xf] %vm362_vm4, %v2680_v21  ;;  %v2861_v45 = vcombine.low %v3425_v0, %v1673_v26  ;;  %v2815_v11 = vcombine.low %v3463_v7, %v3488_v27  ;;  %v857_v33 = vrot.slane %v856_v39, 4  ;;  %v865_v30 = vrot.slane %v863_v15, 4 }
  0x53   : > { %v871_v16 = vrot.slane %v869_v28, 5  ;;  %v1169_v19 = vsel %vm3479_vm10, %v3372_v20, %v1168_v41  ;;  %v1173_v40 = vor.u32 %v3345_v53, %v1168_v41  ;;  %v1144_v52 = vrot.slane %v1142_v63, 5 }
  0x54   : > { %2070 = vrot.lane.b32.xlu0 %v2861_v45, %s4476_s15  ;;  %v862_v42 = vsel %vm3479_vm10, %v857_v33, %v861_v12  ;;  %v866_v0 = vor.u32 %v865_v30, %v861_v12  ;;  %v1152_v2 = vshll.u32 %v3261_v56, 16  ;;  %v1178_v1 = vrot.slane %v1176_v37, 5  ;;  %v802_v37 = vld [vmem:[#allocation2 + $0x18] sm:$0xf]  ;;  %s4500_s15 = smov 32  }
  0x55   : > { %v1174_v3 = vrot.slane %v1173_v40, 4  ;;  %v1468_v53 = vrot.slane %v1467_v18, 4  ;;  %v1470_v20 = vshll.u32 %v3374_v24, 16  ;;  %v1145_v4 = vsel %vm3479_vm10, %v3324_v35, %v1144_v52 }
  0x56   : > { %v867_v60 = vrot.slane %v866_v0, 4  ;;  %v1149_v12 = vor.u32 %v3295_v13, %v1144_v52  ;;  %v1154_v58 = vrot.slane %v1152_v2, 5  ;;  %v1476_v21 = vrot.slane %v1474_v29, 4 }
  0x57   : > { %v814_v14 = vld [vmem:[#allocation2 + $0x8] sm:$0x1]  ;;  %v1179_v56 = vsel %vm3479_vm10, %v1174_v3, %v1178_v1  ;;  %v1472_v63 = vrot.slane %v1470_v20, 5  ;;  %v1480_v46 = vshll.u32 %v1429_v25, 16 }
  0x58   : > { %v1057_v48 = vrot.slane %v814_v14, 5  ;;  %1816 = vrot.lane.b32.xlu0 %v2814_v59, %s4474_s14  ;;  %v872_v35 = vsel %vm3479_vm10, %v867_v60, %v871_v16  ;;  %v3527_v13 = vcombine.low %v1169_v19, %v1179_v56  ;;  %v1150_v18 = vrot.slane %v1149_v12, 4  ;;  %v1017_v15 = vld [vmem:[#allocation2] sm:$0xe] }
  0x59   : > { %v799_v39 = vld [vmem:[#allocation2 + $0x4] sm:$0xf]  ;;  %v2805_v26 = vcombine.low %v862_v42, %v872_v35  ;;  %v1473_v24 = vsel %vm3479_vm10, %v1468_v53, %v1472_v63  ;;  %v1477_v29 = vor.u32 %v1476_v21, %v1472_v63  ;;  %v1482_v25 = vrot.slane %v1480_v46, 5  ;;  %v798_v59 = vld [vmem:[#allocation2] sm:$0xf] }
  0x5a   : > { %v2772_v28 = vrot.slane %v1017_v15, 9  ;;  %v1054_v41 = vrot.slane %v799_v39, 5  ;;  %v1155_v45 = vsel %vm3479_vm10, %v1150_v18, %v1154_v58  ;;  %v835_v33 = vshll.u32 %v799_v39, 16 }
  0x5b   : > { %v2828_v30 = vcombine.low %v1145_v4, %v1155_v45  ;;  %v1478_v16 = vrot.slane %v1477_v29, 4  ;;  %v826_v19 = vshrl.u32 %v798_v59, 16  ;;  %v829_v40 = vshll.u32 %v798_v59, 16 }
  0x5c   : > { %v1055_v42 = vsel %vm3281_vm7, %v2772_v28, %v1054_v41  ;;  %v1056_v0 = vrot.slane %v1054_v41, 4  ;;  %1774 = vrot.lane.b32.xlu0 %v2805_v26, %s4484_s17  ;;  %v837_v52 = vrot.slane %v835_v33, 5  ;;  %v839_v2 = vshrl.u32 %v799_v39, 16  ;;  %v804_v41 = vld [vmem:[#allocation2 + $0x24] sm:$0xf] }
  0x5d   : > { %v1483_v3 = vsel %vm3479_vm10, %v1478_v16, %v1482_v25  ;;  %v828_v1 = vrot.slane %v826_v19, 4  ;;  %v831_v53 = vrot.slane %v829_v40, 5  ;;  %v845_v20 = vshll.u32 %v814_v14, 16 }
  0x5e   : > { %v1058_v60 = vsel %vm3281_vm7, %v1056_v0, %v1057_v48  ;;  %v3544_v4 = vcombine.low %v1473_v24, %v1483_v3  ;;  %v841_v12 = vrot.slane %v839_v2, 4  ;;  %v874_v58 = vshrl.u32 %v802_v37, 16 }
  0x5f   : > { %v2812_v56 = vcombine.low %v1055_v42, %v1058_v60  ;;  %v832_v63 = vor.u32 %v831_v53, %v828_v1  ;;  %v847_v21 = vrot.slane %v845_v20, 5  ;;  %v877_v46 = vshll.u32 %v802_v37, 16 }
  0x60   : > { %1900 = vrot.lane.b32.xlu0 %v2828_v30, %s4480_s20  ;;  %v842_v14 = vor.u32 %v841_v12, %v837_v52  ;;  %v876_v35 = vrot.slane %v874_v58, 4  ;;  %v883_v48 = vshll.u32 %v3411_v6, 16  ;;  %v887_v18 = vshrl.u32 %v3411_v6, 16  ;;  %v3606_v58 = vld [vmem:[#allocation2 + $0x2c] sm:$0x1] }
  0x61   : > { %1812 = vrot.lane.b32.xlu1 %v2812_v56, %s4474_s14  ;;  %v833_v39 = vrot.slane %v832_v63, 4  ;;  %v879_v15 = vrot.slane %v877_v46, 5  ;;  %v893_v26 = vshll.u32 %v3416_v17, 16  ;;  %v1443_v24 = vor.u32 %v3352_v62, %v3350_v61 }
  0x62   : > { %v843_v29 = vrot.slane %v842_v14, 4  ;;  %v885_v25 = vrot.slane %v883_v48, 5  ;;  %v889_v28 = vrot.slane %v887_v18, 4  ;;  %v1446_v6 = vshll.u32 %v3342_v49, 16  ;;  %v1326_v48 = vld [vmem:[#allocation2 + $0x24] sm:$0xe] }
  0x63   : > { %v838_v45 = vsel %vm3479_vm10, %v833_v39, %v837_v52  ;;  %v880_v59 = vor.u32 %v879_v15, %v876_v35  ;;  %v895_v17 = vrot.slane %v893_v26, 5  ;;  %v1444_v33 = vrot.slane %v1443_v24, 4 }
  0x64   : > { %v848_v61 = vsel %vm3479_vm10, %v843_v29, %v847_v21  ;;  %v890_v62 = vor.u32 %v889_v28, %v885_v25  ;;  %v1448_v30 = vrot.slane %v1446_v6, 5  ;;  %v1452_v16 = vrot.slane %v1450_v55, 4 }
  0x65   : > { %1942 = vrot.lane.b32.xlu1 %v2837_v32, %s3077_s13  ;;  %v2804_v19 = vcombine.low %v838_v45, %v848_v61  ;;  %v881_v40 = vrot.slane %v880_v59, 4  ;;  %v1456_v37 = vshll.u32 %v3340_v47, 16  ;;  %v898_v42 = vshrl.u32 %v804_v41, 16  ;;  %v3662_v59 = vld [vmem:[#allocation2 + $0x30] sm:$0xf] }
  0x66   : > { %v891_v0 = vrot.slane %v890_v62, 4  ;;  %v1449_v49 = vsel %vm3479_vm10, %v1444_v33, %v1448_v30  ;;  %v1453_v55 = vor.u32 %v1452_v16, %v1448_v30  ;;  %v901_v52 = vshll.u32 %v804_v41, 16  ;;  %v3677_v62 = vld [vmem:[#allocation2 + $0x34] sm:$0xf] }
  0x67   : > { %1772 = vrot.lane.b32.xlu0 %v2804_v19, %s4484_s17  ;;  %v886_v31 = vsel %vm3479_vm10, %v881_v40, %v885_v25  ;;  %v1458_v5 = vrot.slane %v1456_v37, 5  ;;  %v900_v47 = vrot.slane %v898_v42, 4  ;;  %v907_v32 = vshll.u32 %v3431_v36, 16 }
  0x68   : > { %v896_v2 = vsel %vm3479_vm10, %v891_v0, %v895_v17  ;;  %v1454_v3 = vrot.slane %v1453_v55, 4  ;;  %v903_v1 = vrot.slane %v901_v52, 5  ;;  %v911_v53 = vshrl.u32 %v3431_v36, 16 }
  0x69   : > { %1818 = vrot.lane.b32.xlu1 %v2815_v11, %s4474_s14  ;;  %v3603_v20 = vcombine.low %v886_v31, %v896_v2  ;;  %v909_v60 = vrot.slane %v907_v32, 5  ;;  %v917_v12 = vshll.u32 %v3471_v51, 16  ;;  %v1187_v56 = vor.u32 %v3400_v57, %v3398_v54  ;;  %s2737_s14 = sshll.u32 %s4537_s29, 4  ;;  %s568_s29 = scalar_lea.vmem %s3163_s8, %s2727_s9 }
  0x6a   : > { %v1459_v36 = vsel %vm3479_vm10, %v1454_v3, %v1458_v5  ;;  %v904_v7 = vor.u32 %v903_v1, %v900_v47  ;;  %v913_v27 = vrot.slane %v911_v53, 4  ;;  %v1190_v51 = vshll.u32 %v3384_v34, 16  ;;  %s3680_s19 = scalar_lea.vmem %s3163_s8, %s2737_s14  ;;  %s3688_s9 = sadd.s32 8, %s3153_s28  ;;  %v570_v55 = vld [vmem:[%s568_s29 + $0x8] sm:$0xff] }
  0x6b   : > { %v2852_v11 = vcombine.low %v1449_v49, %v1459_v36  ;;  %v919_v54 = vrot.slane %v917_v12, 5  ;;  %v1188_v57 = vrot.slane %v1187_v56, 4  ;;  %v1196_v63 = vrot.slane %v1194_v50, 4  ;;  %v569_v49 = vld [vmem:[%s568_s29] sm:$0xff]  ;;  %s660_s14 = scalar_select %p659_p1, %s3632_s16, 0 }
  0x6c   : > { %v905_v21 = vrot.slane %v904_v7, 4  ;;  %v914_v46 = vor.u32 %v913_v27, %v909_v60  ;;  %v1192_v14 = vrot.slane %v1190_v51, 5  ;;  %v1200_v35 = vshll.u32 %v3606_v58, 16  ;;  %v617_v53 = vld [vmem:[%s3680_s19] sm:$0xff]  ;;  %p755_p4 = scmp.gt.s32.totalorder %s3688_s9, 0  ;;  %p2762_p7 = scmp.lt.s32.totalorder %s3688_s9, 15 }
  0x6d   : > { %1902 = vrot.lane.b32.xlu1 %v3527_v13, %s4480_s20  ;;  %2028 = vrot.lane.b32.xlu0 %v2852_v11, %s4478_s18  ;;  %v542_v50 = vsel %vm3215_vm2, %v3328_v38, 0  ;;  %v1211_v18 = vor.u32 %v3435_v44, %v3433_v43  ;;  %v1214_v39 = vshll.u32 %v3413_v9, 16  ;;  %v1220_v15 = vrot.slane %v1218_v23, 4  ;;  %v1327_v23 = vld [vmem:[#allocation2 + $0x30] sm:$0xe]  ;;  %v3020_v36 = vld [vmem:[%s4467_s2] sm:$0xff]  }
  0x6e   : > { %v910_v13 = vsel %vm3479_vm10, %v905_v21, %v909_v60  ;;  %v915_v26 = vrot.slane %v914_v46, 4  ;;  %v1193_v38 = vsel %vm3479_vm10, %v1188_v57, %v1192_v14  ;;  %v1197_v24 = vor.u32 %v1196_v63, %v1192_v14  ;;  %v3716_v12 = vld [vmem:[%s4465_s0] ss:$0 sm:$0xff]  ;;  %s4539_s14 = smov (!%p2742_p3, %s660_s14), 15  ;;  %2918 = vmatprep.subr.bf16.mxu0 %v3020_v36  ;;  %2944 = vmatprep.subr.bf16.mxu1 %v3020_v36  ;;  %s4499_s29 = smov 48  }
  0x6f   : > { %v1202_v43 = vrot.slane %v1200_v35, 5  ;;  %v2721_v44 = vcombine.low %v542_v50, %v542_v50  ;;  %v3652_v29 = vrot.slane %v1211_v18, 4  ;;  %v3654_v25 = vrot.slane %v1214_v39, 5  ;;  %v3742_v63 = vld [vmem:[%s4466_s1] ss:$0 sm:$0xff]  ;;  %s3758_s12 = scalar_select %p755_p4, %s3688_s9, 0  ;;  %2919 = vmatpush3.bf16.msra.mxu0 %v3020_v36  ;;  %2949 = vmatpush3.bf16.msra.mxu1 %v3020_v36 }
  0x70   : > { %v920_v28 = vsel %vm3479_vm10, %v915_v26, %v919_v54  ;;  %v1198_v6 = vrot.slane %v1197_v24, 4  ;;  %v2782_v41 = vrot.slane %v1326_v48, 9  ;;  %v1372_v45 = vrot.slane %v3384_v34, 5  ;;  %v3737_v54 = vld [vmem:[%s4467_s2 + $0x8] sm:$0xff]   ;;  %s2747_s30 = sshll.u32 %s4539_s14, 4  ;;  %p752_p1 = scmp.lt.s32.totalorder %s3688_s9, 16 }
  0x71   : > { %2030 = vrot.lane.b32.xlu1 %v3544_v4, %s4478_s18  ;;  %v2807_v17 = vcombine.low %v910_v13, %v920_v28  ;;  %557 = vst.msk [vmem:[#allocation2 + $0x38] sm:$0x1] %vm365_vm3, %v2721_v44  ;;  %v1217_v33 = vsel %vm3479_vm10, %v3652_v29, %v3654_v25  ;;  %v1221_v34 = vor.u32 %v1220_v15, %v3654_v25  ;;  %v1375_v61 = vrot.slane %v3606_v58, 5  ;;  %s3726_s18 = scalar_select %p707_p2, %s3657_s7, 0 }
  0x72   : > { %v1203_v4 = vsel %vm3479_vm10, %v1198_v6, %v1202_v43  ;;  %v1373_v30 = vsel %vm3281_vm7, %v2782_v41, %v1372_v45  ;;  %v1374_v16 = vrot.slane %v1372_v45, 4  ;;  %v2783_v19 = vrot.slane %v1327_v23, 9  ;;  %v3764_v43 = vld [vmem:[#allocation2 + $0x30] sm:$0xf]  ;;  %v3772_v41 = vld [vmem:[#allocation2 + $0x34] sm:$0xf]  ;;  %2920 = vmatprep.subr.bf16.mxu0 %v3737_v54  ;;  %2945 = vmatprep.subr.bf16.mxu1 %v3737_v54 }
  0x73   : > { %v2830_v40 = vcombine.low %v1193_v38, %v1203_v4  ;;  %v3690_v37 = vrot.slane %v1221_v34, 4  ;;  %v1379_v42 = vrot.slane %v3413_v9, 5  ;;  %v1485_v0 = vshrl.u32 %v3662_v59, 16  ;;  %v1630_v9 = vld [vmem:[#allocation2 + $0x30] sm:$0xe]  ;;  %s4541_s18 = smov (!%p2752_p5, %s3726_s18), 15  ;;  %2921 = vmatpush3.bf16.msra.mxu0 %v3737_v54  ;;  %2950 = vmatpush3.bf16.msra.mxu1 %v3737_v54 }
  0x74   : > { %v1376_v52 = vsel %vm3281_vm7, %v1374_v16, %v1375_v61  ;;  %v1488_v31 = vshll.u32 %v3662_v59, 16  ;;  %v1498_v5 = vshrl.u32 %v3677_v62, 16  ;;  %v2846_v47 = vcombine.low %v3662_v59, %v3677_v62  ;;  %v3022_v45 = vld [vmem:[%s4467_s2 + $0x10] sm:$0xff]   ;;  %s4543_s12 = smov (!%p2762_p7, %s3758_s12), 15  ;;  %s2757_s14 = sshll.u32 %s4541_s18, 4 }
  0x75   : > { %1776 = vrot.lane.b32.xlu1 %v3603_v20, %s4484_s17  ;;  %1904 = vrot.lane.b32.xlu0 %v2830_v40, %s4480_s20  ;;  %v2838_v32 = vcombine.low %v1373_v30, %v1376_v52  ;;  %v3709_v2 = vsel %vm3281_vm7, %v2783_v19, %v1379_v42  ;;  %v1381_v3 = vrot.slane %v1379_v42, 4  ;;  %v1487_v1 = vrot.slane %v1485_v0, 4  ;;  %v3787_v30 = vld [vmem:[#allocation2 + $0x30] sm:$0xe]  ;;  %v3023_v52 = vld [vmem:[%s4467_s2 + $0x18] sm:$0xff]   ;;  %s4503_s20 = smov 56  }
  0x76   : > { %v1490_v60 = vrot.slane %v1488_v31, 5  ;;  %v571_v20 = vmul.f32 %v3716_v12, %v569_v49  ;;  %v572_v58 = vmul.f32 %v3716_v12, %v570_v55  ;;  %v576_v56 = vstv %s2728_s11  ;;  %2922 = vmatprep.subr.bf16.mxu0 %v3022_v45  ;;  %s3837_s11 = scalar_lea.vmem %s3163_s8, %s2747_s30  ;;  %2946 = vmatprep.subr.bf16.mxu1 %v3022_v45  ;;  %s712_s30 = scalar_lea.vmem %s3163_s8, %s2757_s14 }
  0x77   : > { %v1494_v7 = vshll.u32 %v3677_v62, 16  ;;  %v1500_v27 = vrot.slane %v1498_v5, 4  ;;  %v2790_v51 = vrot.slane %v1630_v9, 9  ;;  %v1676_v11 = vrot.slane %v3677_v62, 5  ;;  %2923 = vmatpush3.bf16.msra.mxu0 %v3022_v45  ;;  %2951 = vmatpush3.bf16.msra.mxu1 %v3022_v45  ;;  %s2748_s7 = scalar_select %p3832_p12, 0.0, 1.0 }
  0x78   : > { %v1127_v57 = vld [vmem:[#allocation2 + $0x38] sm:$0x1]  ;;  %v573_v21 = vadd.f32 %v3742_v63, %v571_v20  ;;  %v574_v46 = vadd.f32 %v3742_v63, %v572_v58  ;;  %v1491_v35 = vor.u32 %v1490_v60, %v1487_v1  ;;  %v3747_v48 = vmul.f32 %v3716_v12, %v617_v53  ;;  %2924 = vmatprep.subr.bf16.mxu0 %v3023_v52  ;;  %s4505_s14 = scalar_select %p3615_p0, 0.0, 1.0 }
  0x79   : > { %v1430_v14 = vld [vmem:[#allocation2 + $0x38] sm:$0x1]  ;;  %1778 = vrot.lane.b32.xlu1 %v2807_v17, %s4484_s17  ;;  %v1224_v50 = vshll.u32 %v1127_v57, 16  ;;  %1944 = vrot.lane.b32.xlu0 %v2838_v32, %s3077_s13  ;;  %v1382_v18 = vrot.slane %v1127_v57, 5  ;;  %v1496_v39 = vrot.slane %v1494_v7, 5  ;;  %v3762_v24 = vsel %vm3281_vm7, %v2790_v51, %v1676_v11  ;;  %s2767_s17 = sshll.u32 %s4543_s12, 4 }
  0x7a   : > { %v1504_v15 = vshll.u32 %v1430_v14, 16  ;;  %v577_v13 = vmul.f32 %v576_v56, %v573_v21  ;;  %v578_v26 = vmul.f32 %v576_v56, %v574_v46  ;;  %v1492_v38 = vrot.slane %v1491_v35, 4  ;;  %v3807_v55 = vld [vmem:[#allocation2 + $0x38] sm:$0x1]  ;;  %v618_v56 = vld [vmem:[%s3680_s19 + $0x8] sm:$0xff]  ;;  %v665_v51 = vld [vmem:[%s3837_s11] sm:$0xff]  ;;  %2947 = vmatprep.subr.bf16.mxu1 %v3023_v52  ;;  %s3871_s19 = scalar_lea.vmem %s3163_s8, %s2767_s17 }
  0x7b   : > { %v1226_v44 = vrot.slane %v1224_v50, 5  ;;  %v3770_v23 = vsel %vm3281_vm7, %v1381_v3, %v1382_v18  ;;  %v1501_v28 = vor.u32 %v1500_v27, %v1496_v39  ;;  %v1678_v4 = vrot.slane %v1676_v11, 4  ;;  %v666_v18 = vld [vmem:[%s3837_s11 + $0x8] sm:$0xff]  ;;  %s4504_s12 = smov 64   ;;  %2925 = vmatpush3.bf16.msra.mxu0 %v3023_v52  ;;  %2952 = vmatpush3.bf16.msra.mxu1 %v3023_v52  ;;  %p751_p0 = scmp.ge.s32.totalorder %s3688_s9, 0 }
  0x7c   : > { %v1506_v6 = vrot.slane %v1504_v15, 5  ;;  %v2839_v17 = vcombine.low %v3709_v2, %v3770_v23  ;;  %v579_v34 = vpack.c.bf16 %v578_v26, %v577_v13  ;;  %v1497_v61 = vsel %vm3479_vm10, %v1492_v38, %v1496_v39  ;;  %v713_v39 = vld [vmem:[%s712_s30] sm:$0xff]  ;;  %s2758_s8 = scalar_select %p3848_p13, 0.0, 1.0 }
  0x7d   : > { %v1227_v16 = vsel %vm3479_vm10, %v3690_v37, %v1226_v44  ;;  %1992 = vrot.lane.b32.xlu0 %v2846_v47, %s4499_s29  ;;  %v1502_v19 = vrot.slane %v1501_v28, 4  ;;  %v1679_v40 = vrot.slane %v1430_v14, 5  ;;  %v922_v42 = vshrl.u32 %v3764_v43, 16  ;;  %s4506_s17 = smov 16   ;;  %p3974_p2 = pnand %p752_p1, %p751_p0 }
  0x7e   : > { %v2831_v0 = vcombine.low %v1217_v33, %v1227_v16  ;;  %v581_v49 = vshrl.u32 %v579_v34, 16  ;;  %v584_v37 = vshll.u32 %v579_v34, 16  ;;  %v925_v59 = vshll.u32 %v3764_v43, 16  ;;  %s4508_s18 = smov 8   ;;  %s4509_s11 = smov 24  }
  0x7f   : > { %v1507_v62 = vsel %vm3479_vm10, %v1502_v19, %v1506_v6  ;;  %v1680_v29 = vsel %vm3281_vm7, %v1678_v4, %v1679_v40  ;;  %v924_v25 = vrot.slane %v922_v42, 4  ;;  %v931_v33 = vshll.u32 %v3772_v41, 16  ;;  %s2768_s9 = scalar_select %p3974_p2, 0.0, 1.0 }
  0x80   : > { %1906 = vrot.lane.b32.xlu1 %v2831_v0, %s4500_s15  ;;  %v583_v31 = vrot.slane %v581_v49, 7  ;;  %v2854_v5 = vcombine.low %v1497_v61, %v1507_v62  ;;  %v2862_v47 = vcombine.low %v3762_v24, %v1680_v29  ;;  %v927_v9 = vrot.slane %v925_v59, 5  ;;  %v714_v24 = vld [vmem:[%s712_s30 + $0x8] sm:$0xff]  ;;  %v761_v61 = vld [vmem:[%s3871_s19] sm:$0xff]  ;;  %s4545_s28 = smov (!%p282_p8, %s3153_s28), 15  ;;  %p292_p8 = scmp.lt.s32.totalorder %s3057_s21, 1 }
  0x81   : > { %v3839_v32 = vrot.slane %v931_v33, 5  ;;  %v935_v2 = vshrl.u32 %v3772_v41, 16  ;;  %v941_v3 = vshll.u32 %v3807_v55, 16  ;;  %v2776_v1 = vrot.slane %v3787_v30, 9  ;;  %v762_v59 = vld [vmem:[%s3871_s19 + $0x8] sm:$0xff] }
  0x82   : > { %v586_v53 = vor.u32 %v584_v37, %v583_v31  ;;  %2032 = vrot.lane.b32.xlu0 %v2854_v5, %s4503_s20  ;;  %v590_v60 = vsel %vm3215_vm2, %v583_v31, 0  ;;  %v928_v20 = vor.u32 %v927_v9, %v924_v25  ;;  %v1082_v58 = vrot.slane %v3772_v41, 5  ;;  %s4547_s21 = smov (!%p292_p8, %s3057_s21), 1 }
  0x83   : > { %v2731_v36 = vcombine.low %v590_v60, %v590_v60  ;;  %v937_v7 = vrot.slane %v935_v2, 4  ;;  %v1085_v27 = vrot.slane %v3807_v55, 5  ;;  %v943_v57 = vrot.slane %v941_v3, 5 }
  0x84   : > { %1946 = vrot.lane.b32.xlu1 %v2839_v17, %s3077_s13  ;;  %v589_v11 = vsel %vm3215_vm2, 0, %v586_v53  ;;  %v929_v54 = vrot.slane %v928_v20, 4  ;;  %v1084_v21 = vrot.slane %v1082_v58, 4  ;;  %v620_v50 = vmul.f32 %v3716_v12, %v618_v56 }
  0x85   : > { %v2729_v46 = vcombine.low %v589_v11, %v589_v11  ;;  %v2730_v14 = vcombine.high %v589_v11, %v589_v11  ;;  %605 = vst.msk [vmem:[#allocation2 + $0x44] sm:$0x1] %vm365_vm3, %v2731_v36  ;;  %v938_v35 = vor.u32 %v937_v7, %v3839_v32  ;;  %v3879_v13 = vsel %vm3281_vm7, %v2776_v1, %v1082_v58 }
  0x86   : > { %2072 = vrot.lane.b32.xlu0 %v2862_v47, %s4504_s12  ;;  %v934_v15 = vsel %vm3479_vm10, %v929_v54, %v3839_v32  ;;  %v621_v26 = vadd.f32 %v3742_v63, %v3747_v48  ;;  %v624_v38 = vstv %s4505_s14  ;;  %v3892_v23 = vsel %vm3281_vm7, %v1084_v21, %v1085_v27 }
  0x87   : > { %603 = vst.msk [vmem:[#allocation2 + $0x3c] sm:$0xf] %vm362_vm4, %v2729_v46  ;;  %604 = vst.msk [vmem:[#allocation2 + $0x40] sm:$0xf] %vm362_vm4, %v2730_v14  ;;  %v939_v44 = vrot.slane %v938_v35, 4  ;;  %v622_v28 = vadd.f32 %v3742_v63, %v620_v50  ;;  %v667_v48 = vmul.f32 %v3716_v12, %v665_v51  ;;  %v668_v45 = vmul.f32 %v3716_v12, %v666_v18 }
  0x88   : > { %v625_v6 = vmul.f32 %v624_v38, %v621_v26  ;;  %v672_v17 = vstv %s2748_s7  ;;  %v715_v34 = vmul.f32 %v3716_v12, %v713_v39  ;;  %v716_v19 = vmul.f32 %v3716_v12, %v714_v24 }
  0x89   : > { %v944_v4 = vsel %vm3479_vm10, %v939_v44, %v943_v57  ;;  %v626_v30 = vmul.f32 %v624_v38, %v622_v28  ;;  %v669_v16 = vadd.f32 %v3742_v63, %v667_v48  ;;  %v670_v40 = vadd.f32 %v3742_v63, %v668_v45 }
  0x8a   : > { %v717_v42 = vadd.f32 %v3742_v63, %v715_v34  ;;  %v720_v0 = vstv %s2758_s8  ;;  %v2816_v49 = vcombine.low %v3879_v13, %v3892_v23  ;;  %v718_v55 = vadd.f32 %v3742_v63, %v716_v19 }
  0x8b   : > { %v673_v37 = vmul.f32 %v672_v17, %v669_v16  ;;  %v763_v62 = vmul.f32 %v3716_v12, %v761_v61  ;;  %v3910_v25 = vcombine.low %v934_v15, %v944_v4  ;;  %v3914_v52 = vpack.c.bf16 %v626_v30, %v625_v6 }
  0x8c   : > { %v1431_v29 = vld [vmem:[#allocation2 + $0x44] sm:$0x1]  ;;  %v674_v31 = vmul.f32 %v672_v17, %v670_v40  ;;  %v3916_v5 = vmul.f32 %v720_v0, %v717_v42  ;;  %v3922_v20 = vmul.f32 %v720_v0, %v718_v55  ;;  %v764_v58 = vmul.f32 %v3716_v12, %v762_v59 }
  0x8d   : > { %v3912_v33 = vld [vmem:[#allocation2 + $0x44] sm:$0x1]  ;;  %v1528_v47 = vshll.u32 %v1431_v29, 16  ;;  %v1686_v9 = vrot.slane %v1431_v29, 5  ;;  %v3926_v56 = vadd.f32 %v3742_v63, %v763_v62 }
  0x8e   : > { %v965_v32 = vshll.u32 %v3912_v33, 16  ;;  %v1092_v2 = vrot.slane %v3912_v33, 5  ;;  %v1418_v3 = vld [vmem:[#allocation2 + $0x3c] sm:$0xf]  ;;  %v1419_v1 = vld [vmem:[#allocation2 + $0x40] sm:$0xf]  ;;  %v3920_v60 = vpack.c.bf16 %v674_v31, %v673_v37 }
  0x8f   : > { %v1631_v53 = vld [vmem:[#allocation2 + $0x3c] sm:$0xe]  ;;  %v1509_v36 = vshrl.u32 %v1418_v3, 16  ;;  %v1512_v7 = vshll.u32 %v1418_v3, 16  ;;  %v1522_v27 = vshrl.u32 %v1419_v1, 16  ;;  %v2847_v51 = vcombine.low %v1418_v3, %v1419_v1 }
  0x90   : > { %v3928_v11 = vld [vmem:[#allocation2 + $0x3c] sm:$0xf]  ;;  %v1518_v54 = vshll.u32 %v1419_v1, 16  ;;  %v1530_v57 = vrot.slane %v1528_v47, 5  ;;  %v2791_v21 = vrot.slane %v1631_v53, 9  ;;  %v1683_v46 = vrot.slane %v1419_v1, 5 }
  0x91   : > { %v3930_v14 = vld [vmem:[#allocation2 + $0x40] sm:$0xf]  ;;  %v1511_v35 = vrot.slane %v1509_v36, 4  ;;  %v1514_v50 = vrot.slane %v1512_v7, 5  ;;  %1994 = vrot.lane.b32.xlu1 %v2847_v51, %s4499_s29  ;;  %v1524_v12 = vrot.slane %v1522_v27, 4  ;;  %v946_v18 = vshrl.u32 %v3928_v11, 16 }
  0x92   : > { %v1520_v39 = vrot.slane %v1518_v54, 5  ;;  %v1684_v15 = vsel %vm3281_vm7, %v2791_v21, %v1683_v46  ;;  %v1685_v26 = vrot.slane %v1683_v46, 4  ;;  %v949_v38 = vshll.u32 %v3928_v11, 16  ;;  %v1022_v6 = vld [vmem:[#allocation2 + $0x3c] sm:$0xe] }
  0x93   : > { %v1515_v24 = vor.u32 %v1514_v50, %v1511_v35  ;;  %v948_v44 = vrot.slane %v946_v18, 4  ;;  %v955_v28 = vshll.u32 %v3930_v14, 16  ;;  %v959_v48 = vshrl.u32 %v3930_v14, 16  ;;  %v1116_v4 = vld [vmem:[#allocation2 + $0x3c] sm:$0xf] }
  0x94   : > { %v1525_v45 = vor.u32 %v1524_v12, %v1520_v39  ;;  %v1687_v17 = vsel %vm3281_vm7, %v1685_v26, %v1686_v9  ;;  %v951_v34 = vrot.slane %v949_v38, 5  ;;  %v967_v61 = vrot.slane %v965_v32, 5  ;;  %v1117_v29 = vld [vmem:[#allocation2 + $0x40] sm:$0xf]  ;;  %v1128_v21 = vld [vmem:[#allocation2 + $0x44] sm:$0x1] }
  0x95   : > { %v1516_v30 = vrot.slane %v1515_v24, 4  ;;  %v2863_v16 = vcombine.low %v1684_v15, %v1687_v17  ;;  %v957_v19 = vrot.slane %v955_v28, 5  ;;  %v961_v40 = vrot.slane %v959_v48, 4  ;;  %v1328_v46 = vld [vmem:[#allocation2 + $0x3c] sm:$0xe] }
  0x96   : > { %v1526_v42 = vrot.slane %v1525_v45, 4  ;;  %v952_v0 = vor.u32 %v951_v34, %v948_v44  ;;  %v2777_v37 = vrot.slane %v1022_v6, 9  ;;  %v1089_v55 = vrot.slane %v3930_v14, 5 }
  0x97   : > { %v1521_v59 = vsel %vm3479_vm10, %v1516_v30, %v1520_v39  ;;  %2074 = vrot.lane.b32.xlu0 %v2863_v16, %s4504_s12  ;;  %v962_v62 = vor.u32 %v961_v40, %v957_v19  ;;  %v1229_v31 = vshrl.u32 %v1116_v4, 16  ;;  %v1232_v47 = vshll.u32 %v1116_v4, 16 }
  0x98   : > { %v1531_v9 = vsel %vm3479_vm10, %v1526_v42, %v1530_v57  ;;  %v953_v32 = vrot.slane %v952_v0, 4  ;;  %v3949_v3 = vsel %vm3281_vm7, %v2777_v37, %v1089_v55  ;;  %v1091_v1 = vrot.slane %v1089_v55, 4 }
  0x99   : > { %v2855_v53 = vcombine.low %v1521_v59, %v1531_v9  ;;  %v963_v36 = vrot.slane %v962_v62, 4  ;;  %v1231_v7 = vrot.slane %v1229_v31, 4  ;;  %v1234_v27 = vrot.slane %v1232_v47, 5 }
  0x9a   : > { %v958_v51 = vsel %vm3479_vm10, %v953_v32, %v957_v19  ;;  %v1093_v54 = vsel %vm3281_vm7, %v1091_v1, %v1092_v2  ;;  %v1242_v57 = vshrl.u32 %v1117_v29, 16  ;;  %v766_v35 = vadd.f32 %v3742_v63, %v764_v58 }
  0x9b   : > { %2034 = vrot.lane.b32.xlu1 %v2855_v53, %s4503_s20  ;;  %v968_v50 = vsel %vm3479_vm10, %v963_v36, %v967_v61  ;;  %1820 = vrot.lane.b32.xlu0 %v2816_v49, %s4506_s17  ;;  %v2824_v33 = vcombine.low %v1116_v4, %v1117_v29  ;;  %v629_v12 = vshrl.u32 %v3914_v52, 16  ;;  %v632_v2 = vshll.u32 %v3914_v52, 16 }
  0x9c   : > { %v2817_v18 = vcombine.low %v3949_v3, %v1093_v54  ;;  %v1235_v39 = vor.u32 %v1234_v27, %v1231_v7  ;;  %v1238_v15 = vshll.u32 %v1117_v29, 16  ;;  %v1244_v63 = vrot.slane %v1242_v57, 4 }
  0x9d   : > { %v631_v58 = vrot.slane %v629_v12, 7  ;;  %v1248_v26 = vshll.u32 %v1128_v21, 16  ;;  %v2784_v13 = vrot.slane %v1328_v46, 9  ;;  %v1386_v23 = vrot.slane %v1117_v29, 5 }
  0x9e   : > { %v2809_v49 = vcombine.low %v958_v51, %v968_v50  ;;  %v1236_v38 = vrot.slane %v1235_v39, 4  ;;  %v1240_v24 = vrot.slane %v1238_v15, 5  ;;  %v677_v52 = vshrl.u32 %v3920_v60, 16 }
  0x9f   : > { %1780 = vrot.lane.b32.xlu1 %v3910_v25, %s4508_s18  ;;  %1868 = vrot.lane.b32.xlu0 %v2824_v33, %s4509_s11  ;;  %v634_v44 = vor.u32 %v632_v2, %v631_v58  ;;  %v1250_v28 = vrot.slane %v1248_v26, 5  ;;  %v638_v48 = vsel %vm3215_vm2, %v631_v58, 0  ;;  %v1389_v6 = vrot.slane %v1128_v21, 5 }
  0xa0   : > { %v1245_v45 = vor.u32 %v1244_v63, %v1240_v24  ;;  %v2741_v17 = vcombine.low %v638_v48, %v638_v48  ;;  %v1387_v34 = vsel %vm3281_vm7, %v2784_v13, %v1386_v23  ;;  %v1388_v61 = vrot.slane %v1386_v23, 4 }
  0xa1   : > { %v637_v4 = vsel %vm3215_vm2, 0, %v634_v44  ;;  %v679_v25 = vrot.slane %v677_v52, 7  ;;  %v680_v30 = vshll.u32 %v3920_v60, 16  ;;  %v723_v16 = vpack.c.bf16 %v3922_v20, %v3916_v5 }
  0xa2   : > { %v2739_v19 = vcombine.low %v637_v4, %v637_v4  ;;  %v2740_v40 = vcombine.high %v637_v4, %v637_v4  ;;  %v1241_v42 = vsel %vm3479_vm10, %v1236_v38, %v1240_v24  ;;  %v1246_v0 = vrot.slane %v1245_v45, 4  ;;  %653 = vst.msk [vmem:[#allocation2 + $0x50] sm:$0x1] %vm365_vm3, %v2741_v17 }
  0xa3   : > { %1782 = vrot.lane.b32.xlu1 %v2809_v49, %s4508_s18  ;;  %v1390_v37 = vsel %vm3281_vm7, %v1388_v61, %v1389_v6  ;;  %v682_v55 = vor.u32 %v680_v30, %v679_v25  ;;  %v686_v60 = vsel %vm3215_vm2, %v679_v25, 0  ;;  %v725_v59 = vshrl.u32 %v723_v16, 16 }
  0xa4   : > { %651 = vst.msk [vmem:[#allocation2 + $0x48] sm:$0xf] %vm362_vm4, %v2739_v19  ;;  %652 = vst.msk [vmem:[#allocation2 + $0x4c] sm:$0xf] %vm362_vm4, %v2740_v40  ;;  %v1251_v5 = vsel %vm3479_vm10, %v1246_v0, %v1250_v28  ;;  %v2751_v20 = vcombine.low %v686_v60, %v686_v60  ;;  %v768_v62 = vstv %s2768_s9  ;;  %v2840_v9 = vcombine.low %v1387_v34, %v1390_v37 }
  0xa5   : > { %v2832_v29 = vcombine.low %v1241_v42, %v1251_v5  ;;  %v685_v31 = vsel %vm3215_vm2, 0, %v682_v55  ;;  %v727_v47 = vrot.slane %v725_v59, 7  ;;  %v728_v1 = vshll.u32 %v723_v16, 16 }
  0xa6   : > { %v2749_v32 = vcombine.low %v685_v31, %v685_v31  ;;  %v2750_v3 = vcombine.high %v685_v31, %v685_v31  ;;  %701 = vst.msk [vmem:[#allocation2 + $0x5c] sm:$0x1] %vm365_vm3, %v2751_v20  ;;  %v769_v36 = vmul.f32 %v768_v62, %v3926_v56  ;;  %v770_v7 = vmul.f32 %v768_v62, %v766_v35  ;;  %v4022_v56 = vpop.permute.xlu0 %1860 }
  0xa7   : > { %1822 = vrot.lane.b32.xlu1 %v2817_v18, %s4506_s17  ;;  %1908 = vrot.lane.b32.xlu0 %v2832_v29, %s4500_s15  ;;  %v734_v53 = vsel %vm3215_vm2, %v727_v47, 0  ;;  %v2800_v57 = vcombine.low %v3764_v43, %v3772_v41  ;;  %v4025_v18 = vor.u32 %v728_v1, %v727_v47  ;;  %v2801_v15 = vcombine.low %v3928_v11, %v3930_v14 }
  0xa8   : > { %699 = vst.msk [vmem:[#allocation2 + $0x54] sm:$0xf] %vm362_vm4, %v2749_v32  ;;  %700 = vst.msk [vmem:[#allocation2 + $0x58] sm:$0xf] %vm362_vm4, %v2750_v3  ;;  %v2761_v27 = vcombine.low %v734_v53, %v734_v53  ;;  %v4027_v39 = vpack.c.bf16 %v770_v7, %v769_v36 }
  0xa9   : > { %v1129_v51 = vld [vmem:[#allocation2 + $0x50] sm:$0x1] }
  0xaa   : > { %v4015_v54 = vld [vmem:[#allocation2 + $0x50] sm:$0x1]  ;;  %v1272_v21 = vshll.u32 %v1129_v51, 16  ;;  %v1396_v46 = vrot.slane %v1129_v51, 5  ;;  %749 = vst.msk [vmem:[#allocation2 + $0x68] sm:$0x1] %vm365_vm3, %v2761_v27 }
  0xab   : > { %v1552_v50 = vshll.u32 %v4015_v54, 16  ;;  %v1693_v33 = vrot.slane %v4015_v54, 5  ;;  %v1118_v35 = vld [vmem:[#allocation2 + $0x48] sm:$0xf]  ;;  %v1119_v12 = vld [vmem:[#allocation2 + $0x4c] sm:$0xf]  ;;  %1948 = vrot.lane.b32.xlu0 %v2840_v9, %s3077_s13 }
  0xac   : > { %v1329_v2 = vld [vmem:[#allocation2 + $0x48] sm:$0xe]  ;;  %v1253_v63 = vshrl.u32 %v1118_v35, 16  ;;  %v1256_v58 = vshll.u32 %v1118_v35, 16  ;;  %v1266_v26 = vshrl.u32 %v1119_v12, 16  ;;  %v2825_v13 = vcombine.low %v1118_v35, %v1119_v12 }
  0xad   : > { %v1420_v23 = vld [vmem:[#allocation2 + $0x48] sm:$0xf]  ;;  %v1262_v49 = vshll.u32 %v1119_v12, 16  ;;  %v1274_v38 = vrot.slane %v1272_v21, 5  ;;  %v2785_v24 = vrot.slane %v1329_v2, 9  ;;  %v1393_v52 = vrot.slane %v1119_v12, 5 }
  0xae   : > { %v1421_v44 = vld [vmem:[#allocation2 + $0x4c] sm:$0xf]  ;;  %v1255_v28 = vrot.slane %v1253_v63, 4  ;;  %v1258_v48 = vrot.slane %v1256_v58, 5  ;;  %1870 = vrot.lane.b32.xlu1 %v2825_v13, %s4509_s11  ;;  %v1268_v6 = vrot.slane %v1266_v26, 4  ;;  %v1533_v45 = vshrl.u32 %v1420_v23, 16  ;;  %v4040_v0 = vpop.permute.xlu0 %1988 }
  0xaf   : > { %v1264_v17 = vrot.slane %v1262_v49, 5  ;;  %v4034_v34 = vsel %vm3281_vm7, %v2785_v24, %v1393_v52  ;;  %v1395_v61 = vrot.slane %v1393_v52, 4  ;;  %v1536_v4 = vshll.u32 %v1420_v23, 16  ;;  %v4036_v25 = vld [vmem:[#allocation2 + $0x54] sm:$0xf] }
  0xb0   : > { %v1259_v30 = vor.u32 %v1258_v48, %v1255_v28  ;;  %v1535_v16 = vrot.slane %v1533_v45, 4  ;;  %v1546_v19 = vshrl.u32 %v1421_v44, 16  ;;  %v2848_v40 = vcombine.low %v1420_v23, %v1421_v44  ;;  %v4038_v42 = vld [vmem:[#allocation2 + $0x58] sm:$0xf]  ;;  %v4051_v3 = vld [vmem:[#allocation2 + $0x5c] sm:$0x1] }
  0xb1   : > { %v1269_v37 = vor.u32 %v1268_v6, %v1264_v17  ;;  %v1397_v55 = vsel %vm3281_vm7, %v1395_v61, %v1396_v46  ;;  %v1538_v60 = vrot.slane %v1536_v4, 5  ;;  %v1557_v59 = vshrl.u32 %v4036_v25, 16  ;;  %v1632_v27 = vld [vmem:[#allocation2 + $0x48] sm:$0xe]  ;;  %v4066_v48 = vld [vmem:[#allocation2 + $0x4c] sm:$0xf] }
  0xb2   : > { %v1260_v5 = vrot.slane %v1259_v30, 4  ;;  %v2841_v20 = vcombine.low %v4034_v34, %v1397_v55  ;;  %1996 = vrot.lane.b32.xlu0 %v2848_v40, %s4499_s29  ;;  %v1560_v62 = vshll.u32 %v4036_v25, 16  ;;  %v1570_v29 = vshrl.u32 %v4038_v42, 16  ;;  %v4058_v12 = vld [vmem:[#allocation2 + $0x48] sm:$0xf] }
  0xb3   : > { %v1270_v31 = vrot.slane %v1269_v37, 4  ;;  %v1559_v47 = vrot.slane %v1557_v59, 4  ;;  %v2849_v9 = vcombine.low %v4036_v25, %v4038_v42  ;;  %v1539_v32 = vor.u32 %v1538_v60, %v1535_v16  ;;  %v4071_v4 = vld [vmem:[#allocation2 + $0x50] sm:$0x1]  ;;  %v4090_v54 = vld [vmem:[#allocation2 + $0x54] sm:$0xf] }
  0xb4   : > { %v1265_v1 = vsel %vm3479_vm10, %v1260_v5, %v1264_v17  ;;  %v1562_v53 = vrot.slane %v1560_v62, 5  ;;  %v1542_v36 = vshll.u32 %v1421_v44, 16  ;;  %v1548_v7 = vrot.slane %v1546_v19, 4  ;;  %v1633_v5 = vld [vmem:[#allocation2 + $0x54] sm:$0xe]  ;;  %v4084_v62 = vpop.permute.xlu1 %1862 }
  0xb5   : > { %v1275_v51 = vsel %vm3479_vm10, %v1270_v31, %v1274_v38  ;;  %v1540_v21 = vrot.slane %v1539_v32, 4  ;;  %v1554_v46 = vrot.slane %v1552_v50, 5  ;;  %v1566_v35 = vshll.u32 %v4038_v42, 16 }
  0xb6   : > { %v2833_v2 = vcombine.low %v1265_v1, %v1275_v51  ;;  %v1544_v63 = vrot.slane %v1542_v36, 5  ;;  %v1563_v58 = vor.u32 %v1562_v53, %v1559_v47  ;;  %v1572_v26 = vrot.slane %v1570_v29, 4  ;;  %v4060_v13 = vpop.permute.xlu0 %1864 }
  0xb7   : > { %v1568_v23 = vrot.slane %v1566_v35, 5  ;;  %v1576_v49 = vshll.u32 %v4051_v3, 16  ;;  %v2792_v24 = vrot.slane %v1632_v27, 9  ;;  %v1690_v52 = vrot.slane %v1421_v44, 5 }
  0xb8   : > { %1910 = vrot.lane.b32.xlu1 %v2833_v2, %s4500_s15  ;;  %v1545_v50 = vsel %vm3479_vm10, %v1540_v21, %v1544_v63  ;;  %v1549_v38 = vor.u32 %v1548_v7, %v1544_v63  ;;  %v1564_v28 = vrot.slane %v1563_v58, 4  ;;  %v970_v6 = vshrl.u32 %v4058_v12, 16  ;;  %v4094_v7 = vld [vmem:[#allocation2 + $0x58] sm:$0xf]  ;;  %v821_v63 = vld [vmem:[#allocation2 + $0x5c] sm:$0x1] }
  0xb9   : > { %v1573_v45 = vor.u32 %v1572_v26, %v1568_v23  ;;  %v1578_v17 = vrot.slane %v1576_v49, 5  ;;  %v1691_v34 = vsel %vm3281_vm7, %v2792_v24, %v1690_v52  ;;  %v1692_v61 = vrot.slane %v1690_v52, 4  ;;  %v1023_v52 = vld [vmem:[#allocation2 + $0x48] sm:$0xe] }
  0xba   : > { %v1550_v44 = vrot.slane %v1549_v38, 4  ;;  %v1569_v30 = vsel %vm3479_vm10, %v1564_v28, %v1568_v23  ;;  %v972_v16 = vrot.slane %v970_v6, 4  ;;  %v973_v19 = vshll.u32 %v4058_v12, 16  ;;  %v4076_v40 = vpop.permute.xlu0 %1940 }
  0xbb   : > { %v1574_v37 = vrot.slane %v1573_v45, 4  ;;  %v1694_v55 = vsel %vm3281_vm7, %v1692_v61, %v1693_v33  ;;  %v979_v60 = vshll.u32 %v4066_v48, 16  ;;  %v983_v59 = vshrl.u32 %v4066_v48, 16  ;;  %v4111_v45 = vpop.permute.xlu1 %1990 }
  0xbc   : > { %1950 = vrot.lane.b32.xlu1 %v2841_v20, %s3077_s13  ;;  %v1555_v29 = vsel %vm3479_vm10, %v1550_v44, %v1554_v46  ;;  %v2864_v31 = vcombine.low %v1691_v34, %v1694_v55  ;;  %v975_v47 = vrot.slane %v973_v19, 5  ;;  %v989_v32 = vshll.u32 %v4071_v4, 16  ;;  %v1024_v34 = vld [vmem:[#allocation2 + $0x54] sm:$0xe] }
  0xbd   : > { %v2856_v1 = vcombine.low %v1545_v50, %v1555_v29  ;;  %v1579_v33 = vsel %vm3479_vm10, %v1574_v37, %v1578_v17  ;;  %v981_v53 = vrot.slane %v979_v60, 5  ;;  %v985_v36 = vrot.slane %v983_v59, 4  ;;  %v1120_v59 = vld [vmem:[#allocation2 + $0x54] sm:$0xf] }
  0xbe   : > { %v2857_v27 = vcombine.low %v1569_v30, %v1579_v33  ;;  %v976_v51 = vor.u32 %v975_v47, %v972_v16  ;;  %v991_v20 = vrot.slane %v989_v32, 5  ;;  %v2793_v21 = vrot.slane %v1633_v5, 9  ;;  %v4107_v50 = vpop.permute.xlu0 %2068 }
  0xbf   : > { %2036 = vrot.lane.b32.xlu0 %v2856_v1, %s4503_s20  ;;  %v986_v46 = vor.u32 %v985_v36, %v981_v53  ;;  %v1697_v35 = vrot.slane %v4038_v42, 5  ;;  %v1700_v2 = vrot.slane %v4051_v3, 5  ;;  %v994_v58 = vshrl.u32 %v4090_v54, 16 }
  0xc0   : > { %1998 = vrot.lane.b32.xlu1 %v2849_v9, %s4499_s29  ;;  %v977_v26 = vrot.slane %v976_v51, 4  ;;  %v997_v23 = vshll.u32 %v4090_v54, 16  ;;  %v1003_v49 = vshll.u32 %v4094_v7, 16  ;;  %v1007_v24 = vshrl.u32 %v4094_v7, 16 }
  0xc1   : > { %v987_v38 = vrot.slane %v986_v46, 4  ;;  %v1698_v3 = vsel %vm3281_vm7, %v2793_v21, %v1697_v35  ;;  %v1699_v28 = vrot.slane %v1697_v35, 4  ;;  %v996_v6 = vrot.slane %v994_v58, 4  ;;  %v4129_v35 = vpop.permute.xlu1 %1866 }
  0xc2   : > { %v982_v25 = vsel %vm3479_vm10, %v977_v26, %v981_v53  ;;  %v999_v42 = vrot.slane %v997_v23, 5  ;;  %v1005_v9 = vrot.slane %v1003_v49, 5  ;;  %v1009_v17 = vrot.slane %v1007_v24, 4 }
  0xc3   : > { %2076 = vrot.lane.b32.xlu0 %v2864_v31, %s4504_s12  ;;  %v992_v61 = vsel %vm3479_vm10, %v987_v38, %v991_v20  ;;  %v1701_v44 = vsel %vm3281_vm7, %v1699_v28, %v1700_v2  ;;  %v1013_v30 = vshll.u32 %v821_v63, 16  ;;  %v2778_v16 = vrot.slane %v1023_v52, 9  ;;  %v1121_v20 = vld [vmem:[#allocation2 + $0x58] sm:$0xf]  ;;  %v1130_v52 = vld [vmem:[#allocation2 + $0x5c] sm:$0x1] }
  0xc4   : > { %2038 = vrot.lane.b32.xlu1 %v2857_v27, %s4503_s20  ;;  %v2810_v19 = vcombine.low %v982_v25, %v992_v61  ;;  %v2865_v37 = vcombine.low %v1698_v3, %v1701_v44  ;;  %v1000_v55 = vor.u32 %v999_v42, %v996_v6  ;;  %v1010_v60 = vor.u32 %v1009_v17, %v1005_v9  ;;  %v1330_v61 = vld [vmem:[#allocation2 + $0x54] sm:$0xe] }
  0xc5   : > { %v1015_v5 = vrot.slane %v1013_v30, 5  ;;  %v1096_v29 = vrot.slane %v4066_v48, 5  ;;  %v1099_v31 = vrot.slane %v4071_v4, 5  ;;  %v2779_v47 = vrot.slane %v1024_v34, 9 }
  0xc6   : > { %v1001_v32 = vrot.slane %v1000_v55, 4  ;;  %v1011_v1 = vrot.slane %v1010_v60, 4  ;;  %v1103_v33 = vrot.slane %v4094_v7, 5  ;;  %v1106_v53 = vrot.slane %v821_v63, 5  ;;  %v4124_v36 = vpop.permute.xlu0 %2070 }
  0xc7   : > { %2078 = vrot.lane.b32.xlu0 %v2865_v37, %s4504_s12  ;;  %v1097_v27 = vsel %vm3281_vm7, %v2778_v16, %v1096_v29  ;;  %v1098_v51 = vrot.slane %v1096_v29, 4  ;;  %v1277_v21 = vshrl.u32 %v1120_v59, 16  ;;  %v1280_v46 = vshll.u32 %v1120_v59, 16  ;;  %v4149_v37 = vld [vmem:[#allocation2 + $0x68] sm:$0x1] }
  0xc8   : > { %1784 = vrot.lane.b32.xlu1 %v2810_v19, %s4508_s18  ;;  %v1006_v4 = vsel %vm3479_vm10, %v1001_v32, %v1005_v9  ;;  %v1016_v2 = vsel %vm3479_vm10, %v1011_v1, %v1015_v5  ;;  %v1104_v63 = vsel %vm3281_vm7, %v2779_v47, %v1103_v33  ;;  %v1105_v58 = vrot.slane %v1103_v33, 4 }
  0xc9   : > { %v2811_v26 = vcombine.low %v1006_v4, %v1016_v2  ;;  %v1100_v23 = vsel %vm3281_vm7, %v1098_v51, %v1099_v31  ;;  %v1279_v49 = vrot.slane %v1277_v21, 4  ;;  %v1282_v24 = vrot.slane %v1280_v46, 5  ;;  %v3027_v51 = vld [vmem:[#allocation2 + $0x10] sm:$0xf]  ;;  %v3028_v21 = vld [vmem:[#allocation2 + $0xc] sm:$0xf] }
  0xca   : > { %v2818_v38 = vcombine.low %v1097_v27, %v1100_v23  ;;  %v1107_v3 = vsel %vm3281_vm7, %v1105_v58, %v1106_v53  ;;  %v1290_v28 = vshrl.u32 %v1121_v20, 16  ;;  %v2826_v6 = vcombine.low %v1120_v59, %v1121_v20  ;;  %v4142_v25 = vpop.permute.xlu0 %1816  ;;  %v4151_v59 = vpop.permute.xlu1 %1814  ;;  %v4159_v27 = vld [vmem:[#allocation2 + $0x68] sm:$0x1] }
  0xcb   : > { %v2819_v42 = vcombine.low %v1104_v63, %v1107_v3  ;;  %v733_v9 = vsel %vm3215_vm2, 0, %v4025_v18  ;;  %v1283_v17 = vor.u32 %v1282_v24, %v1279_v49  ;;  %v1286_v34 = vshll.u32 %v1121_v20, 16  ;;  %v4169_v49 = vld [vmem:[#allocation2 + $0x4] sm:$0xf]  ;;  %v4171_v24 = vld [vmem:[#allocation2] sm:$0xf] }
  0xcc   : > { %1786 = vrot.lane.b32.xlu1 %v2811_v26, %s4508_s18  ;;  %1824 = vrot.lane.b32.xlu0 %v2818_v38, %s4506_s17  ;;  %v2759_v44 = vcombine.low %v733_v9, %v733_v9  ;;  %v2760_v30 = vcombine.high %v733_v9, %v733_v9  ;;  %v1292_v16 = vrot.slane %v1290_v28, 4  ;;  %v1296_v19 = vshll.u32 %v1130_v52, 16 }
  0xcd   : > { %v1284_v55 = vrot.slane %v1283_v17, 4  ;;  %v1288_v60 = vrot.slane %v1286_v34, 5  ;;  %v2786_v18 = vrot.slane %v1330_v61, 9  ;;  %v1400_v5 = vrot.slane %v1121_v20, 5 }
  0xce   : > { %747 = vst.msk [vmem:[#allocation2 + $0x60] sm:$0xf] %vm362_vm4, %v2759_v44  ;;  %748 = vst.msk [vmem:[#allocation2 + $0x64] sm:$0xf] %vm362_vm4, %v2760_v30  ;;  %v1403_v29 = vrot.slane %v1130_v52, 5  ;;  %v1298_v47 = vrot.slane %v1296_v19, 5  ;;  %v1775_v33 = vpop.permute.xlu0 %1774  ;;  %v2797_v46 = vcombine.low %v3028_v21, %v3027_v51  ;;  %v2796_v52 = vcombine.low %v4171_v24, %v4169_v49 }
  0xcf   : > { %v1293_v31 = vor.u32 %v1292_v16, %v1288_v60  ;;  %v1320_v32 = vshll.u32 %v4149_v37, 16  ;;  %v773_v1 = vshrl.u32 %v4027_v39, 16  ;;  %v1402_v53 = vrot.slane %v1400_v5, 4 }
  0xd0   : > { %1826 = vrot.lane.b32.xlu1 %v2819_v42, %s4506_s17  ;;  %1872 = vrot.lane.b32.xlu0 %v2826_v6, %s4509_s11  ;;  %v1289_v20 = vsel %vm3479_vm10, %v1284_v55, %v1288_v60  ;;  %v776_v63 = vshll.u32 %v4027_v39, 16  ;;  %v1401_v58 = vsel %vm3281_vm7, %v2786_v18, %v1400_v5  ;;  %v1410_v23 = vrot.slane %v4149_v37, 5 }
  0xd1   : > { %v1294_v4 = vrot.slane %v1293_v31, 4  ;;  %v775_v2 = vrot.slane %v773_v1, 7  ;;  %v1404_v26 = vsel %vm3281_vm7, %v1402_v53, %v1403_v29  ;;  %v4177_v3 = vrot.slane %v1320_v32, 5 }
  0xd2   : > { %v1600_v39 = vshll.u32 %v4159_v27, 16  ;;  %v1707_v17 = vrot.slane %v4159_v27, 5  ;;  %v2090_v34 = vsel %vm2084_vm11, %v2797_v46, %v1775_v33  ;;  %v2842_v30 = vcombine.low %v1401_v58, %v1404_v26  ;;  %v4186_v37 = vpop.permute.xlu0 %1900 }
  0xd3   : > { %v1299_v38 = vsel %vm3479_vm10, %v1294_v4, %v1298_v47  ;;  %v782_v28 = vsel %vm3215_vm2, %v775_v2, 0  ;;  %v4182_v6 = vpop.permute.xlu1 %1812  ;;  %v778_v19 = vor.u32 %v776_v63, %v775_v2  ;;  %v2802_v55 = vcombine.low %v4058_v12, %v4066_v48 }
  0xd4   : > { %v2834_v42 = vcombine.low %v1289_v20, %v1299_v38  ;;  %v2771_v9 = vcombine.low %v782_v28, %v782_v28  ;;  %v2803_v60 = vcombine.low %v4090_v54, %v4094_v7  ;;  %v2113_v38 = vsel %vm2109_vm12, %v2090_v34, %v4151_v59  ;;  %v4356_v54 = vld [vmem:[%s4468_s3] ss:$0 sm:$0xff] }
  0xd5   : > { %v1122_v61 = vld [vmem:[#allocation2 + $0x60] sm:$0xf]  ;;  %v1123_v44 = vld [vmem:[#allocation2 + $0x64] sm:$0xf] }
  0xd6   : > { %v1331_v16 = vld [vmem:[#allocation2 + $0x60] sm:$0xe]  ;;  %v1301_v18 = vshrl.u32 %v1122_v61, 16  ;;  %v1304_v5 = vshll.u32 %v1122_v61, 16  ;;  %v1314_v29 = vshrl.u32 %v1123_v44, 16  ;;  %v2827_v31 = vcombine.low %v1122_v61, %v1123_v44  ;;  %1912 = vrot.lane.b32.xlu0 %v2834_v42, %s4500_s15 }
  0xd7   : > { %v1424_v47 = vld [vmem:[#allocation2 + $0x60] sm:$0xf]  ;;  %797 = vst.msk [vmem:[#allocation2 + $0x74] sm:$0x1] %vm365_vm3, %v2771_v9  ;;  %v1310_v32 = vshll.u32 %v1123_v44, 16  ;;  %v2787_v1 = vrot.slane %v1331_v16, 9  ;;  %v4194_v21 = vpop.permute.xlu1 %1942 }
  0xd8   : > { %v1407_v33 = vrot.slane %v1123_v44, 5  ;;  %v1425_v53 = vld [vmem:[#allocation2 + $0x64] sm:$0xf]  ;;  %v1581_v51 = vshrl.u32 %v1424_v47, 16  ;;  %v1303_v46 = vrot.slane %v1301_v18, 4  ;;  %v1306_v20 = vrot.slane %v1304_v5, 5  ;;  %1874 = vrot.lane.b32.xlu1 %v2827_v31, %s4509_s11 }
  0xd9   : > { %v1316_v4 = vrot.slane %v1314_v29, 4  ;;  %v1584_v2 = vshll.u32 %v1424_v47, 16  ;;  %v1312_v63 = vrot.slane %v1310_v32, 5  ;;  %v1594_v9 = vshrl.u32 %v1425_v53, 16  ;;  %v1634_v29 = vld [vmem:[#allocation2 + $0x60] sm:$0xe]  ;;  %v1773_v32 = vpop.permute.xlu0 %1772 }
  0xda   : > { %v1409_v58 = vrot.slane %v1407_v33, 4  ;;  %v1583_v26 = vrot.slane %v1581_v51, 4  ;;  %v1307_v28 = vor.u32 %v1306_v20, %v1303_v46  ;;  %1952 = vrot.lane.b32.xlu0 %v2842_v30, %s3077_s13  ;;  %v2850_v61 = vcombine.low %v1424_v47, %v1425_v53 }
  0xdb   : > { %v1586_v42 = vrot.slane %v1584_v2, 5  ;;  %v1317_v44 = vor.u32 %v1316_v4, %v1312_v63  ;;  %v1408_v16 = vsel %vm3281_vm7, %v2787_v1, %v1407_v33  ;;  %v781_v18 = vsel %vm3215_vm2, 0, %v778_v19  ;;  %v4204_v31 = vpop.permute.xlu1 %1818 }
  0xdc   : > { %v1590_v5 = vshll.u32 %v1425_v53, 16  ;;  %v1308_v51 = vrot.slane %v1307_v28, 4  ;;  %v1411_v59 = vsel %vm3281_vm7, %v1409_v58, %v1410_v23  ;;  %v2769_v34 = vcombine.low %v781_v18, %v781_v18  ;;  %v3024_v28 = vld [vmem:[%s4467_s2 + $0x20] ss:$0 sps:$4 sm:$0xff]  }
  0xdd   : > { %v2770_v30 = vcombine.high %v781_v18, %v781_v18  ;;  %v1318_v46 = vrot.slane %v1317_v44, 4  ;;  %v1587_v47 = vor.u32 %v1586_v42, %v1583_v26  ;;  %v1596_v4 = vrot.slane %v1594_v9, 4  ;;  %2954 = vmatprep.subr.msk.bf16.mxu0 %vm2287_vm1, %v3024_v28  ;;  %2955 = vmatprep.subr.msk.bf16.mxu1 %vm2287_vm1, %v3024_v28 }
  0xde   : > { %v1592_v20 = vrot.slane %v1590_v5, 5  ;;  %v1313_v1 = vsel %vm3479_vm10, %v1308_v51, %v1312_v63  ;;  %2000 = vrot.lane.b32.xlu0 %v2850_v61, %s4499_s29  ;;  %795 = vst.msk [vmem:[#allocation2 + $0x6c] sm:$0xf] %vm362_vm4, %v2769_v34  ;;  %v2794_v22 = vrot.slane %v1634_v29, 9  ;;  %v1704_v19 = vrot.slane %v1425_v53, 5 }
  0xdf   : > { %796 = vst.msk [vmem:[#allocation2 + $0x70] sm:$0xf] %vm362_vm4, %v2770_v30  ;;  %v2130_v23 = vsel %vm2126_vm13, %v2113_v38, %v4084_v62  ;;  %v1323_v33 = vsel %vm3479_vm10, %v1318_v46, %v4177_v3  ;;  %v1588_v2 = vrot.slane %v1587_v47, 4  ;;  %v1602_v63 = vrot.slane %v1600_v39, 5  ;;  %v1903_v26 = vpop.permute.xlu1 %1902  ;;  %v2029_v61 = vpop.permute.xlu0 %2028  ;;  %v4231_v44 = vld [vmem:[#allocation2 + $0x74] sm:$0x1] }
  0xe0   : > { %v1597_v58 = vor.u32 %v1596_v4, %v1592_v20  ;;  %v2835_v42 = vcombine.low %v1313_v1, %v1323_v33  ;;  %v2843_v9 = vcombine.low %v1408_v16, %v1411_v59  ;;  %v1706_v53 = vrot.slane %v1704_v19, 4 }
  0xe1   : > { %v1593_v62 = vsel %vm3479_vm10, %v1588_v2, %v1592_v20  ;;  %v2147_v3 = vsel %vm2143_vm14, %v2130_v23, %v1903_v26  ;;  %v2087_v39 = vsel %vm2084_vm11, %v2796_v52, %v1773_v32  ;;  %v1705_v16 = vsel %vm3281_vm7, %v2794_v22, %v1704_v19  ;;  %v3031_v26 = vld [vmem:[#allocation2 + $0x1c] sm:$0xf] }
  0xe2   : > { %v1598_v38 = vrot.slane %v1597_v58, 4  ;;  %1914 = vrot.lane.b32.xlu1 %v2835_v42, %s4500_s15  ;;  %v1708_v18 = vsel %vm3281_vm7, %v1706_v53, %v1707_v17  ;;  %v2111_v5 = vsel %vm2109_vm12, %v2087_v39, %v4182_v6  ;;  %vm2177_vm2 = vcmask 392192  }
  0xe3   : > { %v2128_v24 = vsel %vm2126_vm13, %v2111_v5, %v4022_v56  ;;  %v2164_v29 = vsel %vm2160_vm15, %v2147_v3, %v4194_v21  ;;  %v2289_v17 = vsel %vm2287_vm1, %v3024_v28, 0  ;;  %v1624_v51 = vshll.u32 %v4231_v44, 16  ;;  %v2031_v34 = vpop.permute.xlu1 %2030  ;;  %v3032_v28 = vld [vmem:[#allocation2 + $0x18] sm:$0xf] }
  0xe4   : > { %v1603_v49 = vsel %vm3479_vm10, %v1598_v38, %v1602_v63  ;;  %v2145_v27 = vsel %vm2143_vm14, %v2128_v24, %v4186_v37  ;;  %v2866_v59 = vcombine.low %v1705_v16, %v1708_v18  ;;  %vm2194_vm3 = vcmask 457728   ;;  %2927 = vmatpush3.bf16.msra.mxu0 %v2289_v17  ;;  %2953 = vmatpush3.bf16.msra.mxu1 %v2289_v17 }
  0xe5   : > { %v2858_v52 = vcombine.low %v1593_v62, %v1603_v49  ;;  %v1426_v32 = vld [vmem:[#allocation2 + $0x6c] sm:$0xf]  ;;  %v2162_v56 = vsel %vm2160_vm15, %v2145_v27, %v4076_v40  ;;  %v2181_v4 = vsel %vm2177_vm2, %v2164_v29, %v4111_v45  ;;  %v1626_v58 = vrot.slane %v1624_v51, 5 }
  0xe6   : > { %v1427_v6 = vld [vmem:[#allocation2 + $0x70] sm:$0xf]  ;;  %1954 = vrot.lane.b32.xlu1 %v2843_v9, %s3077_s13  ;;  %v1605_v21 = vshrl.u32 %v1426_v32, 16  ;;  %v1608_v30 = vshll.u32 %v1426_v32, 16  ;;  %v2179_v1 = vsel %vm2177_vm2, %v2162_v56, %v4040_v0  ;;  %v1635_v33 = vld [vmem:[#allocation2 + $0x6c] sm:$0xe]  ;;  %v2798_v42 = vcombine.low %v3032_v28, %v3031_v26 }
  0xe7   : > { %v1618_v46 = vshrl.u32 %v1427_v6, 16  ;;  %v2851_v37 = vcombine.low %v1426_v32, %v1427_v6  ;;  %2040 = vrot.lane.b32.xlu0 %v2858_v52, %s4503_s20  ;;  %v1614_v47 = vshll.u32 %v1427_v6, 16  ;;  %v1711_v20 = vrot.slane %v1427_v6, 5  ;;  %v1905_v22 = vpop.permute.xlu0 %1904  ;;  %v1777_v3 = vpop.permute.xlu1 %1776  ;;  %s2663_s13 = sshll.u32 %s4545_s28, 1  ;;  %s2666_s28 = sshll.u32 %s4521_s22, 1 }
  0xe8   : > { %v1607_v40 = vrot.slane %v1605_v21, 4  ;;  %v1610_v19 = vrot.slane %v1608_v30, 5  ;;  %v1714_v63 = vrot.slane %v4231_v44, 5  ;;  %v2198_v45 = vsel %vm2194_vm3, %v2181_v4, %v2031_v34  ;;  %v3033_v30 = vld [vmem:[#allocation2 + $0x28] sm:$0xf]  ;;  %s295_s17 = sadd.s32 %s2666_s28, %s4547_s21 }
  0xe9   : > { %v1620_v23 = vrot.slane %v1618_v46, 4  ;;  %v1616_v2 = vrot.slane %v1614_v47, 5  ;;  %v2196_v0 = vsel %vm2194_vm3, %v2179_v1, %v2029_v61  ;;  %vm2211_vm4 = vcmask 523264   ;;  %s2667_s10 = sshll.u32 %s295_s17, 1 }
  0xea   : > { %2002 = vrot.lane.b32.xlu1 %v2851_v37, %s4499_s29  ;;  %v1611_v9 = vor.u32 %v1610_v19, %v1607_v40  ;;  %v2795_v62 = vrot.slane %v1635_v33, 9  ;;  %v1713_v38 = vrot.slane %v1711_v20, 4  ;;  %v2213_v39 = vsel %vm2211_vm4, %v2196_v0, %v4107_v50  ;;  %s2664_s29 = sshll.u32 %s4521_s22, 5  ;;  %s297_s9 = scalar_lea.vmem %s4471_s6, %s2667_s10 }
  0xeb   : > { %2080 = vrot.lane.b32.xlu0 %v2866_v59, %s4504_s12  ;;  %v1621_v53 = vor.u32 %v1620_v23, %v1616_v2  ;;  %v1945_v44 = vpop.permute.xlu0 %1944  ;;  %2928 = vmatprep.mubr.msk.bf16.mxu0 %vm2270_vm5, %v2213_v39  ;;  %v2215_v5 = vsel %vm2211_vm4, %v2198_v45, %v4124_v36  ;;  %v2093_v49 = vsel %vm2084_vm11, %v2798_v42, %v1777_v3  ;;  %v1779_v8 = vpop.permute.xlu1 %1778  ;;  %s286_s15 = sadd.s32 %s2664_s29, %s2663_s13 }
  0xec   : > { %v1612_v16 = vrot.slane %v1611_v9, 4  ;;  %2929 = vmatmul.mubr.msk.bf16.vlgmr.msra.gmra.mrb[0].mxu0 %vm2270_vm5, %v2215_v5  ;;  %v1712_v50 = vsel %vm3281_vm7, %v2795_v62, %v1711_v20  ;;  %v1715_v52 = vsel %vm3281_vm7, %v1713_v38, %v1714_v63  ;;  %v2115_v36 = vsel %vm2109_vm12, %v2093_v49, %v4142_v25 }
  0xed   : > { %v1622_v18 = vrot.slane %v1621_v53, 4  ;;  %v2867_v17 = vcombine.low %v1712_v50, %v1715_v52  ;;  %v2132_v32 = vsel %vm2126_vm13, %v2115_v36, %v4060_v13  ;;  %v3034_v13 = vld [vmem:[#allocation2 + $0x24] sm:$0xf] }
  0xee   : > { %v1617_v61 = vsel %vm3479_vm10, %v1612_v16, %v1616_v2  ;;  %v2149_v51 = vsel %vm2143_vm14, %v2132_v32, %v1905_v22  ;;  %v2799_v46 = vcombine.low %v3034_v13, %v3033_v30 }
  0xef   : > { %v1627_v24 = vsel %vm3479_vm10, %v1622_v18, %v1626_v58  ;;  %v1993_v29 = vpop.permute.xlu0 %1992  ;;  %v2166_v10 = vsel %vm2160_vm15, %v2149_v51, %v1945_v44 }
  0xf0   : > { %v2859_v27 = vcombine.low %v1617_v61, %v1627_v24  ;;  %v2183_v59 = vsel %vm2177_vm2, %v2166_v10, %v1993_v29  ;;  %v2096_v47 = vsel %vm2084_vm11, %v2799_v46, %v1779_v8 }
  0xf1   : > { %v2117_v20 = vsel %vm2109_vm12, %v2096_v47, %v4204_v31 }
  0xf2   : > { %2042 = vrot.lane.b32.xlu1 %v2859_v27, %s4503_s20  ;;  %v1907_v21 = vpop.permute.xlu1 %1906  ;;  %v2134_v1 = vsel %vm2126_vm13, %v2117_v20, %v4129_v35  ;;  %s2665_s20 = sshll.u32 %s286_s15, 3 }
  0xf3   : > { %v2151_v22 = vsel %vm2143_vm14, %v2134_v1, %v1907_v21  ;;  %s4361_s8 = scalar_lea.vmem %s4470_s5, %s2665_s20 }
  0xf4   : > { %v2033_v6 = vpop.permute.xlu0 %2032 }
  0xf5   : > { %v2200_v34 = vsel %vm2194_vm3, %v2183_v59, %v2033_v6 }
  0xf6   : > { %2082 = vrot.lane.b32.xlu1 %v2867_v17, %s4504_s12  ;;  %v1947_v37 = vpop.permute.xlu1 %1946 }
  0xf7   : > { %v2168_v40 = vsel %vm2160_vm15, %v2151_v22, %v1947_v37 }
  0xf8   : > { %v2073_v56 = vpop.permute.xlu0 %2072 }
  0xf9   : > { %v2217_v25 = vsel %vm2211_vm4, %v2200_v34, %v2073_v56 }
  0xfa   : > { %2932 = vmatprep.mubr.msk.bf16.mxu0 %vm2270_vm5, %v2217_v25 }
 0x103   : > { %v1995_v4 = vpop.permute.xlu1 %1994 }
 0x104   : > { %v2185_v23 = vsel %vm2177_vm2, %v2168_v40, %v1995_v4 }
 0x109   : > { %v2075_v19 = vpop.permute.xlu0 %2074 }
 0x10d   : > { %v2035_v33 = vpop.permute.xlu1 %2034  ;;  %v1821_v31 = vpop.permute.xlu0 %1820 }
 0x10e   : > { %v2202_v2 = vsel %vm2194_vm3, %v2185_v23, %v2035_v33 }
 0x10f   : > { %v2219_v58 = vsel %vm2211_vm4, %v2202_v2, %v2075_v19 }
 0x110   : > { %2933 = vmatmul.mubr.msk.bf16.gmra.mrb[4].mxu0 %vm2270_vm5, %v2219_v58 }
 0x111   : > { %v1781_v63 = vpop.permute.xlu1 %1780  ;;  %v1869_v28 = vpop.permute.xlu0 %1868 }
 0x112   : > { %v2099_v38 = vsel %vm2084_vm11, %v2800_v57, %v1781_v63 }
 0x113   : > { %v2119_v3 = vsel %vm2109_vm12, %v2099_v38, %v1821_v31 }
 0x114   : > { %v2136_v39 = vsel %vm2126_vm13, %v2119_v3, %v1869_v28 }
 0x115   : > { %v1783_v26 = vpop.permute.xlu1 %1782 }
 0x116   : > { %v2102_v5 = vsel %vm2084_vm11, %v2801_v15, %v1783_v26 }
 0x119   : > { %v1823_v42 = vpop.permute.xlu1 %1822  ;;  %v1909_v35 = vpop.permute.xlu0 %1908 }
 0x11a   : > { %v2153_v16 = vsel %vm2143_vm14, %v2136_v39, %v1909_v35  ;;  %v2121_v49 = vsel %vm2109_vm12, %v2102_v5, %v1823_v42 }
 0x11d   : > { %v1949_v45 = vpop.permute.xlu0 %1948 }
 0x11e   : > { %v2170_v61 = vsel %vm2160_vm15, %v2153_v16, %v1949_v45 }
 0x120   : > { %v1871_v9 = vpop.permute.xlu1 %1870 }
 0x121   : > { %v2138_v41 = vsel %vm2126_vm13, %v2121_v49, %v1871_v9 }
 0x124   : > { %v1997_v53 = vpop.permute.xlu0 %1996 }
 0x125   : > { %v2187_v43 = vsel %vm2177_vm2, %v2170_v61, %v1997_v53 }
 0x12a   : > { %v1911_v0 = vpop.permute.xlu1 %1910 }
 0x12b   : > { %v2155_v50 = vsel %vm2143_vm14, %v2138_v41, %v1911_v0 }
 0x12e   : > { %v1951_v62 = vpop.permute.xlu1 %1950 }
 0x12f   : > { %v2172_v11 = vsel %vm2160_vm15, %v2155_v50, %v1951_v62 }
 0x131   : > { %v2037_v44 = vpop.permute.xlu0 %2036 }
 0x132   : > { %v1999_v18 = vpop.permute.xlu1 %1998  ;;  %v2204_v57 = vsel %vm2194_vm3, %v2187_v43, %v2037_v44 }
 0x133   : > { %v2189_v14 = vsel %vm2177_vm2, %v2172_v11, %v1999_v18 }
 0x135   : > { %v2077_v24 = vpop.permute.xlu0 %2076 }
 0x136   : > { %v2039_v52 = vpop.permute.xlu1 %2038  ;;  %v2221_v29 = vsel %vm2211_vm4, %v2204_v57, %v2077_v24 }
 0x137   : > { %2936 = vmatprep.mubr.msk.bf16.mxu1 %vm2270_vm5, %v2221_v29  ;;  %v2206_v15 = vsel %vm2194_vm3, %v2189_v14, %v2039_v52 }
 0x139   : > { %v2079_v27 = vpop.permute.xlu0 %2078 }
 0x13a   : > { %v2223_v36 = vsel %vm2211_vm4, %v2206_v15, %v2079_v27  ;;  %v1785_v17 = vpop.permute.xlu1 %1784 }
 0x13b   : > { %2937 = vmatmul.mubr.msk.bf16.vlgmr.msra.gmra.mrb[0].mxu1 %vm2270_vm5, %v2223_v36  ;;  %v2105_v21 = vsel %vm2084_vm11, %v2802_v55, %v1785_v17 }
 0x13e   : > { %v1825_v32 = vpop.permute.xlu0 %1824  ;;  %v1787_v6 = vpop.permute.xlu1 %1786 }
 0x13f   : > { %v2123_v30 = vsel %vm2109_vm12, %v2105_v21, %v1825_v32  ;;  %v2108_v55 = vsel %vm2084_vm11, %v2803_v60, %v1787_v6 }
 0x142   : > { %v1873_v8 = vpop.permute.xlu0 %1872  ;;  %v1827_v51 = vpop.permute.xlu1 %1826 }
 0x143   : > { %v2140_v13 = vsel %vm2126_vm13, %v2123_v30, %v1873_v8  ;;  %v2125_v40 = vsel %vm2109_vm12, %v2108_v55, %v1827_v51 }
 0x148   : > { %v1913_v10 = vpop.permute.xlu0 %1912 }
 0x149   : > { %v2157_v47 = vsel %vm2143_vm14, %v2140_v13, %v1913_v10 }
 0x14a   : > { %v1875_v34 = vpop.permute.xlu1 %1874 }
 0x14b   : > { %v2142_v19 = vsel %vm2126_vm13, %v2125_v40, %v1875_v34 }
 0x14c   : > { %v1953_v59 = vpop.permute.xlu0 %1952 }
 0x14d   : > { %v2174_v20 = vsel %vm2160_vm15, %v2157_v47, %v1953_v59 }
 0x150   : > { %v2001_v56 = vpop.permute.xlu0 %2000 }
 0x151   : > { %v2191_v4 = vsel %vm2177_vm2, %v2174_v20, %v2001_v56 }
 0x154   : > { %v1915_v25 = vpop.permute.xlu1 %1914 }
 0x155   : > { %v2159_v33 = vsel %vm2143_vm14, %v2142_v19, %v1915_v25 }
 0x158   : > { %v1955_v46 = vpop.permute.xlu1 %1954 }
 0x159   : > { %v2041_v37 = vpop.permute.xlu0 %2040  ;;  %v2176_v2 = vsel %vm2160_vm15, %v2159_v33, %v1955_v46 }
 0x15a   : > { %v2208_v1 = vsel %vm2194_vm3, %v2191_v4, %v2041_v37 }
 0x15c   : > { %v2003_v48 = vpop.permute.xlu1 %2002 }
 0x15d   : > { %v2081_v22 = vpop.permute.xlu0 %2080  ;;  %v2193_v58 = vsel %vm2177_vm2, %v2176_v2, %v2003_v48 }
 0x15e   : > { %v2225_v12 = vsel %vm2211_vm4, %v2208_v1, %v2081_v22 }
 0x15f   : > { %2940 = vmatprep.mubr.msk.bf16.mxu1 %vm2270_vm5, %v2225_v12 }
 0x164   : > { %v2043_v23 = vpop.permute.xlu1 %2042 }
 0x165   : > { %v2210_v63 = vsel %vm2194_vm3, %v2193_v58, %v2043_v23 }
 0x168   : > { %v2083_v31 = vpop.permute.xlu1 %2082 }
 0x169   : > { %v2227_v26 = vsel %vm2211_vm4, %v2210_v63, %v2083_v31 }
 0x16a   : > { %2941 = vmatmul.mubr.msk.bf16.gmra.mrb[4].mxu1 %vm2270_vm5, %v2227_v26 }
 0x1bf   : > { %v2930_v7 = vpop.f32.mrb[0].mxu0 }
 0x1c0   : > { %v2334_v60 = vadd.f32 %v2930_v7, %v4356_v54  ;;  %v2325_v28 = vpop.f32.mrb[1].mxu0 }
 0x1c1   : > { %v2326_v42 = vadd.f32 %v4356_v54, %v2325_v28  ;;  %v2931_v35 = vpop.f32.mrb[2].mxu0 }
 0x1c2   : > { %2390 = vst.msk [vmem:[%s4361_s8 + $0x10] sm:$0xff] %vm2084_vm11, %v2334_v60  ;;  %v2337_v9 = vadd.f32 %v2931_v35, %v4356_v54  ;;  %v2328_v45 = vpop.f32.mrb[3].mxu0  ;;  %v2443_v62 = vmul.f32 %v2334_v60, %v2334_v60  ;;  %v2407_v16 = vsel %vm2084_vm11, %v2334_v60, 0.0 }
 0x1c3   : > { %2388 = vst.msk [vmem:[%s4361_s8] sm:$0xff] %vm2084_vm11, %v2326_v42  ;;  %v2441_v0 = vmul.f32 %v2326_v42, %v2326_v42  ;;  %v2329_v53 = vadd.f32 %v4356_v54, %v2328_v45  ;;  %v2404_v38 = vsel %vm2084_vm11, %v2326_v42, 0.0 }
 0x1c4   : > { %2391 = vst.msk [vmem:[%s4361_s8 + $0x18] sm:$0xff] %vm2084_vm11, %v2337_v9  ;;  %v2444_v5 = vmul.f32 %v2337_v9, %v2337_v9  ;;  %v2460_v41 = vsel %vm2084_vm11, %v2443_v62, 0.0  ;;  %v2409_v57 = vsel %vm2084_vm11, %v2337_v9, 0.0 }
 0x1c5   : > { %2389 = vst.msk [vmem:[%s4361_s8 + $0x8] sm:$0xff] %vm2084_vm11, %v2329_v53  ;;  %v2405_v3 = vsel %vm2084_vm11, %v2329_v53, 0.0  ;;  %v2442_v39 = vmul.f32 %v2329_v53, %v2329_v53  ;;  %v2457_v18 = vsel %vm2084_vm11, %v2441_v0, 0.0 }
 0x1c6   : > { %v2406_v44 = vadd.f32 %v2405_v3, %v2404_v38  ;;  %v2462_v52 = vsel %vm2084_vm11, %v2444_v5, 0.0 }
 0x1c7   : > { %v2458_v61 = vsel %vm2084_vm11, %v2442_v39, 0.0 }
 0x1c8   : > { %v2408_v49 = vadd.f32 %v2407_v16, %v2406_v44  ;;  %v2459_v43 = vadd.f32 %v2458_v61, %v2457_v18 }
 0x1ca   : > { %v2461_v24 = vadd.f32 %v2460_v41, %v2459_v43  ;;  %v2410_v50 = vadd.f32 %v2409_v57, %v2408_v49 }
 0x1cc   : > { %v2463_v29 = vadd.f32 %v2462_v52, %v2461_v24 }
 0x1e3   : > { %v2934_v11 = vpop.f32.mrb[4].mxu0 }
 0x1e4   : > { %v2350_v14 = vadd.f32 %v2934_v11, %v4356_v54  ;;  %v2341_v15 = vpop.f32.mrb[5].mxu0 }
 0x1e5   : > { %v2342_v27 = vadd.f32 %v4356_v54, %v2341_v15  ;;  %v2935_v36 = vpop.f32.mrb[6].mxu0 }
 0x1e6   : > { %2394 = vst.msk [vmem:[%s4361_s8 + $0x30] sm:$0xff] %vm2084_vm11, %v2350_v14  ;;  %v2353_v17 = vadd.f32 %v2935_v36, %v4356_v54  ;;  %v2344_v32 = vpop.f32.mrb[7].mxu0  ;;  %v2447_v59 = vmul.f32 %v2350_v14, %v2350_v14  ;;  %v2415_v13 = vsel %vm2084_vm11, %v2350_v14, 0.0 }
 0x1e7   : > { %2392 = vst.msk [vmem:[%s4361_s8 + $0x20] sm:$0xff] %vm2084_vm11, %v2342_v27  ;;  %v2411_v6 = vsel %vm2084_vm11, %v2342_v27, 0.0  ;;  %v2445_v8 = vmul.f32 %v2342_v27, %v2342_v27  ;;  %v2345_v51 = vadd.f32 %v4356_v54, %v2344_v32 }
 0x1e8   : > { %v2412_v10 = vadd.f32 %v2411_v6, %v2410_v50  ;;  %2395 = vst.msk [vmem:[%s4361_s8 + $0x38] sm:$0xff] %vm2084_vm11, %v2353_v17  ;;  %v2448_v46 = vmul.f32 %v2353_v17, %v2353_v17  ;;  %v2468_v4 = vsel %vm2084_vm11, %v2447_v59, 0.0  ;;  %v2417_v1 = vsel %vm2084_vm11, %v2353_v17, 0.0 }
 0x1e9   : > { %v2464_v34 = vsel %vm2084_vm11, %v2445_v8, 0.0  ;;  %2393 = vst.msk [vmem:[%s4361_s8 + $0x28] sm:$0xff] %vm2084_vm11, %v2345_v51  ;;  %v2413_v56 = vsel %vm2084_vm11, %v2345_v51, 0.0  ;;  %v2446_v25 = vmul.f32 %v2345_v51, %v2345_v51 }
 0x1ea   : > { %v2465_v21 = vadd.f32 %v2464_v34, %v2463_v29  ;;  %v2414_v30 = vadd.f32 %v2413_v56, %v2412_v10  ;;  %v2470_v48 = vsel %vm2084_vm11, %v2448_v46, 0.0 }
 0x1eb   : > { %v2466_v37 = vsel %vm2084_vm11, %v2446_v25, 0.0 }
 0x1ec   : > { %v2416_v47 = vadd.f32 %v2415_v13, %v2414_v30  ;;  %v2467_v20 = vadd.f32 %v2466_v37, %v2465_v21 }
 0x1ee   : > { %v2469_v22 = vadd.f32 %v2468_v4, %v2467_v20  ;;  %v2418_v12 = vadd.f32 %v2417_v1, %v2416_v47 }
 0x1f0   : > { %v2471_v55 = vadd.f32 %v2470_v48, %v2469_v22 }
 0x20e   : > { %v2938_v40 = vpop.f32.mrb[0].mxu1 }
 0x20f   : > { %v2366_v19 = vadd.f32 %v2938_v40, %v4356_v54  ;;  %v2357_v23 = vpop.f32.mrb[1].mxu1 }
 0x210   : > { %v2358_v33 = vadd.f32 %v4356_v54, %v2357_v23  ;;  %v2939_v2 = vpop.f32.mrb[2].mxu1 }
 0x211   : > { %2398 = vst.msk [vmem:[%s4361_s8 + $0x50] sm:$0xff] %vm2084_vm11, %v2366_v19  ;;  %v2369_v58 = vadd.f32 %v2939_v2, %v4356_v54  ;;  %v2360_v63 = vpop.f32.mrb[3].mxu1  ;;  %v2451_v28 = vmul.f32 %v2366_v19, %v2366_v19  ;;  %v2423_v53 = vsel %vm2084_vm11, %v2366_v19, 0.0 }
 0x212   : > { %2396 = vst.msk [vmem:[%s4361_s8 + $0x40] sm:$0xff] %vm2084_vm11, %v2358_v33  ;;  %v2419_v31 = vsel %vm2084_vm11, %v2358_v33, 0.0  ;;  %v2449_v26 = vmul.f32 %v2358_v33, %v2358_v33  ;;  %v2361_v7 = vadd.f32 %v4356_v54, %v2360_v63 }
 0x213   : > { %v2420_v60 = vadd.f32 %v2419_v31, %v2418_v12  ;;  %2399 = vst.msk [vmem:[%s4361_s8 + $0x58] sm:$0xff] %vm2084_vm11, %v2369_v58  ;;  %v2452_v62 = vmul.f32 %v2369_v58, %v2369_v58  ;;  %v2476_v44 = vsel %vm2084_vm11, %v2451_v28, 0.0  ;;  %v2425_v16 = vsel %vm2084_vm11, %v2369_v58, 0.0 }
 0x214   : > { %v2472_v42 = vsel %vm2084_vm11, %v2449_v26, 0.0  ;;  %2397 = vst.msk [vmem:[%s4361_s8 + $0x48] sm:$0xff] %vm2084_vm11, %v2361_v7  ;;  %v2421_v35 = vsel %vm2084_vm11, %v2361_v7, 0.0  ;;  %v2450_v9 = vmul.f32 %v2361_v7, %v2361_v7 }
 0x215   : > { %v2473_v45 = vadd.f32 %v2472_v42, %v2471_v55  ;;  %v2422_v0 = vadd.f32 %v2421_v35, %v2420_v60  ;;  %v2478_v61 = vsel %vm2084_vm11, %v2452_v62, 0.0 }
 0x216   : > { %v2474_v38 = vsel %vm2084_vm11, %v2450_v9, 0.0 }
 0x217   : > { %v2424_v3 = vadd.f32 %v2423_v53, %v2422_v0  ;;  %v2475_v39 = vadd.f32 %v2474_v38, %v2473_v45 }
 0x219   : > { %v2477_v18 = vadd.f32 %v2476_v44, %v2475_v39  ;;  %v2426_v5 = vadd.f32 %v2425_v16, %v2424_v3 }
 0x21b   : > { %v2479_v49 = vadd.f32 %v2478_v61, %v2477_v18 }
 0x23d   : > { %v2942_v43 = vpop.f32.mrb[4].mxu1 }
 0x23e   : > { %v2382_v41 = vadd.f32 %v2942_v43, %v4356_v54  ;;  %v2373_v57 = vpop.f32.mrb[5].mxu1 }
 0x23f   : > { %v2374_v24 = vadd.f32 %v4356_v54, %v2373_v57  ;;  %v2943_v50 = vpop.f32.mrb[6].mxu1 }
 0x240   : > { %2402 = vst.msk [vmem:[%s4361_s8 + $0x70] sm:$0xff] %vm2084_vm11, %v2382_v41  ;;  %v2385_v52 = vadd.f32 %v2943_v50, %v4356_v54  ;;  %v2376_v29 = vpop.f32.mrb[7].mxu1  ;;  %v2455_v36 = vmul.f32 %v2382_v41, %v2382_v41  ;;  %v2431_v10 = vsel %vm2084_vm11, %v2382_v41, 0.0 }
 0x241   : > { %2400 = vst.msk [vmem:[%s4361_s8 + $0x60] sm:$0xff] %vm2084_vm11, %v2374_v24  ;;  %v2427_v11 = vsel %vm2084_vm11, %v2374_v24, 0.0  ;;  %v2453_v14 = vmul.f32 %v2374_v24, %v2374_v24  ;;  %v2377_v15 = vadd.f32 %v4356_v54, %v2376_v29 }
 0x242   : > { %v2428_v27 = vadd.f32 %v2427_v11, %v2426_v5  ;;  %2403 = vst.msk [vmem:[%s4361_s8 + $0x78] sm:$0xff] %vm2084_vm11, %v2385_v52  ;;  %v2456_v59 = vmul.f32 %v2385_v52, %v2385_v52  ;;  %v2484_v25 = vsel %vm2084_vm11, %v2455_v36, 0.0  ;;  %v2433_v21 = vsel %vm2084_vm11, %v2385_v52, 0.0 }
 0x243   : > { %v2480_v17 = vsel %vm2084_vm11, %v2453_v14, 0.0  ;;  %2401 = vst.msk [vmem:[%s4361_s8 + $0x68] sm:$0xff] %vm2084_vm11, %v2377_v15  ;;  %v2429_v32 = vsel %vm2084_vm11, %v2377_v15, 0.0  ;;  %v2454_v6 = vmul.f32 %v2377_v15, %v2377_v15 }
 0x244   : > { %v2481_v8 = vadd.f32 %v2480_v17, %v2479_v49  ;;  %v2430_v51 = vadd.f32 %v2429_v32, %v2428_v27  ;;  %v2486_v46 = vsel %vm2084_vm11, %v2456_v59, 0.0 }
 0x245   : > { %v2482_v54 = vsel %vm2084_vm11, %v2454_v6, 0.0 }
 0x246   : > { %v2432_v34 = vadd.f32 %v2431_v10, %v2430_v51  ;;  %v2483_v56 = vadd.f32 %v2482_v54, %v2481_v8 }
 0x248   : > { %v2434_v30 = vadd.f32 %v2433_v21, %v2432_v34  ;;  %v2485_v13 = vadd.f32 %v2484_v25, %v2483_v56 }
 0x24a   : > { %v2435_v37 = vrot.slane %v2434_v30, 4  ;;  %v2487_v47 = vadd.f32 %v2486_v46, %v2485_v13 }
 0x24c   : > { %v2436_v20 = vadd.f32 %v2435_v37, %v2434_v30  ;;  %v2488_v4 = vrot.slane %v2487_v47, 4 }
 0x24e   : > { %v2437_v1 = vrot.slane %v2436_v20, 2  ;;  %v2489_v22 = vadd.f32 %v2488_v4, %v2487_v47 }
 0x250   : > { %v2438_v12 = vadd.f32 %v2437_v1, %v2436_v20  ;;  %v2490_v48 = vrot.slane %v2489_v22, 2 }
 0x252   : > { %v2439_v55 = vrot.slane %v2438_v12, 1  ;;  %v2491_v40 = vadd.f32 %v2490_v48, %v2489_v22 }
 0x254   : > { %v2492_v19 = vrot.slane %v2491_v40, 1  ;;  %v2440_v23 = vadd.f32 %v2439_v55, %v2438_v12 }
 0x256   : > { %v2493_v33 = vadd.f32 %v2492_v19, %v2491_v40 }
 0x258   : > { %v2495_v2 = vsel %vm346_vm0, %v2440_v23, %v2493_v33 }
 0x259   : > { %2497 = vst.msk [vmem:[%s297_s9] sm:$0x3] %vm2496_vm6, %v2495_v2 }
 0x25a PF: > { %s17_s25 = sadd.s32 1, %s3073_s25   ;;  %s4510_s21 = smov %s3065_s23 }
 0x25b   : > { %p14_p3 = scmp.ge.s32.totalorder %s17_s25, 6   ;;  %s4511_s22 = smov %s3069_s24 }
 0x25c   : > { %s4512_s23 = smov %s4515_s26  ;;  %s4513_s24 = smov %s4519_s27 }
 0x25d   :  { %16 = sbr.rel (!%p14_p3) target bundleno = 3 (0x3), region = 101 }

</bundles_post_ra>
